<compile_context>
chip_gen: v7x
topology: tpu7x:2x2x1
jax: 0.10.0
libtpu: 0.0.40
codegen_flags: <defaults>
</compile_context>

<pallas_src>
import functools

import jax
import jax.numpy as jnp
from jax.experimental import pallas as pl
from jax.experimental.pallas import tpu as pltpu


# ----------------------------- 1x1 conv kernel -------------------------------

def _conv1x1_kernel(x_ref, w_ref, b_ref, o_ref):
    # x_ref: (1, H, W, Cin) f32; w_ref: (Cin, Cout) bf16; b_ref: (1, Cout) f32.
    _, H, W, cin = x_ref.shape
    cout = o_ref.shape[3]
    x = x_ref[0].reshape(H * W, cin).astype(jnp.bfloat16)
    y = jnp.dot(x, w_ref[...], preferred_element_type=jnp.float32) + b_ref[...]
    o_ref[0] = y.reshape(H, W, cout)


def conv1x1(x, w, b):
    """x: (N, H, W, Cin) f32; w: (Cin, Cout); b: (Cout,). Runs at the low resolution."""
    N, H, W, cin = x.shape
    cout = w.shape[1]
    return pl.pallas_call(
        _conv1x1_kernel,
        out_shape=jax.ShapeDtypeStruct((N, H, W, cout), jnp.float32),
        grid=(N,),
        in_specs=[
            pl.BlockSpec((1, H, W, cin), lambda n: (n, 0, 0, 0)),
            pl.BlockSpec((cin, cout), lambda n: (0, 0)),
            pl.BlockSpec((1, cout), lambda n: (0, 0)),
        ],
        out_specs=pl.BlockSpec((1, H, W, cout), lambda n: (n, 0, 0, 0)),
        compiler_params=pltpu.CompilerParams(dimension_semantics=("parallel",)),
    )(x, w.astype(jnp.bfloat16), b.reshape(1, cout).astype(jnp.float32))


# ------------------- fused 3x3 conv (+concat, +BN/ReLU prologue) -------------

def _make_dconv_kernel(n_in, with_prologue, TH, W, cin_list, cout, n_h):
    """Builds a kernel computing a 3x3 same-padded conv on an H-tile.

    Ref order: per input j: (main, top_halo, bot_halo); then [scale, shift] if
    with_prologue; then one flattened (9*Cin_j, Cout) bf16 weight per input; then bias;
    outputs: y tile (1, TH, W, Cout) and per-tile BN stats (1, 1, 2, Cout)=(sum, sumsq).
    """

    def kernel(*refs):
        idx = 0
        inputs = []
        for _ in range(n_in):
            inputs.append((refs[idx], refs[idx + 1], refs[idx + 2]))
            idx += 3
        if with_prologue:
            scale_ref, shift_ref = refs[idx], refs[idx + 1]
            idx += 2
        w_refs = refs[idx:idx + n_in]
        idx += n_in
        b_ref = refs[idx]
        idx += 1
        o_ref, stats_ref = refs[idx], refs[idx + 1]

        i = pl.program_id(1)
        is_first = i == 0                 # top halo row is outside the image
        is_last = i == (n_h - 1)          # bottom halo row is outside the image

        acc = None
        for j in range(n_in):
            main_ref, top_ref, bot_ref = inputs[j]
            c = cin_list[j]
            top = top_ref[0]              # (1,  W, c)
            mid = main_ref[0]             # (TH, W, c)
            bot = bot_ref[0]              # (1,  W, c)

            if with_prologue:
                # BatchNorm(scale, shift) + ReLU of the previous conv, fused here (f32).
                s = scale_ref[...]
                t = shift_ref[...]
                top = jnp.maximum(top * s + t, 0.0)
                mid = jnp.maximum(mid * s + t, 0.0)
                bot = jnp.maximum(bot * s + t, 0.0)

            # Conv zero-padding: halo rows that fall outside the image become zeros
            # (after the prologue, so the zero-pad semantics match PyTorch exactly).
            top = jnp.where(is_first, 0.0, top)
            bot = jnp.where(is_last, 0.0, bot)
            rows = jnp.concatenate([top, mid, bot], axis=0)          # (TH+2, W, c)

            # Zero-pad W in VMEM (no host-side jnp.pad round trip).
            zcol = jnp.zeros((TH + 2, 1, c), rows.dtype)
            xw = jnp.concatenate([zcol, rows, zcol], axis=1)          # (TH+2, W+2, c)

            # im2col: one MXU dot with K = 9*Cin instead of 9 dots with K = Cin.
            cols = [xw[kh:kh + TH, kw:kw + W, :].reshape(TH * W, c)
                    for kh in range(3) for kw in range(3)]
            patch = jnp.concatenate(cols, axis=-1).astype(jnp.bfloat16)   # (TH*W, 9c)
            d = jnp.dot(patch, w_refs[j][...], preferred_element_type=jnp.float32)
            acc = d if acc is None else acc + d

        y = acc + b_ref[...]                                          # (TH*W, Cout) f32

        # Per-tile BN partials (f32), finalized outside with a tiny reduce.
        s_sum = jnp.sum(y, axis=0, keepdims=True)                     # (1, Cout)
        s_sq = jnp.sum(y * y, axis=0, keepdims=True)                  # (1, Cout)
        stats_ref[0, 0] = jnp.concatenate([s_sum, s_sq], axis=0)      # (2, Cout)

        # TODO(synk): store as a lane-dense (TH, W*Cout) slab once the
        # (TH*W,Cout)->(TH,W*Cout) Mosaic reshape is verified on all targets.
        o_ref[0] = y.reshape(TH, W, cout)

    return kernel


def _main_map():
    return lambda n, i: (n, i, 0, 0)


def _top_halo_map(TH):
    return lambda n, i: (n, jnp.maximum(i * TH - 1, 0), 0, 0)


def _bot_halo_map(TH, H):
    return lambda n, i: (n, jnp.minimum(i * TH + TH, H - 1), 0, 0)


def dconv3x3(inputs, weight, bias, scale_shift=None):
    """3x3 same-padded conv over the channel-concat of `inputs` (concat fused in-kernel).

    inputs:      list of NHWC f32 arrays sharing (N, H, W).
    weight:      (3, 3, sum(Cin), Cout) f32; bias: (Cout,) f32.
    scale_shift: optional (scale, shift) per-channel f32 arrays; if given, the kernel
                 applies relu(x*scale + shift) to the (single) input before the conv.
    Returns (y, stats): y (N, H, W, Cout) f32 pre-BN conv output;
                        stats (N, n_h, 2, Cout) per-tile (sum, sumsq).
    """
    N, H, W, _ = inputs[0].shape
    cin_list = [int(x.shape[3]) for x in inputs]
    cout = int(weight.shape[3])
    with_prologue = scale_shift is not None
    assert not (with_prologue and len(inputs) != 1)

    TH = 8 if H % 8 == 0 else H           # H-tile; sized to fit 2-input x 2-buffer VMEM
    n_h = H // TH                         # budgets even on v7x (64 MiB) at real UNet sizes

    # Split weight along Cin per fused input, flatten taps into K, cast to bf16 operands.
    w_slices, off = [], 0
    for c in cin_list:
        w_slices.append(weight[:, :, off:off + c, :]
                        .reshape(9 * c, cout).astype(jnp.bfloat16))
        off += c

    args, in_specs = [], []
    for x, c in zip(inputs, cin_list):
        args += [x, x, x]
        in_specs += [
            pl.BlockSpec((1, TH, W, c), _main_map()),
            pl.BlockSpec((1, 1, W, c), _top_halo_map(TH)),
            pl.BlockSpec((1, 1, W, c), _bot_halo_map(TH, H)),
        ]
    if with_prologue:
        scale, shift = scale_shift
        c0 = cin_list[0]
        args += [scale.reshape(1, 1, c0).astype(jnp.float32),
                 shift.reshape(1, 1, c0).astype(jnp.float32)]
        in_specs += [pl.BlockSpec((1, 1, c0), lambda n, i: (0, 0, 0)),
                     pl.BlockSpec((1, 1, c0), lambda n, i: (0, 0, 0))]
    for ws in w_slices:
        args.append(ws)
        in_specs.append(pl.BlockSpec(ws.shape, lambda n, i: (0, 0)))
    args.append(bias.reshape(1, cout).astype(jnp.float32))
    in_specs.append(pl.BlockSpec((1, cout), lambda n, i: (0, 0)))

    kernel = _make_dconv_kernel(len(inputs), with_prologue, TH, W, cin_list, cout, n_h)

    y, stats = pl.pallas_call(
        kernel,
        out_shape=(jax.ShapeDtypeStruct((N, H, W, cout), jnp.float32),
                   jax.ShapeDtypeStruct((N, n_h, 2, cout), jnp.float32)),
        grid=(N, n_h),
        in_specs=in_specs,
        out_specs=(pl.BlockSpec((1, TH, W, cout), lambda n, i: (n, i, 0, 0)),
                   pl.BlockSpec((1, 1, 2, cout), lambda n, i: (n, i, 0, 0))),
        compiler_params=pltpu.CompilerParams(
            dimension_semantics=("parallel", "parallel")),
    )(*args)
    return y, stats


# ------------------------------- JAX glue ------------------------------------

def bilinear_upsample_x2(x):
    """2-tap gather + lerp bilinear upsample, scale 2, align_corners=True. NHWC."""
    N, H, W, C = x.shape

    def taps(n_in):
        n_out = 2 * n_in
        if n_in == 1:
            return jnp.zeros((n_out,), jnp.int32), jnp.zeros((n_out,), jnp.float32)
        src = jnp.arange(n_out, dtype=jnp.float32) * (n_in - 1) / (n_out - 1)
        lo = jnp.clip(jnp.floor(src).astype(jnp.int32), 0, n_in - 2)
        return lo, src - lo.astype(jnp.float32)

    lo_h, fh = taps(H)
    lo_w, fw = taps(W)
    xh = (jnp.take(x, lo_h, axis=1) * (1.0 - fh)[None, :, None, None]
          + jnp.take(x, lo_h + 1, axis=1) * fh[None, :, None, None])
    xw = (jnp.take(xh, lo_w, axis=2) * (1.0 - fw)[None, None, :, None]
          + jnp.take(xh, lo_w + 1, axis=2) * fw[None, None, :, None])
    return xw


def _bn_scale_shift(stats, count, gamma, beta, eps=1e-5):
    """Finalize train-mode BatchNorm (biased var) from per-tile (sum, sumsq) partials."""
    s = jnp.sum(stats[:, :, 0, :], axis=(0, 1))
    q = jnp.sum(stats[:, :, 1, :], axis=(0, 1))
    mean = s / count
    var = jnp.maximum(q / count - mean * mean, 0.0)
    scale = gamma * jax.lax.rsqrt(var + eps)
    shift = beta - mean * scale
    return scale, shift


# ------------------------------- Up module -----------------------------------

def init_up_params(key, in_channels_1, in_channels_2, out_channels):
    c_half = in_channels_1 // 2
    c_cat = c_half + in_channels_2
    ks = jax.random.split(key, 6)
    s = 0.1
    return {
        # up: 1x1 conv C1 -> C1//2   (stored as (Cin, Cout))
        "up_w": jax.random.normal(ks[0], (in_channels_1, c_half), jnp.float32) * s,
        "up_b": jax.random.normal(ks[1], (c_half,), jnp.float32) * s,
        # DoubleConv conv1: 3x3, c_cat -> out   (stored as (3, 3, Cin, Cout))
        "c1_w": jax.random.normal(ks[2], (3, 3, c_cat, out_channels), jnp.float32) * s,
        "c1_b": jax.random.normal(ks[3], (out_channels,), jnp.float32) * s,
        "bn1_g": jnp.ones((out_channels,), jnp.float32),
        "bn1_b": jnp.zeros((out_channels,), jnp.float32),
        # DoubleConv conv2: 3x3, out -> out
        "c2_w": jax.random.normal(ks[4], (3, 3, out_channels, out_channels), jnp.float32) * s,
        "c2_b": jax.random.normal(ks[5], (out_channels,), jnp.float32) * s,
        "bn2_g": jnp.ones((out_channels,), jnp.float32),
        "bn2_b": jnp.zeros((out_channels,), jnp.float32),
    }


@functools.partial(jax.jit, static_argnames=("in_channels_2",))
def up_forward(x1_nchw, x2_nchw, params, in_channels_2):
    # NCHW -> NHWC
    x1 = jnp.transpose(x1_nchw, (0, 2, 3, 1)).astype(jnp.float32)
    x2 = jnp.transpose(x2_nchw, (0, 2, 3, 1)).astype(jnp.float32)

    # self.up: Upsample(bilinear, align_corners=True) then Conv2d 1x1.  The 1x1 conv is
    # per-pixel linear and the bilinear taps sum to 1, so conv(up(x)) == up(conv(x));
    # running the conv at low resolution is 4x cheaper and halves the upsampled channels.
    x1 = conv1x1(x1, params["up_w"], params["up_b"])
    x1 = bilinear_upsample_x2(x1)

    # F.pad x1 to match x2's spatial size (zero pad, same split as PyTorch).
    diffY = x2.shape[1] - x1.shape[1]
    diffX = x2.shape[2] - x1.shape[2]
    if diffY or diffX:
        x1 = jnp.pad(x1, ((0, 0),
                          (diffY // 2, diffY - diffY // 2),
                          (diffX // 2, diffX - diffX // 2),
                          (0, 0)))

    inputs = [x1, x2] if in_channels_2 > 0 else [x1]

    # DoubleConv: conv1 (concat fused) -> [BN1+ReLU fused as conv2's prologue] -> conv2.
    count = x2.shape[0] * x2.shape[1] * x2.shape[2]
    y1, st1 = dconv3x3(inputs, params["c1_w"], params["c1_b"])
    sc1, sh1 = _bn_scale_shift(st1, count, params["bn1_g"], params["bn1_b"])

    y2, st2 = dconv3x3([y1], params["c2_w"], params["c2_b"], scale_shift=(sc1, sh1))
    sc2, sh2 = _bn_scale_shift(st2, count, params["bn2_g"], params["bn2_b"])

    # Final BN2+ReLU: single elementwise pass, XLA fuses it with the output transpose.
    out = jnp.maximum(y2 * sc2 + sh2, 0.0)
    return jnp.transpose(out, (0, 3, 1, 2))   # NHWC -> NCHW


# --------------------------------- main ---------------------------------------

if __name__ == "__main__":
    key = jax.random.PRNGKey(0)
    k_x1, k_x2, k_p = jax.random.split(key, 3)

    N = 2
    in_channels_1 = 8     # channels of the deeper (smaller) feature map x1
    in_channels_2 = 4     # channels of the skip connection x2
    out_channels = 8
    H, W = 8, 8           # x1 spatial; x2 is 2x larger

    x1 = jax.random.normal(k_x1, (N, in_channels_1, H, W), jnp.float32)
    x2 = jax.random.normal(k_x2, (N, in_channels_2, 2 * H, 2 * W), jnp.float32)

    params = init_up_params(k_p, in_channels_1, in_channels_2, out_channels)

    out = up_forward(x1, x2, params, in_channels_2)
    out = jax.block_until_ready(out)

    assert out.shape == (N, out_channels, 2 * H, 2 * W), out.shape
    assert bool(jnp.all(jnp.isfinite(out)))
    print("KERNEL_OK")
</pallas_src>

<mosaic_0001>
module attributes {stable_mosaic.version = 11 : i64} {
  func.func @_conv1x1_kernel(%arg0: i32, %arg1: memref<1x8x8x8xf32, #tpu.memory_space<vmem>>, %arg2: memref<8x4xbf16, #tpu.memory_space<vmem>>, %arg3: memref<1x4xf32, #tpu.memory_space<vmem>>, %arg4: memref<1x8x8x4xf32, #tpu.memory_space<vmem>>) attributes {dimension_semantics = [#tpu.dimension_semantics<parallel>], iteration_bounds = array<i64: 2>, scalar_prefetch = 0 : i64, scratch_operands = 0 : i64, tpu.core_type = #tpu.core_type<tc>, window_params = [{transform_indices = @transform_0, window_bounds = array<i64: 1, 8, 8, 8>}, {pipeline_mode = #tpu.pipeline_mode<synchronous>, transform_indices = @transform_1, window_bounds = array<i64: 8, 4>}, {pipeline_mode = #tpu.pipeline_mode<synchronous>, transform_indices = @transform_2, window_bounds = array<i64: 1, 4>}, {transform_indices = @transform_3, window_bounds = array<i64: 1, 8, 8, 4>}]} {
    %c0 = arith.constant 0 : index
    %c0_0 = arith.constant 0 : index
    %c0_1 = arith.constant 0 : index
    %c0_2 = arith.constant 0 : index
    %0 = vector.load %arg1[%c0, %c0_0, %c0_1, %c0_2] : memref<1x8x8x8xf32, #tpu.memory_space<vmem>>, vector<1x8x8x8xf32>
    %1 = vector.shape_cast %0 : vector<1x8x8x8xf32> to vector<8x8x8xf32>
    %2 = vector.shape_cast %1 : vector<8x8x8xf32> to vector<64x8xf32>
    %3 = arith.truncf %2 : vector<64x8xf32> to vector<64x8xbf16>
    %c0_3 = arith.constant 0 : index
    %c0_4 = arith.constant 0 : index
    %4 = vector.load %arg2[%c0_3, %c0_4] : memref<8x4xbf16, #tpu.memory_space<vmem>>, vector<8x4xbf16>
    %cst = arith.constant dense<0.000000e+00> : vector<64x4xf32>
    %5 = tpu.matmul %3, %4, %cst {dimension_numbers = #tpu.dot_dimension_numbers<[1], [0], [0], [1], [0, 0, 1, 1], [], []>} : vector<64x8xbf16>, vector<8x4xbf16>, vector<64x4xf32> -> vector<64x4xf32>
    %c0_5 = arith.constant 0 : index
    %c0_6 = arith.constant 0 : index
    %6 = vector.load %arg3[%c0_5, %c0_6] : memref<1x4xf32, #tpu.memory_space<vmem>>, vector<1x4xf32>
    %7 = vector.broadcast %6 : vector<1x4xf32> to vector<64x4xf32>
    %8 = arith.addf %5, %7 : vector<64x4xf32>
    %9 = vector.shape_cast %8 : vector<64x4xf32> to vector<8x8x4xf32>
    %c0_7 = arith.constant 0 : index
    %c0_8 = arith.constant 0 : index
    %c0_9 = arith.constant 0 : index
    %c0_10 = arith.constant 0 : index
    %10 = vector.load %arg4[%c0_7, %c0_8, %c0_9, %c0_10] : memref<1x8x8x4xf32, #tpu.memory_space<vmem>>, vector<1x8x8x4xf32>
    %11 = vector.shape_cast %10 : vector<1x8x8x4xf32> to vector<8x8x4xf32>
    %12 = vector.shape_cast %9 : vector<8x8x4xf32> to vector<1x8x8x4xf32>
    tpu.vector_store %arg4[%c0_7, %c0_8, %c0_9, %c0_10], %12 {strides = array<i32>} : memref<1x8x8x4xf32, #tpu.memory_space<vmem>>, vector<1x8x8x4xf32>,
    return
  }
  func.func @transform_0(%arg0: i32) -> (i32, i32, i32, i32) {
    %c0_i32 = arith.constant 0 : i32
    %c0_i32_0 = arith.constant 0 : i32
    %c0_i32_1 = arith.constant 0 : i32
    %c0_i32_2 = arith.constant 0 : i32
    return %arg0, %c0_i32, %c0_i32_0, %c0_i32_1 : i32, i32, i32, i32
  }
  func.func @transform_1(%arg0: i32) -> (i32, i32) {
    %c0_i32 = arith.constant 0 : i32
    %c0_i32_0 = arith.constant 0 : i32
    %c0_i32_1 = arith.constant 0 : i32
    return %c0_i32, %c0_i32_0 : i32, i32
  }
  func.func @transform_2(%arg0: i32) -> (i32, i32) {
    %c0_i32 = arith.constant 0 : i32
    %c0_i32_0 = arith.constant 0 : i32
    %c0_i32_1 = arith.constant 0 : i32
    return %c0_i32, %c0_i32_0 : i32, i32
  }
  func.func @transform_3(%arg0: i32) -> (i32, i32, i32, i32) {
    %c0_i32 = arith.constant 0 : i32
    %c0_i32_0 = arith.constant 0 : i32
    %c0_i32_1 = arith.constant 0 : i32
    %c0_i32_2 = arith.constant 0 : i32
    return %arg0, %c0_i32, %c0_i32_0, %c0_i32_1 : i32, i32, i32, i32
  }
}

module attributes {stable_mosaic.version = 11 : i64} {
  func.func @kernel(%arg0: i32, %arg1: i32, %arg2: memref<1x8x16x4xf32, #tpu.memory_space<vmem>>, %arg3: memref<1x1x16x4xf32, #tpu.memory_space<vmem>>, %arg4: memref<1x1x16x4xf32, #tpu.memory_space<vmem>>, %arg5: memref<1x8x16x4xf32, #tpu.memory_space<vmem>>, %arg6: memref<1x1x16x4xf32, #tpu.memory_space<vmem>>, %arg7: memref<1x1x16x4xf32, #tpu.memory_space<vmem>>, %arg8: memref<36x8xbf16, #tpu.memory_space<vmem>>, %arg9: memref<36x8xbf16, #tpu.memory_space<vmem>>, %arg10: memref<1x8xf32, #tpu.memory_space<vmem>>, %arg11: memref<1x8x16x8xf32, #tpu.memory_space<vmem>>, %arg12: memref<1x1x2x8xf32, #tpu.memory_space<vmem>>) attributes {dimension_semantics = [#tpu.dimension_semantics<parallel>, #tpu.dimension_semantics<parallel>], iteration_bounds = array<i64: 2, 2>, scalar_prefetch = 0 : i64, scratch_operands = 0 : i64, tpu.core_type = #tpu.core_type<tc>, window_params = [{transform_indices = @transform_0, window_bounds = array<i64: 1, 8, 16, 4>}, {transform_indices = @transform_1, window_bounds = array<i64: 1, 1, 16, 4>}, {transform_indices = @transform_2, window_bounds = array<i64: 1, 1, 16, 4>}, {transform_indices = @transform_3, window_bounds = array<i64: 1, 8, 16, 4>}, {transform_indices = @transform_4, window_bounds = array<i64: 1, 1, 16, 4>}, {transform_indices = @transform_5, window_bounds = array<i64: 1, 1, 16, 4>}, {pipeline_mode = #tpu.pipeline_mode<synchronous>, transform_indices = @transform_6, window_bounds = array<i64: 36, 8>}, {pipeline_mode = #tpu.pipeline_mode<synchronous>, transform_indices = @transform_7, window_bounds = array<i64: 36, 8>}, {pipeline_mode = #tpu.pipeline_mode<synchronous>, transform_indices = @transform_8, window_bounds = array<i64: 1, 8>}, {transform_indices = @transform_9, window_bounds = array<i64: 1, 8, 16, 8>}, {transform_indices = @transform_10, window_bounds = array<i64: 1, 1, 2, 8>}]} {
    %c0_i32 = arith.constant 0 : i32
    %0 = arith.cmpi eq, %arg1, %c0_i32 : i32
    %c1_i32 = arith.constant 1 : i32
    %1 = arith.cmpi eq, %arg1, %c1_i32 : i32
    %c0 = arith.constant 0 : index
    %c0_0 = arith.constant 0 : index
    %c0_1 = arith.constant 0 : index
    %c0_2 = arith.constant 0 : index
    %2 = vector.load %arg3[%c0, %c0_0, %c0_1, %c0_2] : memref<1x1x16x4xf32, #tpu.memory_space<vmem>>, vector<1x1x16x4xf32>
    %3 = vector.shape_cast %2 : vector<1x1x16x4xf32> to vector<1x16x4xf32>
    %c0_3 = arith.constant 0 : index
    %c0_4 = arith.constant 0 : index
    %c0_5 = arith.constant 0 : index
    %c0_6 = arith.constant 0 : index
    %4 = vector.load %arg2[%c0_3, %c0_4, %c0_5, %c0_6] : memref<1x8x16x4xf32, #tpu.memory_space<vmem>>, vector<1x8x16x4xf32>
    %5 = vector.shape_cast %4 : vector<1x8x16x4xf32> to vector<8x16x4xf32>
    %c0_7 = arith.constant 0 : index
    %c0_8 = arith.constant 0 : index
    %c0_9 = arith.constant 0 : index
    %c0_10 = arith.constant 0 : index
    %6 = vector.load %arg4[%c0_7, %c0_8, %c0_9, %c0_10] : memref<1x1x16x4xf32, #tpu.memory_space<vmem>>, vector<1x1x16x4xf32>
    %7 = vector.shape_cast %6 : vector<1x1x16x4xf32> to vector<1x16x4xf32>
    %cst = arith.constant 0.000000e+00 : f32
    %8 = vector.broadcast %cst : f32 to vector<1x16x4xf32>
    %9 = arith.select %0, %8, %3 : vector<1x16x4xf32>
    %cst_11 = arith.constant 0.000000e+00 : f32
    %10 = vector.broadcast %cst_11 : f32 to vector<1x16x4xf32>
    %11 = arith.select %1, %10, %7 : vector<1x16x4xf32>
    %12 = tpu.concatenate %9, %5, %11 in 0 : vector<1x16x4xf32>, vector<8x16x4xf32>, vector<1x16x4xf32> -> vector<10x16x4xf32>
    %cst_12 = arith.constant 0.000000e+00 : f32
    %13 = vector.broadcast %cst_12 : f32 to vector<10x1x4xf32>
    %14 = tpu.concatenate %13, %12, %13 in 1 : vector<10x1x4xf32>, vector<10x16x4xf32>, vector<10x1x4xf32> -> vector<10x18x4xf32>
    %15 = vector.extract_strided_slice %14 {offsets = [0, 0, 0], sizes = [8, 16, 4], strides = [1, 1, 1]} : vector<10x18x4xf32> to vector<8x16x4xf32>
    %16 = vector.shape_cast %15 : vector<8x16x4xf32> to vector<128x4xf32>
    %17 = vector.extract_strided_slice %14 {offsets = [0, 1, 0], sizes = [8, 16, 4], strides = [1, 1, 1]} : vector<10x18x4xf32> to vector<8x16x4xf32>
    %18 = vector.shape_cast %17 : vector<8x16x4xf32> to vector<128x4xf32>
    %19 = vector.extract_strided_slice %14 {offsets = [0, 2, 0], sizes = [8, 16, 4], strides = [1, 1, 1]} : vector<10x18x4xf32> to vector<8x16x4xf32>
    %20 = vector.shape_cast %19 : vector<8x16x4xf32> to vector<128x4xf32>
    %21 = vector.extract_strided_slice %14 {offsets = [1, 0, 0], sizes = [8, 16, 4], strides = [1, 1, 1]} : vector<10x18x4xf32> to vector<8x16x4xf32>
    %22 = vector.shape_cast %21 : vector<8x16x4xf32> to vector<128x4xf32>
    %23 = vector.extract_strided_slice %14 {offsets = [1, 1, 0], sizes = [8, 16, 4], strides = [1, 1, 1]} : vector<10x18x4xf32> to vector<8x16x4xf32>
    %24 = vector.shape_cast %23 : vector<8x16x4xf32> to vector<128x4xf32>
    %25 = vector.extract_strided_slice %14 {offsets = [1, 2, 0], sizes = [8, 16, 4], strides = [1, 1, 1]} : vector<10x18x4xf32> to vector<8x16x4xf32>
    %26 = vector.shape_cast %25 : vector<8x16x4xf32> to vector<128x4xf32>
    %27 = vector.extract_strided_slice %14 {offsets = [2, 0, 0], sizes = [8, 16, 4], strides = [1, 1, 1]} : vector<10x18x4xf32> to vector<8x16x4xf32>
    %28 = vector.shape_cast %27 : vector<8x16x4xf32> to vector<128x4xf32>
    %29 = vector.extract_strided_slice %14 {offsets = [2, 1, 0], sizes = [8, 16, 4], strides = [1, 1, 1]} : vector<10x18x4xf32> to vector<8x16x4xf32>
    %30 = vector.shape_cast %29 : vector<8x16x4xf32> to vector<128x4xf32>
    %31 = vector.extract_strided_slice %14 {offsets = [2, 2, 0], sizes = [8, 16, 4], strides = [1, 1, 1]} : vector<10x18x4xf32> to vector<8x16x4xf32>
    %32 = vector.shape_cast %31 : vector<8x16x4xf32> to vector<128x4xf32>
    %33 = tpu.concatenate %16, %18, %20, %22, %24, %26, %28, %30, %32 in 1 : vector<128x4xf32>, vector<128x4xf32>, vector<128x4xf32>, vector<128x4xf32>, vector<128x4xf32>, vector<128x4xf32>, vector<128x4xf32>, vector<128x4xf32>, vector<128x4xf32> -> vector<128x36xf32>
    %34 = arith.truncf %33 : vector<128x36xf32> to vector<128x36xbf16>
    %c0_13 = arith.constant 0 : index
    %c0_14 = arith.constant 0 : index
    %35 = vector.load %arg8[%c0_13, %c0_14] : memref<36x8xbf16, #tpu.memory_space<vmem>>, vector<36x8xbf16>
    %cst_15 = arith.constant dense<0.000000e+00> : vector<128x8xf32>
    %36 = tpu.matmul %34, %35, %cst_15 {dimension_numbers = #tpu.dot_dimension_numbers<[1], [0], [0], [1], [0, 0, 1, 1], [], []>} : vector<128x36xbf16>, vector<36x8xbf16>, vector<128x8xf32> -> vector<128x8xf32>
    %c0_16 = arith.constant 0 : index
    %c0_17 = arith.constant 0 : index
    %c0_18 = arith.constant 0 : index
    %c0_19 = arith.constant 0 : index
    %37 = vector.load %arg6[%c0_16, %c0_17, %c0_18, %c0_19] : memref<1x1x16x4xf32, #tpu.memory_space<vmem>>, vector<1x1x16x4xf32>
    %38 = vector.shape_cast %37 : vector<1x1x16x4xf32> to vector<1x16x4xf32>
    %c0_20 = arith.constant 0 : index
    %c0_21 = arith.constant 0 : index
    %c0_22 = arith.constant 0 : index
    %c0_23 = arith.constant 0 : index
    %39 = vector.load %arg5[%c0_20, %c0_21, %c0_22, %c0_23] : memref<1x8x16x4xf32, #tpu.memory_space<vmem>>, vector<1x8x16x4xf32>
    %40 = vector.shape_cast %39 : vector<1x8x16x4xf32> to vector<8x16x4xf32>
    %c0_24 = arith.constant 0 : index
    %c0_25 = arith.constant 0 : index
    %c0_26 = arith.constant 0 : index
    %c0_27 = arith.constant 0 : index
    %41 = vector.load %arg7[%c0_24, %c0_25, %c0_26, %c0_27] : memref<1x1x16x4xf32, #tpu.memory_space<vmem>>, vector<1x1x16x4xf32>
    %42 = vector.shape_cast %41 : vector<1x1x16x4xf32> to vector<1x16x4xf32>
    %cst_28 = arith.constant 0.000000e+00 : f32
    %43 = vector.broadcast %cst_28 : f32 to vector<1x16x4xf32>
    %44 = arith.select %0, %43, %38 : vector<1x16x4xf32>
    %cst_29 = arith.constant 0.000000e+00 : f32
    %45 = vector.broadcast %cst_29 : f32 to vector<1x16x4xf32>
    %46 = arith.select %1, %45, %42 : vector<1x16x4xf32>
    %47 = tpu.concatenate %44, %40, %46 in 0 : vector<1x16x4xf32>, vector<8x16x4xf32>, vector<1x16x4xf32> -> vector<10x16x4xf32>
    %cst_30 = arith.constant 0.000000e+00 : f32
    %48 = vector.broadcast %cst_30 : f32 to vector<10x1x4xf32>
    %49 = tpu.concatenate %48, %47, %48 in 1 : vector<10x1x4xf32>, vector<10x16x4xf32>, vector<10x1x4xf32> -> vector<10x18x4xf32>
    %50 = vector.extract_strided_slice %49 {offsets = [0, 0, 0], sizes = [8, 16, 4], strides = [1, 1, 1]} : vector<10x18x4xf32> to vector<8x16x4xf32>
    %51 = vector.shape_cast %50 : vector<8x16x4xf32> to vector<128x4xf32>
    %52 = vector.extract_strided_slice %49 {offsets = [0, 1, 0], sizes = [8, 16, 4], strides = [1, 1, 1]} : vector<10x18x4xf32> to vector<8x16x4xf32>
    %53 = vector.shape_cast %52 : vector<8x16x4xf32> to vector<128x4xf32>
    %54 = vector.extract_strided_slice %49 {offsets = [0, 2, 0], sizes = [8, 16, 4], strides = [1, 1, 1]} : vector<10x18x4xf32> to vector<8x16x4xf32>
    %55 = vector.shape_cast %54 : vector<8x16x4xf32> to vector<128x4xf32>
    %56 = vector.extract_strided_slice %49 {offsets = [1, 0, 0], sizes = [8, 16, 4], strides = [1, 1, 1]} : vector<10x18x4xf32> to vector<8x16x4xf32>
    %57 = vector.shape_cast %56 : vector<8x16x4xf32> to vector<128x4xf32>
    %58 = vector.extract_strided_slice %49 {offsets = [1, 1, 0], sizes = [8, 16, 4], strides = [1, 1, 1]} : vector<10x18x4xf32> to vector<8x16x4xf32>
    %59 = vector.shape_cast %58 : vector<8x16x4xf32> to vector<128x4xf32>
    %60 = vector.extract_strided_slice %49 {offsets = [1, 2, 0], sizes = [8, 16, 4], strides = [1, 1, 1]} : vector<10x18x4xf32> to vector<8x16x4xf32>
    %61 = vector.shape_cast %60 : vector<8x16x4xf32> to vector<128x4xf32>
    %62 = vector.extract_strided_slice %49 {offsets = [2, 0, 0], sizes = [8, 16, 4], strides = [1, 1, 1]} : vector<10x18x4xf32> to vector<8x16x4xf32>
    %63 = vector.shape_cast %62 : vector<8x16x4xf32> to vector<128x4xf32>
    %64 = vector.extract_strided_slice %49 {offsets = [2, 1, 0], sizes = [8, 16, 4], strides = [1, 1, 1]} : vector<10x18x4xf32> to vector<8x16x4xf32>
    %65 = vector.shape_cast %64 : vector<8x16x4xf32> to vector<128x4xf32>
    %66 = vector.extract_strided_slice %49 {offsets = [2, 2, 0], sizes = [8, 16, 4], strides = [1, 1, 1]} : vector<10x18x4xf32> to vector<8x16x4xf32>
    %67 = vector.shape_cast %66 : vector<8x16x4xf32> to vector<128x4xf32>
    %68 = tpu.concatenate %51, %53, %55, %57, %59, %61, %63, %65, %67 in 1 : vector<128x4xf32>, vector<128x4xf32>, vector<128x4xf32>, vector<128x4xf32>, vector<128x4xf32>, vector<128x4xf32>, vector<128x4xf32>, vector<128x4xf32>, vector<128x4xf32> -> vector<128x36xf32>
    %69 = arith.truncf %68 : vector<128x36xf32> to vector<128x36xbf16>
    %c0_31 = arith.constant 0 : index
    %c0_32 = arith.constant 0 : index
    %70 = vector.load %arg9[%c0_31, %c0_32] : memref<36x8xbf16, #tpu.memory_space<vmem>>, vector<36x8xbf16>
    %cst_33 = arith.constant dense<0.000000e+00> : vector<128x8xf32>
    %71 = tpu.matmul %69, %70, %cst_33 {dimension_numbers = #tpu.dot_dimension_numbers<[1], [0], [0], [1], [0, 0, 1, 1], [], []>} : vector<128x36xbf16>, vector<36x8xbf16>, vector<128x8xf32> -> vector<128x8xf32>
    %72 = arith.addf %36, %71 : vector<128x8xf32>
    %c0_34 = arith.constant 0 : index
    %c0_35 = arith.constant 0 : index
    %73 = vector.load %arg10[%c0_34, %c0_35] : memref<1x8xf32, #tpu.memory_space<vmem>>, vector<1x8xf32>
    %74 = vector.broadcast %73 : vector<1x8xf32> to vector<128x8xf32>
    %75 = arith.addf %72, %74 : vector<128x8xf32>
    %cst_36 = arith.constant dense<0.000000e+00> : vector<8xf32>
    %76 = vector.multi_reduction <add>, %75, %cst_36 [0] : vector<128x8xf32> to vector<8xf32>
    %77 = vector.shape_cast %76 : vector<8xf32> to vector<1x8xf32>
    %78 = arith.mulf %75, %75 : vector<128x8xf32>
    %cst_37 = arith.constant dense<0.000000e+00> : vector<8xf32>
    %79 = vector.multi_reduction <add>, %78, %cst_37 [0] : vector<128x8xf32> to vector<8xf32>
    %80 = vector.shape_cast %79 : vector<8xf32> to vector<1x8xf32>
    %81 = tpu.concatenate %77, %80 in 0 : vector<1x8xf32>, vector<1x8xf32> -> vector<2x8xf32>
    %c0_38 = arith.constant 0 : index
    %c0_39 = arith.constant 0 : index
    %c0_40 = arith.constant 0 : index
    %c0_41 = arith.constant 0 : index
    %82 = vector.load %arg12[%c0_38, %c0_39, %c0_40, %c0_41] : memref<1x1x2x8xf32, #tpu.memory_space<vmem>>, vector<1x1x2x8xf32>
    %83 = vector.shape_cast %82 : vector<1x1x2x8xf32> to vector<2x8xf32>
    %84 = vector.shape_cast %81 : vector<2x8xf32> to vector<1x1x2x8xf32>
    tpu.vector_store %arg12[%c0_38, %c0_39, %c0_40, %c0_41], %84 {strides = array<i32>} : memref<1x1x2x8xf32, #tpu.memory_space<vmem>>, vector<1x1x2x8xf32>,
    %85 = vector.shape_cast %75 : vector<128x8xf32> to vector<8x16x8xf32>
    %c0_42 = arith.constant 0 : index
    %c0_43 = arith.constant 0 : index
    %c0_44 = arith.constant 0 : index
    %c0_45 = arith.constant 0 : index
    %86 = vector.load %arg11[%c0_42, %c0_43, %c0_44, %c0_45] : memref<1x8x16x8xf32, #tpu.memory_space<vmem>>, vector<1x8x16x8xf32>
    %87 = vector.shape_cast %86 : vector<1x8x16x8xf32> to vector<8x16x8xf32>
    %88 = vector.shape_cast %85 : vector<8x16x8xf32> to vector<1x8x16x8xf32>
    tpu.vector_store %arg11[%c0_42, %c0_43, %c0_44, %c0_45], %88 {strides = array<i32>} : memref<1x8x16x8xf32, #tpu.memory_space<vmem>>, vector<1x8x16x8xf32>,
    return
  }
  func.func @transform_0(%arg0: i32, %arg1: i32) -> (i32, i32, i32, i32) {
    %c0_i32 = arith.constant 0 : i32
    %c0_i32_0 = arith.constant 0 : i32
    %c0_i32_1 = arith.constant 0 : i32
    return %arg0, %arg1, %c0_i32, %c0_i32_0 : i32, i32, i32, i32
  }
  func.func @transform_1(%arg0: i32, %arg1: i32) -> (i32, i32, i32, i32) {
    %c8_i32 = arith.constant 8 : i32
    %0 = arith.muli %arg1, %c8_i32 : i32
    %c1_i32 = arith.constant 1 : i32
    %1 = arith.subi %0, %c1_i32 : i32
    %c0_i32 = arith.constant 0 : i32
    %2 = arith.maxsi %1, %c0_i32 : i32
    %c0_i32_0 = arith.constant 0 : i32
    %c0_i32_1 = arith.constant 0 : i32
    %c0_i32_2 = arith.constant 0 : i32
    return %arg0, %2, %c0_i32_0, %c0_i32_1 : i32, i32, i32, i32
  }
  func.func @transform_2(%arg0: i32, %arg1: i32) -> (i32, i32, i32, i32) {
    %c8_i32 = arith.constant 8 : i32
    %0 = arith.muli %arg1, %c8_i32 : i32
    %c8_i32_0 = arith.constant 8 : i32
    %1 = arith.addi %0, %c8_i32_0 : i32
    %c15_i32 = arith.constant 15 : i32
    %2 = arith.minsi %1, %c15_i32 : i32
    %c0_i32 = arith.constant 0 : i32
    %c0_i32_1 = arith.constant 0 : i32
    %c0_i32_2 = arith.constant 0 : i32
    return %arg0, %2, %c0_i32, %c0_i32_1 : i32, i32, i32, i32
  }
  func.func @transform_3(%arg0: i32, %arg1: i32) -> (i32, i32, i32, i32) {
    %c0_i32 = arith.constant 0 : i32
    %c0_i32_0 = arith.constant 0 : i32
    %c0_i32_1 = arith.constant 0 : i32
    return %arg0, %arg1, %c0_i32, %c0_i32_0 : i32, i32, i32, i32
  }
  func.func @transform_4(%arg0: i32, %arg1: i32) -> (i32, i32, i32, i32) {
    %c8_i32 = arith.constant 8 : i32
    %0 = arith.muli %arg1, %c8_i32 : i32
    %c1_i32 = arith.constant 1 : i32
    %1 = arith.subi %0, %c1_i32 : i32
    %c0_i32 = arith.constant 0 : i32
    %2 = arith.maxsi %1, %c0_i32 : i32
    %c0_i32_0 = arith.constant 0 : i32
    %c0_i32_1 = arith.constant 0 : i32
    %c0_i32_2 = arith.constant 0 : i32
    return %arg0, %2, %c0_i32_0, %c0_i32_1 : i32, i32, i32, i32
  }
  func.func @transform_5(%arg0: i32, %arg1: i32) -> (i32, i32, i32, i32) {
    %c8_i32 = arith.constant 8 : i32
    %0 = arith.muli %arg1, %c8_i32 : i32
    %c8_i32_0 = arith.constant 8 : i32
    %1 = arith.addi %0, %c8_i32_0 : i32
    %c15_i32 = arith.constant 15 : i32
    %2 = arith.minsi %1, %c15_i32 : i32
    %c0_i32 = arith.constant 0 : i32
    %c0_i32_1 = arith.constant 0 : i32
    %c0_i32_2 = arith.constant 0 : i32
    return %arg0, %2, %c0_i32, %c0_i32_1 : i32, i32, i32, i32
  }
  func.func @transform_6(%arg0: i32, %arg1: i32) -> (i32, i32) {
    %c0_i32 = arith.constant 0 : i32
    %c0_i32_0 = arith.constant 0 : i32
    %c0_i32_1 = arith.constant 0 : i32
    return %c0_i32, %c0_i32_0 : i32, i32
  }
  func.func @transform_7(%arg0: i32, %arg1: i32) -> (i32, i32) {
    %c0_i32 = arith.constant 0 : i32
    %c0_i32_0 = arith.constant 0 : i32
    %c0_i32_1 = arith.constant 0 : i32
    return %c0_i32, %c0_i32_0 : i32, i32
  }
  func.func @transform_8(%arg0: i32, %arg1: i32) -> (i32, i32) {
    %c0_i32 = arith.constant 0 : i32
    %c0_i32_0 = arith.constant 0 : i32
    %c0_i32_1 = arith.constant 0 : i32
    return %c0_i32, %c0_i32_0 : i32, i32
  }
  func.func @transform_9(%arg0: i32, %arg1: i32) -> (i32, i32, i32, i32) {
    %c0_i32 = arith.constant 0 : i32
    %c0_i32_0 = arith.constant 0 : i32
    %c0_i32_1 = arith.constant 0 : i32
    return %arg0, %arg1, %c0_i32, %c0_i32_0 : i32, i32, i32, i32
  }
  func.func @transform_10(%arg0: i32, %arg1: i32) -> (i32, i32, i32, i32) {
    %c0_i32 = arith.constant 0 : i32
    %c0_i32_0 = arith.constant 0 : i32
    %c0_i32_1 = arith.constant 0 : i32
    return %arg0, %arg1, %c0_i32, %c0_i32_0 : i32, i32, i32, i32
  }
}

module attributes {stable_mosaic.version = 11 : i64} {
  func.func @kernel(%arg0: i32, %arg1: i32, %arg2: memref<1x8x16x8xf32, #tpu.memory_space<vmem>>, %arg3: memref<1x1x16x8xf32, #tpu.memory_space<vmem>>, %arg4: memref<1x1x16x8xf32, #tpu.memory_space<vmem>>, %arg5: memref<1x1x8xf32, #tpu.memory_space<vmem>>, %arg6: memref<1x1x8xf32, #tpu.memory_space<vmem>>, %arg7: memref<72x8xbf16, #tpu.memory_space<vmem>>, %arg8: memref<1x8xf32, #tpu.memory_space<vmem>>, %arg9: memref<1x8x16x8xf32, #tpu.memory_space<vmem>>, %arg10: memref<1x1x2x8xf32, #tpu.memory_space<vmem>>) attributes {dimension_semantics = [#tpu.dimension_semantics<parallel>, #tpu.dimension_semantics<parallel>], iteration_bounds = array<i64: 2, 2>, scalar_prefetch = 0 : i64, scratch_operands = 0 : i64, tpu.core_type = #tpu.core_type<tc>, window_params = [{transform_indices = @transform_0, window_bounds = array<i64: 1, 8, 16, 8>}, {transform_indices = @transform_1, window_bounds = array<i64: 1, 1, 16, 8>}, {transform_indices = @transform_2, window_bounds = array<i64: 1, 1, 16, 8>}, {pipeline_mode = #tpu.pipeline_mode<synchronous>, transform_indices = @transform_3, window_bounds = array<i64: 1, 1, 8>}, {pipeline_mode = #tpu.pipeline_mode<synchronous>, transform_indices = @transform_4, window_bounds = array<i64: 1, 1, 8>}, {pipeline_mode = #tpu.pipeline_mode<synchronous>, transform_indices = @transform_5, window_bounds = array<i64: 72, 8>}, {pipeline_mode = #tpu.pipeline_mode<synchronous>, transform_indices = @transform_6, window_bounds = array<i64: 1, 8>}, {transform_indices = @transform_7, window_bounds = array<i64: 1, 8, 16, 8>}, {transform_indices = @transform_8, window_bounds = array<i64: 1, 1, 2, 8>}]} {
    %c0_i32 = arith.constant 0 : i32
    %0 = arith.cmpi eq, %arg1, %c0_i32 : i32
    %c1_i32 = arith.constant 1 : i32
    %1 = arith.cmpi eq, %arg1, %c1_i32 : i32
    %c0 = arith.constant 0 : index
    %c0_0 = arith.constant 0 : index
    %c0_1 = arith.constant 0 : index
    %c0_2 = arith.constant 0 : index
    %2 = vector.load %arg3[%c0, %c0_0, %c0_1, %c0_2] : memref<1x1x16x8xf32, #tpu.memory_space<vmem>>, vector<1x1x16x8xf32>
    %3 = vector.shape_cast %2 : vector<1x1x16x8xf32> to vector<1x16x8xf32>
    %c0_3 = arith.constant 0 : index
    %c0_4 = arith.constant 0 : index
    %c0_5 = arith.constant 0 : index
    %c0_6 = arith.constant 0 : index
    %4 = vector.load %arg2[%c0_3, %c0_4, %c0_5, %c0_6] : memref<1x8x16x8xf32, #tpu.memory_space<vmem>>, vector<1x8x16x8xf32>
    %5 = vector.shape_cast %4 : vector<1x8x16x8xf32> to vector<8x16x8xf32>
    %c0_7 = arith.constant 0 : index
    %c0_8 = arith.constant 0 : index
    %c0_9 = arith.constant 0 : index
    %c0_10 = arith.constant 0 : index
    %6 = vector.load %arg4[%c0_7, %c0_8, %c0_9, %c0_10] : memref<1x1x16x8xf32, #tpu.memory_space<vmem>>, vector<1x1x16x8xf32>
    %7 = vector.shape_cast %6 : vector<1x1x16x8xf32> to vector<1x16x8xf32>
    %c0_11 = arith.constant 0 : index
    %c0_12 = arith.constant 0 : index
    %c0_13 = arith.constant 0 : index
    %8 = vector.load %arg5[%c0_11, %c0_12, %c0_13] : memref<1x1x8xf32, #tpu.memory_space<vmem>>, vector<1x1x8xf32>
    %c0_14 = arith.constant 0 : index
    %c0_15 = arith.constant 0 : index
    %c0_16 = arith.constant 0 : index
    %9 = vector.load %arg6[%c0_14, %c0_15, %c0_16] : memref<1x1x8xf32, #tpu.memory_space<vmem>>, vector<1x1x8xf32>
    %10 = vector.broadcast %8 : vector<1x1x8xf32> to vector<1x16x8xf32>
    %11 = arith.mulf %3, %10 : vector<1x16x8xf32>
    %12 = vector.broadcast %9 : vector<1x1x8xf32> to vector<1x16x8xf32>
    %13 = arith.addf %11, %12 : vector<1x16x8xf32>
    %cst = arith.constant 0.000000e+00 : f32
    %14 = vector.broadcast %cst : f32 to vector<1x16x8xf32>
    %15 = arith.maximumf %13, %14 : vector<1x16x8xf32>
    %16 = vector.broadcast %8 : vector<1x1x8xf32> to vector<8x16x8xf32>
    %17 = arith.mulf %5, %16 : vector<8x16x8xf32>
    %18 = vector.broadcast %9 : vector<1x1x8xf32> to vector<8x16x8xf32>
    %19 = arith.addf %17, %18 : vector<8x16x8xf32>
    %cst_17 = arith.constant 0.000000e+00 : f32
    %20 = vector.broadcast %cst_17 : f32 to vector<8x16x8xf32>
    %21 = arith.maximumf %19, %20 : vector<8x16x8xf32>
    %22 = vector.broadcast %8 : vector<1x1x8xf32> to vector<1x16x8xf32>
    %23 = arith.mulf %7, %22 : vector<1x16x8xf32>
    %24 = vector.broadcast %9 : vector<1x1x8xf32> to vector<1x16x8xf32>
    %25 = arith.addf %23, %24 : vector<1x16x8xf32>
    %cst_18 = arith.constant 0.000000e+00 : f32
    %26 = vector.broadcast %cst_18 : f32 to vector<1x16x8xf32>
    %27 = arith.maximumf %25, %26 : vector<1x16x8xf32>
    %cst_19 = arith.constant 0.000000e+00 : f32
    %28 = vector.broadcast %cst_19 : f32 to vector<1x16x8xf32>
    %29 = arith.select %0, %28, %15 : vector<1x16x8xf32>
    %cst_20 = arith.constant 0.000000e+00 : f32
    %30 = vector.broadcast %cst_20 : f32 to vector<1x16x8xf32>
    %31 = arith.select %1, %30, %27 : vector<1x16x8xf32>
    %32 = tpu.concatenate %29, %21, %31 in 0 : vector<1x16x8xf32>, vector<8x16x8xf32>, vector<1x16x8xf32> -> vector<10x16x8xf32>
    %cst_21 = arith.constant 0.000000e+00 : f32
    %33 = vector.broadcast %cst_21 : f32 to vector<10x1x8xf32>
    %34 = tpu.concatenate %33, %32, %33 in 1 : vector<10x1x8xf32>, vector<10x16x8xf32>, vector<10x1x8xf32> -> vector<10x18x8xf32>
    %35 = vector.extract_strided_slice %34 {offsets = [0, 0, 0], sizes = [8, 16, 8], strides = [1, 1, 1]} : vector<10x18x8xf32> to vector<8x16x8xf32>
    %36 = vector.shape_cast %35 : vector<8x16x8xf32> to vector<128x8xf32>
    %37 = vector.extract_strided_slice %34 {offsets = [0, 1, 0], sizes = [8, 16, 8], strides = [1, 1, 1]} : vector<10x18x8xf32> to vector<8x16x8xf32>
    %38 = vector.shape_cast %37 : vector<8x16x8xf32> to vector<128x8xf32>
    %39 = vector.extract_strided_slice %34 {offsets = [0, 2, 0], sizes = [8, 16, 8], strides = [1, 1, 1]} : vector<10x18x8xf32> to vector<8x16x8xf32>
    %40 = vector.shape_cast %39 : vector<8x16x8xf32> to vector<128x8xf32>
    %41 = vector.extract_strided_slice %34 {offsets = [1, 0, 0], sizes = [8, 16, 8], strides = [1, 1, 1]} : vector<10x18x8xf32> to vector<8x16x8xf32>
    %42 = vector.shape_cast %41 : vector<8x16x8xf32> to vector<128x8xf32>
    %43 = vector.extract_strided_slice %34 {offsets = [1, 1, 0], sizes = [8, 16, 8], strides = [1, 1, 1]} : vector<10x18x8xf32> to vector<8x16x8xf32>
    %44 = vector.shape_cast %43 : vector<8x16x8xf32> to vector<128x8xf32>
    %45 = vector.extract_strided_slice %34 {offsets = [1, 2, 0], sizes = [8, 16, 8], strides = [1, 1, 1]} : vector<10x18x8xf32> to vector<8x16x8xf32>
    %46 = vector.shape_cast %45 : vector<8x16x8xf32> to vector<128x8xf32>
    %47 = vector.extract_strided_slice %34 {offsets = [2, 0, 0], sizes = [8, 16, 8], strides = [1, 1, 1]} : vector<10x18x8xf32> to vector<8x16x8xf32>
    %48 = vector.shape_cast %47 : vector<8x16x8xf32> to vector<128x8xf32>
    %49 = vector.extract_strided_slice %34 {offsets = [2, 1, 0], sizes = [8, 16, 8], strides = [1, 1, 1]} : vector<10x18x8xf32> to vector<8x16x8xf32>
    %50 = vector.shape_cast %49 : vector<8x16x8xf32> to vector<128x8xf32>
    %51 = vector.extract_strided_slice %34 {offsets = [2, 2, 0], sizes = [8, 16, 8], strides = [1, 1, 1]} : vector<10x18x8xf32> to vector<8x16x8xf32>
    %52 = vector.shape_cast %51 : vector<8x16x8xf32> to vector<128x8xf32>
    %53 = tpu.concatenate %36, %38, %40, %42, %44, %46, %48, %50, %52 in 1 : vector<128x8xf32>, vector<128x8xf32>, vector<128x8xf32>, vector<128x8xf32>, vector<128x8xf32>, vector<128x8xf32>, vector<128x8xf32>, vector<128x8xf32>, vector<128x8xf32> -> vector<128x72xf32>
    %54 = arith.truncf %53 : vector<128x72xf32> to vector<128x72xbf16>
    %c0_22 = arith.constant 0 : index
    %c0_23 = arith.constant 0 : index
    %55 = vector.load %arg7[%c0_22, %c0_23] : memref<72x8xbf16, #tpu.memory_space<vmem>>, vector<72x8xbf16>
    %cst_24 = arith.constant dense<0.000000e+00> : vector<128x8xf32>
    %56 = tpu.matmul %54, %55, %cst_24 {dimension_numbers = #tpu.dot_dimension_numbers<[1], [0], [0], [1], [0, 0, 1, 1], [], []>} : vector<128x72xbf16>, vector<72x8xbf16>, vector<128x8xf32> -> vector<128x8xf32>
    %c0_25 = arith.constant 0 : index
    %c0_26 = arith.constant 0 : index
    %57 = vector.load %arg8[%c0_25, %c0_26] : memref<1x8xf32, #tpu.memory_space<vmem>>, vector<1x8xf32>
    %58 = vector.broadcast %57 : vector<1x8xf32> to vector<128x8xf32>
    %59 = arith.addf %56, %58 : vector<128x8xf32>
    %cst_27 = arith.constant dense<0.000000e+00> : vector<8xf32>
    %60 = vector.multi_reduction <add>, %59, %cst_27 [0] : vector<128x8xf32> to vector<8xf32>
    %61 = vector.shape_cast %60 : vector<8xf32> to vector<1x8xf32>
    %62 = arith.mulf %59, %59 : vector<128x8xf32>
    %cst_28 = arith.constant dense<0.000000e+00> : vector<8xf32>
    %63 = vector.multi_reduction <add>, %62, %cst_28 [0] : vector<128x8xf32> to vector<8xf32>
    %64 = vector.shape_cast %63 : vector<8xf32> to vector<1x8xf32>
    %65 = tpu.concatenate %61, %64 in 0 : vector<1x8xf32>, vector<1x8xf32> -> vector<2x8xf32>
    %c0_29 = arith.constant 0 : index
    %c0_30 = arith.constant 0 : index
    %c0_31 = arith.constant 0 : index
    %c0_32 = arith.constant 0 : index
    %66 = vector.load %arg10[%c0_29, %c0_30, %c0_31, %c0_32] : memref<1x1x2x8xf32, #tpu.memory_space<vmem>>, vector<1x1x2x8xf32>
    %67 = vector.shape_cast %66 : vector<1x1x2x8xf32> to vector<2x8xf32>
    %68 = vector.shape_cast %65 : vector<2x8xf32> to vector<1x1x2x8xf32>
    tpu.vector_store %arg10[%c0_29, %c0_30, %c0_31, %c0_32], %68 {strides = array<i32>} : memref<1x1x2x8xf32, #tpu.memory_space<vmem>>, vector<1x1x2x8xf32>,
    %69 = vector.shape_cast %59 : vector<128x8xf32> to vector<8x16x8xf32>
    %c0_33 = arith.constant 0 : index
    %c0_34 = arith.constant 0 : index
    %c0_35 = arith.constant 0 : index
    %c0_36 = arith.constant 0 : index
    %70 = vector.load %arg9[%c0_33, %c0_34, %c0_35, %c0_36] : memref<1x8x16x8xf32, #tpu.memory_space<vmem>>, vector<1x8x16x8xf32>
    %71 = vector.shape_cast %70 : vector<1x8x16x8xf32> to vector<8x16x8xf32>
    %72 = vector.shape_cast %69 : vector<8x16x8xf32> to vector<1x8x16x8xf32>
    tpu.vector_store %arg9[%c0_33, %c0_34, %c0_35, %c0_36], %72 {strides = array<i32>} : memref<1x8x16x8xf32, #tpu.memory_space<vmem>>, vector<1x8x16x8xf32>,
    return
  }
  func.func @transform_0(%arg0: i32, %arg1: i32) -> (i32, i32, i32, i32) {
    %c0_i32 = arith.constant 0 : i32
    %c0_i32_0 = arith.constant 0 : i32
    %c0_i32_1 = arith.constant 0 : i32
    return %arg0, %arg1, %c0_i32, %c0_i32_0 : i32, i32, i32, i32
  }
  func.func @transform_1(%arg0: i32, %arg1: i32) -> (i32, i32, i32, i32) {
    %c8_i32 = arith.constant 8 : i32
    %0 = arith.muli %arg1, %c8_i32 : i32
    %c1_i32 = arith.constant 1 : i32
    %1 = arith.subi %0, %c1_i32 : i32
    %c0_i32 = arith.constant 0 : i32
    %2 = arith.maxsi %1, %c0_i32 : i32
    %c0_i32_0 = arith.constant 0 : i32
    %c0_i32_1 = arith.constant 0 : i32
    %c0_i32_2 = arith.constant 0 : i32
    return %arg0, %2, %c0_i32_0, %c0_i32_1 : i32, i32, i32, i32
  }
  func.func @transform_2(%arg0: i32, %arg1: i32) -> (i32, i32, i32, i32) {
    %c8_i32 = arith.constant 8 : i32
    %0 = arith.muli %arg1, %c8_i32 : i32
    %c8_i32_0 = arith.constant 8 : i32
    %1 = arith.addi %0, %c8_i32_0 : i32
    %c15_i32 = arith.constant 15 : i32
    %2 = arith.minsi %1, %c15_i32 : i32
    %c0_i32 = arith.constant 0 : i32
    %c0_i32_1 = arith.constant 0 : i32
    %c0_i32_2 = arith.constant 0 : i32
    return %arg0, %2, %c0_i32, %c0_i32_1 : i32, i32, i32, i32
  }
  func.func @transform_3(%arg0: i32, %arg1: i32) -> (i32, i32, i32) {
    %c0_i32 = arith.constant 0 : i32
    %c0_i32_0 = arith.constant 0 : i32
    %c0_i32_1 = arith.constant 0 : i32
    %c0_i32_2 = arith.constant 0 : i32
    return %c0_i32, %c0_i32_0, %c0_i32_1 : i32, i32, i32
  }
  func.func @transform_4(%arg0: i32, %arg1: i32) -> (i32, i32, i32) {
    %c0_i32 = arith.constant 0 : i32
    %c0_i32_0 = arith.constant 0 : i32
    %c0_i32_1 = arith.constant 0 : i32
    %c0_i32_2 = arith.constant 0 : i32
    return %c0_i32, %c0_i32_0, %c0_i32_1 : i32, i32, i32
  }
  func.func @transform_5(%arg0: i32, %arg1: i32) -> (i32, i32) {
    %c0_i32 = arith.constant 0 : i32
    %c0_i32_0 = arith.constant 0 : i32
    %c0_i32_1 = arith.constant 0 : i32
    return %c0_i32, %c0_i32_0 : i32, i32
  }
  func.func @transform_6(%arg0: i32, %arg1: i32) -> (i32, i32) {
    %c0_i32 = arith.constant 0 : i32
    %c0_i32_0 = arith.constant 0 : i32
    %c0_i32_1 = arith.constant 0 : i32
    return %c0_i32, %c0_i32_0 : i32, i32
  }
  func.func @transform_7(%arg0: i32, %arg1: i32) -> (i32, i32, i32, i32) {
    %c0_i32 = arith.constant 0 : i32
    %c0_i32_0 = arith.constant 0 : i32
    %c0_i32_1 = arith.constant 0 : i32
    return %arg0, %arg1, %c0_i32, %c0_i32_0 : i32, i32, i32, i32
  }
  func.func @transform_8(%arg0: i32, %arg1: i32) -> (i32, i32, i32, i32) {
    %c0_i32 = arith.constant 0 : i32
    %c0_i32_0 = arith.constant 0 : i32
    %c0_i32_1 = arith.constant 0 : i32
    return %arg0, %arg1, %c0_i32, %c0_i32_0 : i32, i32, i32, i32
  }
}

</mosaic_0001>

<bundles_post_ra>
// kernel: up_forward.3
= control target key start
LH: loop header
LB: loop body
LE: loop exit
PB: predicated region body
PF: predicated region fallthrough
CT: control target
= control target key end

     0   :  { %s411_s12 = smov 0   ;;  %s442_s0 = inlined_call_operand.vmem [shape: f32[2,8,8,8], index: 0, kind: input, shape index: {}]   ;;  %s443_s1 = inlined_call_operand.vmem [shape: bf16[8,4], index: 1, kind: input, shape index: {}]   ;;  %s444_s2 = inlined_call_operand.vmem [shape: f32[1,4], index: 2, kind: input, shape index: {}]   ;;  %s445_s3 = inlined_call_operand.vmem [shape: f32[2,8,8,4], index: 3, kind: output, shape index: {}]  }
   0x1 LB: > { %s338_s13 = sadd.s32 4294967295, %s389_s12   ;;  %p342_p0 = scmp.ge.s32.totalorder %s389_s12, 1  ;;  %s389_s12 = sphi %s411_s12, %s13_s12  }
   0x2   : > { %p137_p1 = scmp.lt.s32.totalorder %s389_s12, 3 }
   0x4   : > { %p138_p2 = pnand %p342_p0, %p137_p1 }
   0x5   : > { %v184_v0 = vld [vmem:[%s443_s1] sm:$0xf] (!%p138_p2)  ;;  %vm205_vm0 = vcmask (!%p138_p2), 1043456   ;;  %p161_p3 = scmp.lt.s32.totalorder (!%p138_p2), %s338_s13, 1  ;;  %vm192_vm1 = vcmask (!%p138_p2), 64512   ;;  %vm274_vm2 = vcmask (!%p138_p2), 31744  }
   0x6   : > { %141 = sbr.rel (%p138_p2) target bundleno = 239 (0xef), region = 32  ;;  %373 = vmatprep.subr.msk.bf16.mxu0 (!%p138_p2), %vm205_vm0, %v184_v0  ;;  %374 = vmatprep.subr.msk.bf16.mxu1 (!%p138_p2), %vm205_vm0, %v184_v0  ;;  %v207_v1 = vsel (!%p138_p2), %vm205_vm0, %v184_v0, 0  ;;  %v347_v14 = vld [vmem:[%s444_s2] ss:$0 sm:$0xff] (!%p138_p2) }
   0x7   : > { %362 = vmatpush3.bf16.msra.mxu0 (!%p138_p2), %v207_v1  ;;  %372 = vmatpush3.bf16.msra.mxu1 (!%p138_p2), %v207_v1 }
   0xd   : > { %s447_s13 = smov (!%p161_p3, %s338_s13), 1 }
   0xe   : > { %s354_s16 = sshll.u32 %s447_s13, 6 }
   0xf   : > { %s165_s19 = scalar_lea.vmem %s442_s0, %s354_s16  ;;  %s170_s24 = scalar_lea.vmem %s445_s3, %s354_s16 }
  0x10   : > { %v172_v2 = vld [vmem:[%s165_s19] sm:$0xff]  ;;  %v173_v3 = vld [vmem:[%s165_s19 + $0x8] sm:$0xff]  ;;  %v174_v7 = vld [vmem:[%s165_s19 + $0x10] sm:$0xff] }
  0x11   : > { %v176_v4 = vld [vmem:[%s165_s19 + $0x20] sm:$0xff]  ;;  %v180_v5 = vpack.c.bf16 %v173_v3, %v172_v2  ;;  %v177_v6 = vld [vmem:[%s165_s19 + $0x28] sm:$0xff]  ;;  %v175_v8 = vld [vmem:[%s165_s19 + $0x18] sm:$0xff] }
  0x12   : > { %v182_v9 = vpack.c.bf16 %v177_v6, %v176_v4  ;;  %v181_v10 = vpack.c.bf16 %v175_v8, %v174_v7  ;;  %v178_v11 = vld [vmem:[%s165_s19 + $0x30] sm:$0xff]  ;;  %v179_v12 = vld [vmem:[%s165_s19 + $0x38] sm:$0xff] }
  0x13   : > { %363 = vmatprep.mubr.msk.bf16.mxu0 %vm192_vm1, %v180_v5  ;;  %v183_v13 = vpack.c.bf16 %v179_v12, %v178_v11 }
  0x14   : > { %367 = vmatprep.mubr.msk.bf16.mxu1 %vm192_vm1, %v182_v9  ;;  %364 = vmatmul.mubr.msk.bf16.vlgmr.msra.gmra.mrb[0].mxu0 %vm192_vm1, %v181_v10 }
  0x15   : > { %368 = vmatmul.mubr.msk.bf16.vlgmr.msra.gmra.mrb[0].mxu1 %vm192_vm1, %v183_v13 }
  0xe7   : > { %v365_v15 = vpop.f32.mrb[0].mxu0 }
  0xe8   : > { %v252_v16 = vadd.f32 %v365_v15, %v347_v14  ;;  %v369_v17 = vpop.f32.mrb[0].mxu1  ;;  %v243_v18 = vpop.f32.mrb[1].mxu0 }
  0xe9   : > { %v268_v19 = vadd.f32 %v369_v17, %v347_v14  ;;  %v244_v20 = vadd.f32 %v347_v14, %v243_v18  ;;  %v259_v21 = vpop.f32.mrb[1].mxu1  ;;  %v366_v22 = vpop.f32.mrb[2].mxu0 }
  0xea   : > { %277 = vst.msk [vmem:[%s170_s24 + $0x10] sm:$0xff] %vm274_vm2, %v252_v16  ;;  %v260_v23 = vadd.f32 %v347_v14, %v259_v21  ;;  %v255_v24 = vadd.f32 %v366_v22, %v347_v14  ;;  %v370_v25 = vpop.f32.mrb[2].mxu1  ;;  %v246_v26 = vpop.f32.mrb[3].mxu0 }
  0xeb   : > { %281 = vst.msk [vmem:[%s170_s24 + $0x30] sm:$0xff] %vm274_vm2, %v268_v19  ;;  %275 = vst.msk [vmem:[%s170_s24] sm:$0xff] %vm274_vm2, %v244_v20  ;;  %v271_v27 = vadd.f32 %v370_v25, %v347_v14  ;;  %v247_v28 = vadd.f32 %v347_v14, %v246_v26  ;;  %v262_v29 = vpop.f32.mrb[3].mxu1 }
  0xec   : > { %279 = vst.msk [vmem:[%s170_s24 + $0x20] sm:$0xff] %vm274_vm2, %v260_v23  ;;  %278 = vst.msk [vmem:[%s170_s24 + $0x18] sm:$0xff] %vm274_vm2, %v255_v24  ;;  %v263_v30 = vadd.f32 %v347_v14, %v262_v29 }
  0xed   : > { %282 = vst.msk [vmem:[%s170_s24 + $0x38] sm:$0xff] %vm274_vm2, %v271_v27  ;;  %276 = vst.msk [vmem:[%s170_s24 + $0x8] sm:$0xff] %vm274_vm2, %v247_v28 }
  0xee   : > { %280 = vst.msk [vmem:[%s170_s24 + $0x28] sm:$0xff] %vm274_vm2, %v263_v30 }
  0xef PF: > { %s13_s12 = sadd.s32 1, %s389_s12  }
  0xf0   : > { %p10_p4 = scmp.ge.s32.totalorder %s13_s12, 4  }
  0xf2   :  { %12 = sbr.rel (!%p10_p4) target bundleno = 1 (0x1), region = 62 }

// kernel: up_forward.5
= control target key start
LH: loop header
LB: loop body
LE: loop exit
PB: predicated region body
PF: predicated region fallthrough
CT: control target
= control target key end

     0   :  { %s2392_s27 = smov 0   ;;  %s2394_s28 = smov 0   ;;  %s3187_s0 = inlined_call_operand.vmem [shape: f32[2,16,16,8], index: 0, kind: input, shape index: {}, may-alias: {0,1,2}]   ;;  %s3188_s1 = inlined_call_operand.vmem [shape: f32[2,16,16,8], index: 1, kind: input, shape index: {}, may-alias: {0,1,2}]   ;;  %s3189_s2 = inlined_call_operand.vmem [shape: f32[2,16,16,8], index: 2, kind: input, shape index: {}, may-alias: {0,1,2}]   ;;  %s3190_s3 = inlined_call_operand.vmem [shape: f32[1,1,8], index: 3, kind: input, shape index: {}]   ;;  %s3191_s4 = inlined_call_operand.vmem [shape: f32[1,1,8], index: 4, kind: input, shape index: {}]   ;;  %s3192_s5 = inlined_call_operand.vmem [shape: bf16[72,8], index: 5, kind: input, shape index: {}]   ;;  %s3193_s6 = inlined_call_operand.vmem [shape: f32[1,8], index: 6, kind: input, shape index: {}]   ;;  %s3194_s7 = inlined_call_operand.vmem [shape: f32[2,16,16,8], index: 7, kind: output, shape index: {0}]   ;;  %s3195_s8 = inlined_call_operand.vmem [shape: f32[2,2,2,8], index: 8, kind: output, shape index: {1}]  }
   0x1   :  { %s2396_s29 = smov 0   ;;  %s2398_s30 = smov 0  }
   0x2   :  { %s2400_s9 = smov 0  }
   0x3 LB: > { %s28_s10 = sadd.s32 1, %s2329_s29  ;;  %s31_s11 = sadd.s32 1, %s2333_s30  ;;  %s2337_s9 = sphi %s2400_s9, %s19_s9   ;;  %s2333_s30 = sphi %s2398_s30, %s3202_s30   ;;  %s2329_s29 = sphi %s2396_s29, %s3201_s29   ;;  %s2325_s28 = sphi %s2394_s28, %s3200_s28   ;;  %s2321_s27 = sphi %s2392_s27, %s3199_s27  }
   0x4   : > { %p29_p0 = scmp.ge.s32.totalorder %s28_s10, 2  ;;  %p1827_p1 = scmp.ge.s32.totalorder %s2337_s9, 1 }
   0x5   : > { %p353_p2 = scmp.lt.s32.totalorder %s2337_s9, 5 }
   0x6   : > { %s3204_s10 = smov (%p29_p0, %s28_s10), 0  ;;  %s3206_s11 = smov (!%p29_p0, %s31_s11), %s2333_s30 }
   0x7   : > { %p354_p3 = pnand %p1827_p1, %p353_p2  ;;  %p33_p4 = scmp.ge.s32.totalorder %s3206_s11, 2 }
   0x8   : > { %s2425_s12 = sshll.u32 (!%p354_p3), %s2321_s27, 3  ;;  %p432_p5 = scmp.lt.s32.totalorder (!%p354_p3), %s2325_s28, 1  ;;  %v2441_v0 = vld [vmem:[%s3190_s3] ss:$0 sm:$0xff] (!%p354_p3)  ;;  %vm622_vm0 = vcmask (!%p354_p3), 1040384   ;;  %vm758_vm1 = vcmask (!%p354_p3), 1045504  }
   0x9   : > { %s3208_s11 = smov (%p33_p4, %s3206_s11), 0  ;;  %357 = sbr.rel (%p354_p3) target bundleno = 521 (0x209), region = 48 }
   0xa   : > { %p434_p6 = scmp.lt.s32.totalorder (!%p354_p3), %s2425_s12, 15  ;;  %v2453_v1 = vld [vmem:[%s3191_s4] ss:$0 sm:$0xff] (!%p354_p3)  ;;  %s1833_s25 = sadd.s32 (!%p354_p3), 4294967295, %s2425_s12  ;;  %vm717_vm2 = vcmask (!%p354_p3), 1046528   ;;  %vm1419_vm5 = vcmask (!%p354_p3), 1043456  }
   0xb   : > { %p444_p7 = scmp.gt.s32.totalorder (!%p354_p3), %s1833_s25, 0  ;;  %p1834_p8 = scmp.lt.s32.totalorder (!%p354_p3), %s1833_s25, 15  ;;  %v2294_v60 = vld [vmem:[%s3192_s5] sm:$0xff] (!%p354_p3)   ;;  %vm1207_vm6 = vcmask (!%p354_p3), 64512   ;;  %vm1224_vm7 = vcmask (!%p354_p3), 130048   ;;  %vm1241_vm8 = vcmask (!%p354_p3), 195584  }
   0xc   : > { %p496_p10 = scmp.eq.s32.totalorder (!%p354_p3), %s2321_s27, 0  ;;  %s2339_s20 = smov (!%p354_p3), 24   ;;  %1888 = vmatprep.subr.bf16.mxu0 (!%p354_p3), %v2294_v60  ;;  %1914 = vmatprep.subr.bf16.mxu1 (!%p354_p3), %v2294_v60  ;;  %vm1258_vm9 = vcmask (!%p354_p3), 261120   ;;  %vm1275_vm10 = vcmask (!%p354_p3), 326656   ;;  %vm1292_vm11 = vcmask (!%p354_p3), 392192   ;;  %vm1309_vm12 = vcmask (!%p354_p3), 457728  }
   0xd   : > { %1889 = vmatpush3.bf16.msra.mxu0 (!%p354_p3), %v2294_v60  ;;  %1919 = vmatpush3.bf16.msra.mxu1 (!%p354_p3), %v2294_v60  ;;  %s2341_s23 = smov (!%p354_p3), 16   ;;  %s2343_s18 = smov (!%p354_p3), 32   ;;  %vm1326_vm13 = vcmask (!%p354_p3), 523264   ;;  %vm1394_vm14 = vcmask (!%p354_p3), 588800   ;;  %vm1611_vm15 = vcmask (!%p354_p3), 58368  }
   0xe   : > { %p497_p11 = scmp.eq.s32.totalorder (!%p354_p3), %s2321_s27, 1  ;;  %p489_p12 = scmp.lt.s32.totalorder (!%p354_p3), %s2321_s27, 1 }
  0x10   : > { %s3210_s28 = smov (!%p432_p5, %s2325_s28), 1  ;;  %s3218_s27 = smov (!%p489_p12, %s2321_s27), 1 }
  0x11   : > { %s435_s13 = scalar_select %p434_p6, %s2425_s12, 15 }
  0x12   : > { %s2432_s14 = sshll.u32 %s3210_s28, 5 }
  0x13   : > { %s1829_s15 = sshll.u32 %s435_s13, 1  ;;  %s460_s13 = sadd.s32 8, %s2425_s12 }
  0x14   : > { %s2435_s16 = sadd.s32 %s2432_s14, %s1829_s15  ;;  %p2476_p9 = scmp.lt.s32.totalorder %s460_s13, 15 }
  0x15   : > { %s1831_s17 = sshll.u32 %s2435_s16, 3  ;;  %s1853_s16 = sshll.u32 %s3210_s28, 1 }
  0x16   : > { %s2448_s22 = scalar_lea.vmem %s3187_s0, %s1831_s17  ;;  %s3214_s13 = smov (!%p2476_p9, %s460_s13), 15 }
  0x17   : > { %v502_v2 = vld [vmem:[%s2448_s22 + $0x10] sm:$0xff]  ;;  %v503_v3 = vld [vmem:[%s2448_s22 + $0x18] sm:$0xff]  ;;  %v500_v4 = vld [vmem:[%s2448_s22] sm:$0xff]  ;;  %s445_s26 = scalar_select %p444_p7, %s1833_s25, 0 }
  0x18   : > { %v540_v5 = vmul.f32 %v2441_v0, %v502_v2  ;;  %v541_v6 = vmul.f32 %v2441_v0, %v503_v3  ;;  %v501_v7 = vld [vmem:[%s2448_s22 + $0x8] sm:$0xff]  ;;  %v538_v8 = vmul.f32 %v2441_v0, %v500_v4  ;;  %v504_v9 = vld [vmem:[%s2448_s22 + $0x20] sm:$0xff]  ;;  %v506_v43 = vld [vmem:[%s2448_s22 + $0x30] sm:$0xff]  ;;  %s3216_s13 = smov (!%p2476_p9, %s3214_s13), 15 }
  0x19   : > { %v505_v10 = vld [vmem:[%s2448_s22 + $0x28] sm:$0xff]  ;;  %v539_v11 = vmul.f32 %v2441_v0, %v501_v7  ;;  %v542_v12 = vmul.f32 %v2441_v0, %v504_v9  ;;  %s3212_s26 = smov (!%p1834_p8, %s445_s26), 15  ;;  %v507_v48 = vld [vmem:[%s2448_s22 + $0x38] sm:$0xff]  ;;  %v544_v56 = vmul.f32 %v2441_v0, %v506_v43 }
  0x1a   : > { %v543_v13 = vmul.f32 %v2441_v0, %v505_v10  ;;  %v556_v14 = vadd.f32 %v2453_v1, %v540_v5  ;;  %v557_v15 = vadd.f32 %v2453_v1, %v541_v6  ;;  %v554_v16 = vadd.f32 %v2453_v1, %v538_v8  ;;  %s1839_s15 = sshll.u32 %s3212_s26, 1  ;;  %s2540_s26 = sshll.u32 %s3216_s13, 1 }
  0x1b   : > { %v555_v17 = vadd.f32 %v2453_v1, %v539_v11  ;;  %v558_v18 = vadd.f32 %v2453_v1, %v542_v12  ;;  %s452_s19 = sadd.s32 %s1839_s15, %s2432_s14  ;;  %v545_v59 = vmul.f32 %v2441_v0, %v507_v48  ;;  %s469_s13 = sadd.s32 %s2540_s26, %s2432_s14  ;;  %v560_v10 = vadd.f32 %v2453_v1, %v544_v56  ;;  %v2297_v48 = vld [vmem:[%s3192_s5 + $0x18] sm:$0xff]  }
  0x1c   : > { %v559_v19 = vadd.f32 %v2453_v1, %v543_v13  ;;  %v572_v20 = vmax.f32 %v556_v14, 0.0  ;;  %v573_v21 = vmax.f32 %v557_v15, 0.0  ;;  %v570_v22 = vmax.f32 %v554_v16, 0.0  ;;  %s1841_s12 = sshll.u32 %s452_s19, 3  ;;  %s2340_s19 = smov 48   ;;  %v2295_v14 = vld [vmem:[%s3192_s5 + $0x8] sm:$0xff]  }
  0x1d   : > { %v571_v23 = vmax.f32 %v555_v17, 0.0  ;;  %v574_v24 = vmax.f32 %v558_v18, 0.0  ;;  %s454_s24 = scalar_lea.vmem %s3188_s1, %s1841_s12  ;;  %v561_v13 = vadd.f32 %v2453_v1, %v545_v59  ;;  %1890 = vmatprep.subr.bf16.mxu0 %v2295_v14  ;;  %1915 = vmatprep.subr.bf16.mxu1 %v2295_v14  ;;  %s2345_s15 = smov 56  }
  0x1e   : > { %v575_v25 = vmax.f32 %v559_v19, 0.0  ;;  %v629_v26 = vrot.slane %v572_v20, 7  ;;  %v630_v27 = vrot.slane %v573_v21, 7  ;;  %v626_v28 = vrot.slane %v570_v22, 7  ;;  %s2534_s25 = scalar_select %p496_p10, 1, 0  ;;  %1891 = vmatpush3.bf16.msra.mxu0 %v2295_v14  ;;  %1920 = vmatpush3.bf16.msra.mxu1 %v2295_v14 }
  0x1f   : > { %v627_v29 = vrot.slane %v571_v23, 7  ;;  %v632_v30 = vrot.slane %v574_v24, 7  ;;  %v498_v3 = vld [vmem:[%s454_s24] sm:$0xff]  ;;  %v499_v4 = vld [vmem:[%s454_s24 + $0x8] sm:$0xff]  ;;  %s2342_s24 = smov 8   ;;  %s2346_s12 = smov 64  }
  0x20   : > { %v633_v31 = vrot.slane %v575_v25, 7  ;;  %v2482_v32 = vsel %vm622_vm0, %v629_v26, %v630_v27  ;;  %v2485_v33 = vsel %vm622_vm0, 0.0, %v629_v26  ;;  %v2488_v34 = vsel %vm622_vm0, 0.0, %v626_v28  ;;  %v513_v23 = vld [vmem:[%s2448_s22 + $0x68] sm:$0xff]  ;;  %s597_s21 = scalar_select %p497_p11, 1, 0 }
  0x21   : > { %v2491_v35 = vsel %vm622_vm0, %v630_v27, 0.0  ;;  %v1979_v36 = vpack.i.bf16 %v2482_v32, %v2485_v33  ;;  %v2496_v37 = vsel %vm622_vm0, %v626_v28, %v627_v29  ;;  %v2502_v39 = vsel %vm622_vm0, 0.0, %v632_v30  ;;  %v2296_v27 = vld [vmem:[%s3192_s5 + $0x10] sm:$0xff]  }
  0x22   : > { %v2499_v38 = vsel %vm622_vm0, %v632_v30, %v633_v31  ;;  %v1974_v40 = vpack.i.bf16 %v2496_v37, %v2488_v34  ;;  %v692_v42 = vsel %vm622_vm0, %v627_v29, 0.0  ;;  %v764_v44 = vrot.slane %v2488_v34, 2  ;;  %1892 = vmatprep.subr.bf16.mxu0 %v2296_v27  ;;  %1916 = vmatprep.subr.bf16.mxu1 %v2296_v27 }
  0x23   : > { %v2509_v41 = vpack.i.bf16 %v2499_v38, %v2502_v39  ;;  %1980 = vrot.lane.b32.xlu1 %v1979_v36, %s2339_s20  ;;  %v765_v45 = vrot.slane %v2496_v37, 2  ;;  %v767_v46 = vrot.slane %v692_v42, 2  ;;  %v723_v47 = vrot.slane %v2488_v34, 1  ;;  %1893 = vmatpush3.bf16.msra.mxu0 %v2296_v27 }
  0x24   : > { %1975 = vrot.lane.b32.xlu0 %v1974_v40, %s2339_s20  ;;  %v724_v49 = vrot.slane %v2496_v37, 1  ;;  %v726_v50 = vrot.slane %v692_v42, 1  ;;  %v728_v51 = vrot.slane %v2485_v33, 1  ;;  %v729_v52 = vrot.slane %v2482_v32, 1  ;;  %1921 = vmatpush3.bf16.msra.mxu1 %v2296_v27 }
  0x25   : > { %v766_v53 = vsel %vm758_vm1, %v764_v44, %v765_v45  ;;  %v768_v54 = vsel %vm758_vm1, %v765_v45, %v767_v46  ;;  %v731_v55 = vrot.slane %v2491_v35, 1  ;;  %v769_v2 = vrot.slane %v2485_v33, 2  ;;  %v508_v46 = vld [vmem:[%s2448_s22 + $0x40] sm:$0xff]  ;;  %1894 = vmatprep.subr.bf16.mxu0 %v2297_v48  ;;  %1917 = vmatprep.subr.bf16.mxu1 %v2297_v48 }
  0x26   : > { %v725_v57 = vsel %vm717_vm2, %v723_v47, %v724_v49  ;;  %v727_v58 = vsel %vm717_vm2, %v724_v49, %v726_v50  ;;  %v2547_v61 = vpack.i.bf16 %v768_v54, %v766_v53  ;;  %v730_v63 = vsel %vm717_vm2, %v728_v51, %v729_v52  ;;  %v509_v47 = vld [vmem:[%s2448_s22 + $0x48] sm:$0xff] }
  0x27   : > { %1990 = vrot.lane.b32.xlu1 %v2509_v41, %s2340_s19  ;;  %v1994_v62 = vpack.i.bf16 %v727_v58, %v725_v57  ;;  %v732_v5 = vsel %vm717_vm2, %v729_v52, %v731_v55  ;;  %v770_v6 = vrot.slane %v2482_v32, 2  ;;  %v772_v7 = vrot.slane %v2491_v35, 2  ;;  %1895 = vmatpush3.bf16.msra.mxu0 %v2297_v48 }
  0x28   : > { %1985 = vrot.lane.b32.xlu0 %v1979_v36, %s2340_s19  ;;  %v2558_v8 = vsel %vm622_vm0, %v633_v31, 0.0  ;;  %v593_v9 = vstv %s2534_s25  ;;  %v526_v11 = vmul.f32 %v2441_v0, %v498_v3  ;;  %v527_v12 = vmul.f32 %v2441_v0, %v499_v4  ;;  %s2344_s25 = smov 40   ;;  %1922 = vmatpush3.bf16.msra.mxu1 %v2297_v48 }
  0x29   : > { %v2570_v15 = vpack.i.bf16 %v732_v5, %v730_v63  ;;  %v733_v16 = vrot.slane %v2502_v39, 1  ;;  %v734_v17 = vrot.slane %v2499_v38, 1  ;;  %v736_v18 = vrot.slane %v2558_v8, 1 }
  0x2a   : > { %v771_v19 = vsel %vm758_vm1, %v769_v2, %v770_v6  ;;  %v773_v20 = vsel %vm758_vm1, %v770_v6, %v772_v7  ;;  %v534_v21 = vadd.f32 %v2453_v1, %v526_v11  ;;  %v535_v22 = vadd.f32 %v2453_v1, %v527_v12  ;;  %v510_v6 = vld [vmem:[%s2448_s22 + $0x50] sm:$0xff] }
  0x2b   : > { %2000 = vrot.lane.b32.xlu1 %v2547_v61, %s2341_s23  ;;  %vm2580_vm3 = vcmp.eq.s32.totalorder %v593_v9, 1  ;;  %v576_v26 = vmax.f32 %v560_v10, 0.0  ;;  %v2589_v28 = vpack.i.bf16 %v773_v20, %v771_v19  ;;  %v735_v29 = vsel %vm717_vm2, %v733_v16, %v734_v17  ;;  %v511_v16 = vld [vmem:[%s2448_s22 + $0x58] sm:$0xff] }
  0x2c   : > { %1995 = vrot.lane.b32.xlu0 %v1994_v62, %s2342_s24  ;;  %v536_v24 = vmax.f32 %v534_v21, 0.0  ;;  %v537_v25 = vmax.f32 %v535_v22, 0.0  ;;  %v737_v30 = vsel %vm717_vm2, %v734_v17, %v736_v18  ;;  %v577_v31 = vmax.f32 %v561_v13, 0.0  ;;  %v512_v18 = vld [vmem:[%s2448_s22 + $0x60] sm:$0xff] }
  0x2d   : > { %v2598_v43 = vpack.i.bf16 %v737_v30, %v735_v29  ;;  %v774_v44 = vrot.slane %v2502_v39, 2  ;;  %v635_v45 = vrot.slane %v576_v26, 7  ;;  %v546_v59 = vmul.f32 %v2441_v0, %v508_v46 }
  0x2e   : > { %v595_v35 = vsel %vm2580_vm3, 0.0, %v536_v24  ;;  %v596_v36 = vsel %vm2580_vm3, 0.0, %v537_v25  ;;  %v636_v52 = vrot.slane %v577_v31, 7  ;;  %v547_v60 = vmul.f32 %v2441_v0, %v509_v47  ;;  %v514_v24 = vld [vmem:[%s2448_s22 + $0x70] sm:$0xff] }
  0x2f   : > { %2010 = vrot.lane.b32.xlu1 %v2570_v15, %s2343_s18  ;;  %v623_v40 = vrot.slane %v595_v35, 7  ;;  %v624_v42 = vrot.slane %v596_v36, 7  ;;  %v775_v63 = vrot.slane %v2499_v38, 2  ;;  %v777_v2 = vrot.slane %v2558_v8, 2 }
  0x30   : > { %2005 = vrot.lane.b32.xlu0 %v1994_v62, %s2343_s18  ;;  %v2635_v8 = vsel %vm622_vm0, %v635_v45, %v636_v52  ;;  %v2638_v9 = vsel %vm622_vm0, 0.0, %v635_v45  ;;  %v695_v10 = vsel %vm622_vm0, %v636_v52, 0.0  ;;  %v562_v11 = vadd.f32 %v2453_v1, %v546_v59 }
  0x31   : > { %v2609_v49 = vsel %vm622_vm0, %v623_v40, %v624_v42  ;;  %v2612_v50 = vsel %vm622_vm0, 0.0, %v623_v40  ;;  %v691_v51 = vsel %vm622_vm0, %v624_v42, 0.0  ;;  %v563_v12 = vadd.f32 %v2453_v1, %v547_v60  ;;  %v515_v60 = vld [vmem:[%s2448_s22 + $0x78] sm:$0xff]  ;;  %s1848_s22 = sshll.u32 %s469_s13, 3 }
  0x32   : > { %v759_v53 = vrot.slane %v2612_v50, 2  ;;  %v760_v54 = vrot.slane %v2609_v49, 2  ;;  %v762_v55 = vrot.slane %v691_v51, 2  ;;  %v718_v56 = vrot.slane %v2612_v50, 1  ;;  %s471_s13 = scalar_lea.vmem %s3189_s2, %s1848_s22 }
  0x33   : > { %2020 = vrot.lane.b32.xlu1 %v2589_v28, %s2344_s25  ;;  %v719_v57 = vrot.slane %v2609_v49, 1  ;;  %v721_v58 = vrot.slane %v691_v51, 1  ;;  %v776_v13 = vsel %vm758_vm1, %v774_v44, %v775_v63  ;;  %v778_v14 = vsel %vm758_vm1, %v775_v63, %v777_v2 }
  0x34   : > { %2015 = vrot.lane.b32.xlu0 %v2547_v61, %s2344_s25  ;;  %v761_v62 = vsel %vm758_vm1, %v759_v53, %v760_v54  ;;  %v763_v61 = vsel %vm758_vm1, %v760_v54, %v762_v55  ;;  %v548_v17 = vmul.f32 %v2441_v0, %v510_v6  ;;  %v738_v19 = vrot.slane %v2638_v9, 1 }
  0x35   : > { %v2044_v3 = vpack.i.bf16 %v763_v61, %v761_v62  ;;  %v720_v4 = vsel %vm717_vm2, %v718_v56, %v719_v57  ;;  %v722_v5 = vsel %vm717_vm2, %v719_v57, %v721_v58  ;;  %v739_v20 = vrot.slane %v2635_v8, 1 }
  0x36   : > { %v2034_v7 = vpack.i.bf16 %v722_v5, %v720_v4  ;;  %v578_v21 = vmax.f32 %v562_v11, 0.0  ;;  %v579_v22 = vmax.f32 %v563_v12, 0.0  ;;  %v741_v25 = vrot.slane %v695_v10, 1 }
  0x37   : > { %2030 = vrot.lane.b32.xlu1 %v2598_v43, %s2345_s15  ;;  %v779_v26 = vrot.slane %v2638_v9, 2  ;;  %v780_v27 = vrot.slane %v2635_v8, 2  ;;  %v782_v29 = vrot.slane %v695_v10, 2  ;;  %v549_v35 = vmul.f32 %v2441_v0, %v511_v16 }
  0x38   : > { %2025 = vrot.lane.b32.xlu0 %v2570_v15, %s2345_s15  ;;  %v638_v30 = vrot.slane %v578_v21, 7  ;;  %v639_v31 = vrot.slane %v579_v22, 7  ;;  %v564_v36 = vadd.f32 %v2453_v1, %v548_v17  ;;  %v550_v40 = vmul.f32 %v2441_v0, %v512_v18 }
  0x39   : > { %v551_v42 = vmul.f32 %v2441_v0, %v513_v23  ;;  %v552_v44 = vmul.f32 %v2441_v0, %v514_v24  ;;  %v2663_v45 = vpack.i.bf16 %v778_v14, %v776_v13  ;;  %v565_v46 = vadd.f32 %v2453_v1, %v549_v35 }
  0x3a   : > { %v740_v47 = vsel %vm717_vm2, %v738_v19, %v739_v20  ;;  %v742_v48 = vsel %vm717_vm2, %v739_v20, %v741_v25  ;;  %v781_v51 = vsel %vm758_vm1, %v779_v26, %v780_v27  ;;  %v783_v52 = vsel %vm758_vm1, %v780_v27, %v782_v29 }
  0x3b   : > { %2045 = vrot.lane.b32.xlu1 %v2044_v3, %s2341_s23  ;;  %v2673_v53 = vsel %vm622_vm0, %v638_v30, %v639_v31  ;;  %v580_v54 = vmax.f32 %v564_v36, 0.0  ;;  %v2680_v55 = vpack.i.bf16 %v2635_v8, %v2638_v9  ;;  %v2683_v56 = vsel %vm622_vm0, %v639_v31, 0.0 }
  0x3c   : > { %2035 = vrot.lane.b32.xlu0 %v2034_v7, %s2342_s24  ;;  %v581_v57 = vmax.f32 %v565_v46, 0.0  ;;  %v2687_v58 = vpack.i.bf16 %v742_v48, %v740_v47  ;;  %v2689_v59 = vpack.i.bf16 %v783_v52, %v781_v51  ;;  %v744_v3 = vrot.slane %v2673_v53, 1  ;;  %v516_v48 = vld [vmem:[%s471_s13] sm:$0xff] }
  0x3d   : > { %v641_v63 = vrot.slane %v580_v54, 7  ;;  %v746_v4 = vrot.slane %v2683_v56, 1  ;;  %v566_v5 = vadd.f32 %v2453_v1, %v550_v40  ;;  %v567_v6 = vadd.f32 %v2453_v1, %v551_v42 }
  0x3e   : > { %v642_v2 = vrot.slane %v581_v57, 7  ;;  %v553_v12 = vmul.f32 %v2441_v0, %v515_v60  ;;  %v785_v22 = vrot.slane %v2673_v53, 2  ;;  %v568_v36 = vadd.f32 %v2453_v1, %v552_v44 }
  0x3f   : > { %2050 = vrot.lane.b32.xlu1 %v2570_v15, %s2342_s24  ;;  %v2676_v15 = vsel %vm622_vm0, 0.0, %v638_v30  ;;  %v2707_v10 = vsel %vm622_vm0, 0.0, %v641_v63  ;;  %v582_v21 = vmax.f32 %v566_v5, 0.0  ;;  %v583_v25 = vmax.f32 %v567_v6, 0.0  ;;  %v517_v6 = vld [vmem:[%s471_s13 + $0x8] sm:$0xff] }
  0x40   : > { %2040 = vrot.lane.b32.xlu0 %v2589_v28, %s2346_s12  ;;  %v2696_v62 = vpack.i.bf16 %v2673_v53, %v2676_v15  ;;  %v743_v61 = vrot.slane %v2676_v15, 1  ;;  %v2704_v7 = vsel %vm622_vm0, %v641_v63, %v642_v2  ;;  %v697_v11 = vsel %vm622_vm0, %v642_v2, 0.0 }
  0x41   : > { %v784_v13 = vrot.slane %v2676_v15, 2  ;;  %v748_v14 = vrot.slane %v2707_v10, 1  ;;  %v749_v16 = vrot.slane %v2704_v7, 1  ;;  %v751_v17 = vrot.slane %v697_v11, 1 }
  0x42   : > { %v789_v18 = vrot.slane %v2707_v10, 2  ;;  %v790_v19 = vrot.slane %v2704_v7, 2  ;;  %v792_v20 = vrot.slane %v697_v11, 2  ;;  %v644_v29 = vrot.slane %v582_v21, 7 }
  0x43   : > { %2060 = vrot.lane.b32.xlu1 %v2598_v43, %s2342_s24  ;;  %v750_v23 = vsel %vm717_vm2, %v748_v14, %v749_v16  ;;  %v752_v24 = vsel %vm717_vm2, %v749_v16, %v751_v17  ;;  %v645_v31 = vrot.slane %v583_v25, 7  ;;  %v745_v51 = vsel %vm717_vm2, %v743_v61, %v744_v3 }
  0x44   : > { %2055 = vrot.lane.b32.xlu0 %v2663_v45, %s2346_s12  ;;  %v2726_v26 = vpack.i.bf16 %v752_v24, %v750_v23  ;;  %v791_v27 = vsel %vm758_vm1, %v789_v18, %v790_v19  ;;  %v2740_v35 = vsel %vm622_vm0, 0.0, %v644_v29  ;;  %v747_v44 = vsel %vm717_vm2, %v744_v3, %v746_v4 }
  0x45   : > { %v2745_v40 = vsel %vm622_vm0, %v644_v29, %v645_v31  ;;  %v698_v42 = vsel %vm622_vm0, %v645_v31, 0.0  ;;  %v753_v46 = vrot.slane %v2740_v35, 1  ;;  %v794_v47 = vrot.slane %v2740_v35, 2 }
  0x46   : > { %v756_v52 = vrot.slane %v698_v42, 1  ;;  %v795_v54 = vrot.slane %v2745_v40, 2  ;;  %v797_v57 = vrot.slane %v698_v42, 2  ;;  %v569_v60 = vadd.f32 %v2453_v1, %v553_v12 }
  0x47   : > { %2070 = vrot.lane.b32.xlu1 %v2663_v45, %s2341_s23  ;;  %v584_v63 = vmax.f32 %v568_v36, 0.0  ;;  %v586_v11 = vmul.f32 %v2441_v0, %v516_v48  ;;  %v587_v17 = vmul.f32 %v2441_v0, %v517_v6  ;;  %v598_v23 = vstv %s597_s21 }
  0x48   : > { %2065 = vrot.lane.b32.xlu0 %v2589_v28, %s2341_s23  ;;  %v793_v28 = vsel %vm758_vm1, %v790_v19, %v792_v20  ;;  %v796_v5 = vsel %vm758_vm1, %v794_v47, %v795_v54  ;;  %v798_v3 = vsel %vm758_vm1, %v795_v54, %v797_v57  ;;  %v585_v4 = vmax.f32 %v569_v60, 0.0  ;;  %v2298_v57 = vld [vmem:[%s3192_s5 + $0x20] ss:$0 sps:$4 sm:$0xff]  }
  0x49   : > { %v2735_v30 = vpack.i.bf16 %v793_v28, %v791_v27  ;;  %v2768_v12 = vpack.i.bf16 %v798_v3, %v796_v5  ;;  %v647_v16 = vrot.slane %v584_v63, 7  ;;  %v588_v18 = vadd.f32 %v2453_v1, %v586_v11  ;;  %1924 = vmatprep.subr.msk.bf16.mxu0 %vm1419_vm5, %v2298_v57  ;;  %1925 = vmatprep.subr.msk.bf16.mxu1 %vm1419_vm5, %v2298_v57 }
  0x4a   : > { %v2776_v19 = vpack.i.bf16 %v747_v44, %v745_v51  ;;  %v787_v20 = vrot.slane %v2683_v56, 2  ;;  %v589_v56 = vadd.f32 %v2453_v1, %v587_v17  ;;  %vm599_vm4 = vcmp.eq.s32.totalorder %v598_v23, 1 }
  0x4b   : > { %2080 = vrot.lane.b32.xlu1 %v2680_v55, %s2339_s20  ;;  %v689_v21 = vsel %vm622_vm0, 0.0, %v647_v16  ;;  %v590_v42 = vmax.f32 %v588_v18, 0.0  ;;  %v786_v60 = vsel %vm758_vm1, %v784_v13, %v785_v22 }
  0x4c   : > { %2075 = vrot.lane.b32.xlu0 %v2509_v41, %s2339_s20  ;;  %v754_v41 = vrot.slane %v2745_v40, 1  ;;  %v801_v27 = vrot.slane %v689_v21, 1  ;;  %v806_v28 = vrot.slane %v689_v21, 2 }
  0x4d   : > { %v600_v54 = vsel %vm599_vm4, 0.0, %v590_v42 }
  0x4e   : > { %v755_v2 = vsel %vm717_vm2, %v753_v46, %v754_v41  ;;  %v757_v61 = vsel %vm717_vm2, %v754_v41, %v756_v52  ;;  %v591_v52 = vmax.f32 %v589_v56, 0.0  ;;  %v650_v1 = vrot.slane %v600_v54, 7 }
  0x4f   : > { %2090 = vrot.lane.b32.xlu1 %v2687_v58, %s2343_s18  ;;  %v2765_v14 = vpack.i.bf16 %v757_v61, %v755_v2  ;;  %v788_v61 = vsel %vm758_vm1, %v785_v22, %v787_v20 }
  0x50   : > { %2085 = vrot.lane.b32.xlu0 %v2598_v43, %s2343_s18  ;;  %v648_v43 = vrot.slane %v585_v4, 7  ;;  %v690_v2 = vsel %vm622_vm0, 0.0, %v650_v1  ;;  %v1421_v4 = vsel %vm1419_vm5, %v2298_v57, 0  ;;  %v2134_v22 = vpack.i.bf16 %v788_v61, %v786_v60 }
  0x51   : > { %v813_v5 = vrot.slane %v690_v2, 1  ;;  %v818_v6 = vrot.slane %v690_v2, 2  ;;  %1897 = vmatpush3.bf16.msra.mxu0 %v1421_v4  ;;  %1923 = vmatpush3.bf16.msra.mxu1 %v1421_v4 }
  0x52   : > { %v649_v24 = vsel %vm622_vm0, %v647_v16, %v648_v43  ;;  %v699_v25 = vsel %vm622_vm0, %v648_v43, 0.0 }
  0x53   : > { %2100 = vrot.lane.b32.xlu1 %v2689_v59, %s2344_s25  ;;  %v2782_v29 = vpack.i.bf16 %v649_v24, %v689_v21  ;;  %v802_v0 = vrot.slane %v649_v24, 1  ;;  %v804_v31 = vrot.slane %v699_v25, 1  ;;  %v807_v36 = vrot.slane %v649_v24, 2 }
  0x54   : > { %2095 = vrot.lane.b32.xlu0 %v2663_v45, %s2344_s25  ;;  %v809_v45 = vrot.slane %v699_v25, 2 }
  0x55   : > { %v803_v46 = vsel %vm717_vm2, %v801_v27, %v802_v0  ;;  %v805_v47 = vsel %vm717_vm2, %v802_v0, %v804_v31  ;;  %v808_v48 = vsel %vm758_vm1, %v806_v28, %v807_v36  ;;  %v2159_v27 = vpack.i.bf16 %v2704_v7, %v2707_v10 }
  0x56   : > { %v2792_v51 = vpack.i.bf16 %v805_v47, %v803_v46  ;;  %v810_v41 = vsel %vm758_vm1, %v807_v36, %v809_v45  ;;  %v2189_v28 = vpack.i.bf16 %v2745_v40, %v2740_v35 }
  0x57   : > { %2110 = vrot.lane.b32.xlu1 %v2696_v62, %s2340_s19  ;;  %v2795_v44 = vpack.i.bf16 %v810_v41, %v808_v48 }
  0x58   : > { %2105 = vrot.lane.b32.xlu0 %v2680_v55, %s2340_s19  ;;  %v601_v55 = vsel %vm599_vm4, 0.0, %v591_v52 }
  0x59   : > { %v651_v63 = vrot.slane %v601_v55, 7 }
  0x5b   : > { %2120 = vrot.lane.b32.xlu1 %v2776_v19, %s2345_s15  ;;  %v652_v11 = vsel %vm622_vm0, %v650_v1, %v651_v63  ;;  %v700_v3 = vsel %vm622_vm0, %v651_v63, 0.0 }
  0x5c   : > { %2115 = vrot.lane.b32.xlu0 %v2687_v58, %s2345_s15  ;;  %v2269_v13 = vpack.i.bf16 %v652_v11, %v690_v2  ;;  %v814_v16 = vrot.slane %v652_v11, 1  ;;  %v819_v43 = vrot.slane %v652_v11, 2  ;;  %v816_v17 = vrot.slane %v700_v3, 1 }
  0x5d   : > { %v821_v18 = vrot.slane %v700_v3, 2 }
  0x5e   : > { %v815_v20 = vsel %vm717_vm2, %v813_v5, %v814_v16  ;;  %v817_v21 = vsel %vm717_vm2, %v814_v16, %v816_v17  ;;  %v820_v23 = vsel %vm758_vm1, %v818_v6, %v819_v43 }
  0x5f   : > { %2130 = vrot.lane.b32.xlu1 %v2687_v58, %s2342_s24  ;;  %v2279_v24 = vpack.i.bf16 %v817_v21, %v815_v20  ;;  %v822_v58 = vsel %vm758_vm1, %v819_v43, %v821_v18 }
  0x60   : > { %2125 = vrot.lane.b32.xlu0 %v2689_v59, %s2346_s12  ;;  %v2289_v25 = vpack.i.bf16 %v822_v58, %v820_v23 }
  0x63   : > { %2140 = vrot.lane.b32.xlu1 %v2776_v19, %s2342_s24 }
  0x64   : > { %2135 = vrot.lane.b32.xlu0 %v2134_v22, %s2346_s12 }
  0x67   : > { %2150 = vrot.lane.b32.xlu1 %v2134_v22, %s2341_s23 }
  0x68   : > { %2145 = vrot.lane.b32.xlu0 %v2689_v59, %s2341_s23 }
  0x6b   : > { %2160 = vrot.lane.b32.xlu1 %v2159_v27, %s2339_s20 }
  0x6c   : > { %2155 = vrot.lane.b32.xlu0 %v2696_v62, %s2339_s20 }
  0x6f   : > { %2170 = vrot.lane.b32.xlu1 %v2726_v26, %s2343_s18 }
  0x70   : > { %2165 = vrot.lane.b32.xlu0 %v2776_v19, %s2343_s18 }
  0x73   : > { %2180 = vrot.lane.b32.xlu1 %v2735_v30, %s2344_s25 }
  0x74   : > { %2175 = vrot.lane.b32.xlu0 %v2134_v22, %s2344_s25 }
  0x77   : > { %2190 = vrot.lane.b32.xlu1 %v2189_v28, %s2340_s19 }
  0x78   : > { %2185 = vrot.lane.b32.xlu0 %v2159_v27, %s2340_s19 }
  0x7b   : > { %2200 = vrot.lane.b32.xlu1 %v2765_v14, %s2345_s15 }
  0x7c   : > { %2195 = vrot.lane.b32.xlu0 %v2726_v26, %s2345_s15 }
  0x7f   : > { %2210 = vrot.lane.b32.xlu1 %v2726_v26, %s2342_s24 }
  0x80   : > { %2205 = vrot.lane.b32.xlu0 %v2735_v30, %s2346_s12 }
  0x83   : > { %2220 = vrot.lane.b32.xlu1 %v2765_v14, %s2342_s24 }
  0x84   : > { %2215 = vrot.lane.b32.xlu0 %v2768_v12, %s2346_s12 }
  0x87   : > { %2230 = vrot.lane.b32.xlu1 %v2768_v12, %s2341_s23 }
  0x88   : > { %2225 = vrot.lane.b32.xlu0 %v2735_v30, %s2341_s23 }
  0x8b   : > { %2240 = vrot.lane.b32.xlu1 %v2782_v29, %s2339_s20 }
  0x8c   : > { %2235 = vrot.lane.b32.xlu0 %v2189_v28, %s2339_s20 }
  0x8f   : > { %2250 = vrot.lane.b32.xlu1 %v2792_v51, %s2343_s18 }
  0x90   : > { %2245 = vrot.lane.b32.xlu0 %v2765_v14, %s2343_s18  ;;  %s3083_s18 = scalar_lea.vmem %s3194_s7, %s1831_s17  ;;  %s492_s17 = sadd.s32 %s1853_s16, %s3218_s27 }
  0x93   : > { %2260 = vrot.lane.b32.xlu1 %v2795_v44, %s2344_s25 }
  0x94   : > { %2255 = vrot.lane.b32.xlu0 %v2768_v12, %s2344_s25  ;;  %s1854_s25 = sshll.u32 %s492_s17, 1 }
  0x95   : > { %v1981_v59 = vpop.permute.xlu1 %1980  ;;  %s494_s26 = scalar_lea.vmem %s3195_s8, %s1854_s25 }
  0x96   : > { %v2872_v62 = vpop.permute.xlu0 %1975  ;;  %v1983_v52 = vunpack.i.h.bf16 %v1981_v59  ;;  %v1982_v54 = vunpack.i.l.bf16 %v1981_v59 }
  0x97   : > { %2270 = vrot.lane.b32.xlu1 %v2269_v13, %s2340_s19  ;;  %v1978_v63 = vunpack.i.h.bf16 %v2872_v62  ;;  %v1977_v2 = vunpack.i.l.bf16 %v2872_v62 }
  0x98   : > { %2265 = vrot.lane.b32.xlu0 %v2782_v29, %s2340_s19 }
  0x99   : > { %v2877_v26 = vpop.permute.xlu1 %1990 }
  0x9a   : > { %v2879_v30 = vpop.permute.xlu0 %1985  ;;  %v1993_v5 = vunpack.i.h.bf16 %v2877_v26  ;;  %v1992_v6 = vunpack.i.l.bf16 %v2877_v26 }
  0x9b   : > { %2280 = vrot.lane.b32.xlu1 %v2279_v24, %s2345_s15  ;;  %v1988_v22 = vunpack.i.h.bf16 %v2879_v30  ;;  %v1987_v18 = vunpack.i.l.bf16 %v2879_v30 }
  0x9c   : > { %2275 = vrot.lane.b32.xlu0 %v2792_v51, %s2345_s15 }
  0x9d   : > { %v2001_v14 = vpop.permute.xlu1 %2000 }
  0x9e   : > { %v1996_v19 = vpop.permute.xlu0 %1995  ;;  %v2003_v36 = vunpack.i.h.bf16 %v2001_v14  ;;  %v2002_v45 = vunpack.i.l.bf16 %v2001_v14 }
  0x9f   : > { %2290 = vrot.lane.b32.xlu1 %v2289_v25, %s2346_s12  ;;  %v1998_v0 = vunpack.i.h.bf16 %v1996_v19  ;;  %v1997_v31 = vunpack.i.l.bf16 %v1996_v19 }
  0xa0   : > { %2285 = vrot.lane.b32.xlu0 %v2795_v44, %s2346_s12 }
  0xa1   : > { %v2011_v12 = vpop.permute.xlu1 %2010  ;;  %v1211_v42 = vsel %vm1207_vm6, %v2496_v37, %v1998_v0  ;;  %v1210_v46 = vsel %vm1207_vm6, %v2488_v34, %v1997_v31 }
  0xa2   : > { %v2887_v29 = vpop.permute.xlu0 %2005  ;;  %v1228_v48 = vsel %vm1224_vm7, %v1211_v42, %v2003_v36  ;;  %v1227_v51 = vsel %vm1224_vm7, %v1210_v46, %v2002_v45  ;;  %v2013_v1 = vunpack.i.h.bf16 %v2011_v12  ;;  %v2012_v57 = vunpack.i.l.bf16 %v2011_v12 }
  0xa3   : > { %v1244_v37 = vsel %vm1241_vm8, %v1227_v51, %v1982_v54  ;;  %v1245_v34 = vsel %vm1241_vm8, %v1228_v48, %v1983_v52  ;;  %v2008_v23 = vunpack.i.h.bf16 %v2887_v29  ;;  %v2007_v24 = vunpack.i.l.bf16 %v2887_v29 }
  0xa4   : > { %v1261_v13 = vsel %vm1258_vm9, %v1244_v37, %v2012_v57  ;;  %v1262_v16 = vsel %vm1258_vm9, %v1245_v34, %v2013_v1 }
  0xa5   : > { %v2021_v56 = vpop.permute.xlu1 %2020 }
  0xa6   : > { %v2016_v47 = vpop.permute.xlu0 %2015  ;;  %v2023_v55 = vunpack.i.h.bf16 %v2021_v56  ;;  %v2022_v60 = vunpack.i.l.bf16 %v2021_v56 }
  0xa7   : > { %v2018_v28 = vunpack.i.h.bf16 %v2016_v47  ;;  %v2017_v59 = vunpack.i.l.bf16 %v2016_v47 }
  0xa8   : > { %v1278_v20 = vsel %vm1275_vm10, %v1261_v13, %v2022_v60  ;;  %v1279_v21 = vsel %vm1275_vm10, %v1262_v16, %v2023_v55 }
  0xa9   : > { %v2895_v41 = vpop.permute.xlu1 %2030  ;;  %v1295_v14 = vsel %vm1292_vm11, %v1278_v20, %v1992_v6  ;;  %v1296_v19 = vsel %vm1292_vm11, %v1279_v21, %v1993_v5 }
  0xaa   : > { %v2026_v44 = vpop.permute.xlu0 %2025  ;;  %v2033_v0 = vunpack.i.h.bf16 %v2895_v41 }
  0xab   : > { %v2028_v36 = vunpack.i.h.bf16 %v2026_v44  ;;  %v2027_v45 = vunpack.i.l.bf16 %v2026_v44 }
  0xac   : > { %v1313_v34 = vsel %vm1309_vm12, %v1296_v19, %v2033_v0 }
  0xad   : > { %v2046_v61 = vpop.permute.xlu1 %2045 }
  0xae   : > { %v2048_v11 = vunpack.i.h.bf16 %v2046_v61  ;;  %v2047_v3 = vunpack.i.l.bf16 %v2046_v61  ;;  %v2036_v4 = vpop.permute.xlu0 %2035 }
  0xaf   : > { %v2038_v43 = vunpack.i.h.bf16 %v2036_v4  ;;  %v2037_v17 = vunpack.i.l.bf16 %v2036_v4 }
  0xb1   : > { %v1209_v58 = vsel %vm1207_vm6, %v2609_v49, %v2038_v43  ;;  %v1208_v25 = vsel %vm1207_vm6, %v2612_v50, %v2037_v17  ;;  %v2915_v27 = vpop.permute.xlu1 %2050  ;;  %v2032_v50 = vunpack.i.l.bf16 %v2895_v41 }
  0xb2   : > { %v1226_v62 = vsel %vm1224_vm7, %v1209_v58, %v2048_v11  ;;  %v1225_v26 = vsel %vm1224_vm7, %v1208_v25, %v2047_v3  ;;  %v2041_v30 = vpop.permute.xlu0 %2040  ;;  %v2053_v20 = vunpack.i.h.bf16 %v2915_v27  ;;  %v2052_v21 = vunpack.i.l.bf16 %v2915_v27 }
  0xb3   : > { %v1243_v12 = vsel %vm1241_vm8, %v1226_v62, %v1978_v63  ;;  %v1242_v49 = vsel %vm1241_vm8, %v1225_v26, %v1977_v2  ;;  %v2043_v47 = vunpack.i.h.bf16 %v2041_v30  ;;  %v2042_v48 = vunpack.i.l.bf16 %v2041_v30 }
  0xb4   : > { %v1259_v31 = vsel %vm1258_vm9, %v1242_v49, %v2007_v24  ;;  %v1260_v29 = vsel %vm1258_vm9, %v1243_v12, %v2008_v23  ;;  %v1312_v44 = vsel %vm1309_vm12, %v1295_v14, %v2032_v50  ;;  %v1213_v49 = vsel %vm1207_vm6, %v2482_v32, %v2053_v20 }
  0xb5   : > { %v2061_v56 = vpop.permute.xlu1 %2060  ;;  %v1276_v42 = vsel %vm1275_vm10, %v1259_v31, %v2017_v59  ;;  %v1277_v46 = vsel %vm1275_vm10, %v1260_v29, %v2018_v28  ;;  %v1212_v27 = vsel %vm1207_vm6, %v2485_v33, %v2052_v21 }
  0xb6   : > { %v2056_v51 = vpop.permute.xlu0 %2055  ;;  %v1293_v52 = vsel %vm1292_vm11, %v1276_v42, %v1987_v18  ;;  %v1294_v54 = vsel %vm1292_vm11, %v1277_v46, %v1988_v22  ;;  %v2063_v22 = vunpack.i.h.bf16 %v2061_v56  ;;  %v2062_v18 = vunpack.i.l.bf16 %v2061_v56 }
  0xb7   : > { %v2058_v1 = vunpack.i.h.bf16 %v2056_v51  ;;  %v2057_v41 = vunpack.i.l.bf16 %v2056_v51  ;;  %v1310_v57 = vsel %vm1309_vm12, %v1293_v52, %v2027_v45  ;;  %v1311_v37 = vsel %vm1309_vm12, %v1294_v54, %v2028_v36 }
  0xb8   : > { %v1327_v55 = vsel %vm1326_vm13, %v1310_v57, %v2042_v48  ;;  %v1328_v60 = vsel %vm1326_vm13, %v1311_v37, %v2043_v47  ;;  %v1215_v30 = vsel %vm1207_vm6, %v2499_v38, %v2063_v22  ;;  %v1214_v14 = vsel %vm1207_vm6, %v2502_v39, %v2062_v18 }
  0xb9   : > { %v1329_v63 = vsel %vm1326_vm13, %v1312_v44, %v2057_v41  ;;  %v1330_v2 = vsel %vm1326_vm13, %v1313_v34, %v2058_v1  ;;  %v2071_v61 = vpop.permute.xlu1 %2070  ;;  %v1343_v5 = vpack.c.bf16 %v1328_v60, %v1327_v55 }
  0xba   : > { %v1344_v6 = vpack.c.bf16 %v1330_v2, %v1329_v63  ;;  %v2066_v11 = vpop.permute.xlu0 %2065  ;;  %v2073_v23 = vunpack.i.h.bf16 %v2071_v61  ;;  %v2072_v24 = vunpack.i.l.bf16 %v2071_v61 }
  0xbb   : > { %1898 = vmatprep.mubr.msk.bf16.mxu0 %vm1394_vm14, %v1343_v5  ;;  %v2068_v58 = vunpack.i.h.bf16 %v2066_v11  ;;  %v2067_v25 = vunpack.i.l.bf16 %v2066_v11 }
  0xbc   : > { %1899 = vmatmul.mubr.msk.bf16.vlgmr.msra.gmra.mrb[0].mxu0 %vm1394_vm14, %v1344_v6  ;;  %v1231_v0 = vsel %vm1224_vm7, %v1214_v14, %v2072_v24  ;;  %v1232_v50 = vsel %vm1224_vm7, %v1215_v30, %v2073_v23 }
  0xbd   : > { %v2081_v3 = vpop.permute.xlu1 %2080  ;;  %v1230_v31 = vsel %vm1224_vm7, %v1213_v49, %v2068_v58  ;;  %v1229_v29 = vsel %vm1224_vm7, %v1212_v27, %v2067_v25 }
  0xbe   : > { %v2076_v4 = vpop.permute.xlu0 %2075  ;;  %v2083_v59 = vunpack.i.h.bf16 %v2081_v3  ;;  %v2082_v62 = vunpack.i.l.bf16 %v2081_v3 }
  0xbf   : > { %v2078_v19 = vunpack.i.h.bf16 %v2076_v4  ;;  %v2077_v12 = vunpack.i.l.bf16 %v2076_v4 }
  0xc0   : > { %v1248_v39 = vsel %vm1241_vm8, %v1231_v0, %v2082_v62  ;;  %v1249_v56 = vsel %vm1241_vm8, %v1232_v50, %v2083_v59 }
  0xc1   : > { %v2941_v13 = vpop.permute.xlu1 %2090  ;;  %v1246_v33 = vsel %vm1241_vm8, %v1229_v29, %v2077_v12  ;;  %v1247_v47 = vsel %vm1241_vm8, %v1230_v31, %v2078_v19 }
  0xc2   : > { %v2086_v16 = vpop.permute.xlu0 %2085  ;;  %v2093_v52 = vunpack.i.h.bf16 %v2941_v13  ;;  %v2092_v54 = vunpack.i.l.bf16 %v2941_v13 }
  0xc3   : > { %v2088_v38 = vunpack.i.h.bf16 %v2086_v16  ;;  %v2087_v36 = vunpack.i.l.bf16 %v2086_v16 }
  0xc4   : > { %v1265_v22 = vsel %vm1258_vm9, %v1248_v39, %v2092_v54  ;;  %v1266_v18 = vsel %vm1258_vm9, %v1249_v56, %v2093_v52 }
  0xc5   : > { %v2943_v43 = vpop.permute.xlu1 %2100  ;;  %v1263_v57 = vsel %vm1258_vm9, %v1246_v33, %v2087_v36  ;;  %v1264_v37 = vsel %vm1258_vm9, %v1247_v47, %v2088_v38 }
  0xc6   : > { %v2096_v17 = vpop.permute.xlu0 %2095  ;;  %v2103_v44 = vunpack.i.h.bf16 %v2943_v43  ;;  %v2102_v34 = vunpack.i.l.bf16 %v2943_v43 }
  0xc7   : > { %v2098_v42 = vunpack.i.h.bf16 %v2096_v17  ;;  %v2097_v32 = vunpack.i.l.bf16 %v2096_v17 }
  0xc8   : > { %v1282_v24 = vsel %vm1275_vm10, %v1265_v22, %v2102_v34  ;;  %v1283_v58 = vsel %vm1275_vm10, %v1266_v18, %v2103_v44 }
  0xc9   : > { %v2111_v28 = vpop.permute.xlu1 %2110  ;;  %v1280_v60 = vsel %vm1275_vm10, %v1263_v57, %v2097_v32  ;;  %v1281_v63 = vsel %vm1275_vm10, %v1264_v37, %v2098_v42 }
  0xca   : > { %v2106_v26 = vpop.permute.xlu0 %2105  ;;  %v2113_v2 = vunpack.i.h.bf16 %v2111_v28  ;;  %v2112_v61 = vunpack.i.l.bf16 %v2111_v28 }
  0xcb   : > { %v2108_v48 = vunpack.i.h.bf16 %v2106_v26  ;;  %v2107_v51 = vunpack.i.l.bf16 %v2106_v26 }
  0xcc   : > { %v1299_v59 = vsel %vm1292_vm11, %v1282_v24, %v2112_v61  ;;  %v1300_v62 = vsel %vm1292_vm11, %v1283_v58, %v2113_v2 }
  0xcd   : > { %v2121_v45 = vpop.permute.xlu1 %2120  ;;  %v1297_v6 = vsel %vm1292_vm11, %v1280_v60, %v2107_v51  ;;  %v1298_v11 = vsel %vm1292_vm11, %v1281_v63, %v2108_v48 }
  0xce   : > { %v2116_v46 = vpop.permute.xlu0 %2115  ;;  %v2123_v13 = vunpack.i.h.bf16 %v2121_v45  ;;  %v2122_v16 = vunpack.i.l.bf16 %v2121_v45 }
  0xcf   : > { %v2118_v1 = vunpack.i.h.bf16 %v2116_v46  ;;  %v2117_v41 = vunpack.i.l.bf16 %v2116_v46 }
  0xd0   : > { %v1316_v14 = vsel %vm1309_vm12, %v1299_v59, %v2122_v16  ;;  %v1317_v19 = vsel %vm1309_vm12, %v1300_v62, %v2123_v13 }
  0xd1   : > { %v2131_v55 = vpop.permute.xlu1 %2130  ;;  %v1314_v17 = vsel %vm1309_vm12, %v1297_v6, %v2117_v41  ;;  %v1315_v43 = vsel %vm1309_vm12, %v1298_v11, %v2118_v1 }
  0xd2   : > { %v2126_v5 = vpop.permute.xlu0 %2125  ;;  %v2133_v32 = vunpack.i.h.bf16 %v2131_v55  ;;  %v2132_v46 = vunpack.i.l.bf16 %v2131_v55 }
  0xd3   : > { %v2128_v3 = vunpack.i.h.bf16 %v2126_v5  ;;  %v2127_v4 = vunpack.i.l.bf16 %v2126_v5 }
  0xd4   : > { %v1217_v60 = vsel %vm1207_vm6, %v2635_v8, %v2133_v32  ;;  %v1216_v55 = vsel %vm1207_vm6, %v2638_v9, %v2132_v46 }
  0xd5   : > { %v1331_v20 = vsel %vm1326_vm13, %v1314_v17, %v2127_v4  ;;  %v1332_v21 = vsel %vm1326_vm13, %v1315_v43, %v2128_v3  ;;  %v2141_v23 = vpop.permute.xlu1 %2140 }
  0xd6   : > { %v1345_v25 = vpack.c.bf16 %v1332_v21, %v1331_v20  ;;  %v2136_v28 = vpop.permute.xlu0 %2135  ;;  %v2143_v56 = vunpack.i.h.bf16 %v2141_v23  ;;  %v2142_v42 = vunpack.i.l.bf16 %v2141_v23 }
  0xd7   : > { %v2138_v26 = vunpack.i.h.bf16 %v2136_v28  ;;  %v2137_v30 = vunpack.i.l.bf16 %v2136_v28 }
  0xd8   : > { %1902 = vmatprep.mubr.msk.bf16.mxu0 %vm1394_vm14, %v1345_v25  ;;  %v1219_v57 = vsel %vm1207_vm6, %v2673_v53, %v2143_v56  ;;  %v1218_v37 = vsel %vm1207_vm6, %v2676_v15, %v2142_v42 }
  0xd9   : > { %v1334_v12 = vsel %vm1326_vm13, %v1317_v19, %v2138_v26  ;;  %v1333_v49 = vsel %vm1326_vm13, %v1316_v14, %v2137_v30  ;;  %v2151_v27 = vpop.permute.xlu1 %2150 }
  0xda   : > { %v1346_v0 = vpack.c.bf16 %v1334_v12, %v1333_v49  ;;  %v2146_v50 = vpop.permute.xlu0 %2145  ;;  %v2153_v33 = vunpack.i.h.bf16 %v2151_v27  ;;  %v2152_v47 = vunpack.i.l.bf16 %v2151_v27 }
  0xdb   : > { %v2148_v48 = vunpack.i.h.bf16 %v2146_v50  ;;  %v2147_v51 = vunpack.i.l.bf16 %v2146_v50 }
  0xdc   : > { %1903 = vmatmul.mubr.msk.bf16.gmra.mrb[4].mxu0 %vm1394_vm14, %v1346_v0  ;;  %v1235_v63 = vsel %vm1224_vm7, %v1218_v37, %v2152_v47  ;;  %v1236_v2 = vsel %vm1224_vm7, %v1219_v57, %v2153_v33 }
  0xdd   : > { %v2161_v31 = vpop.permute.xlu1 %2160  ;;  %v1234_v61 = vsel %vm1224_vm7, %v1217_v60, %v2148_v48  ;;  %v1233_v5 = vsel %vm1224_vm7, %v1216_v55, %v2147_v51 }
  0xde   : > { %v2156_v29 = vpop.permute.xlu0 %2155  ;;  %v2163_v54 = vunpack.i.h.bf16 %v2161_v31  ;;  %v2162_v1 = vunpack.i.l.bf16 %v2161_v31 }
  0xdf   : > { %v2158_v44 = vunpack.i.h.bf16 %v2156_v29  ;;  %v2157_v34 = vunpack.i.l.bf16 %v2156_v29 }
  0xe0   : > { %v1252_v15 = vsel %vm1241_vm8, %v1235_v63, %v2162_v1  ;;  %v1253_v3 = vsel %vm1241_vm8, %v1236_v2, %v2163_v54 }
  0xe1   : > { %v2989_v38 = vpop.permute.xlu1 %2170  ;;  %v1250_v9 = vsel %vm1241_vm8, %v1233_v5, %v2157_v34  ;;  %v1251_v16 = vsel %vm1241_vm8, %v1234_v61, %v2158_v44 }
  0xe2   : > { %v2166_v36 = vpop.permute.xlu0 %2165  ;;  %v2173_v22 = vunpack.i.h.bf16 %v2989_v38  ;;  %v2172_v18 = vunpack.i.l.bf16 %v2989_v38 }
  0xe3   : > { %v2168_v53 = vunpack.i.h.bf16 %v2166_v36  ;;  %v2167_v6 = vunpack.i.l.bf16 %v2166_v36 }
  0xe4   : > { %v1269_v38 = vsel %vm1258_vm9, %v1252_v15, %v2172_v18  ;;  %v1270_v36 = vsel %vm1258_vm9, %v1253_v3, %v2173_v22 }
  0xe5   : > { %v2991_v45 = vpop.permute.xlu1 %2180  ;;  %v1267_v23 = vsel %vm1258_vm9, %v1250_v9, %v2167_v6  ;;  %v1268_v24 = vsel %vm1258_vm9, %v1251_v16, %v2168_v53 }
  0xe6   : > { %v2176_v39 = vpop.permute.xlu0 %2175  ;;  %v2183_v58 = vunpack.i.h.bf16 %v2991_v45  ;;  %v2182_v25 = vunpack.i.l.bf16 %v2991_v45 }
  0xe7   : > { %v2178_v4 = vunpack.i.h.bf16 %v2176_v39  ;;  %v2177_v8 = vunpack.i.l.bf16 %v2176_v39 }
  0xe8   : > { %v1286_v42 = vsel %vm1275_vm10, %v1269_v38, %v2182_v25  ;;  %v1287_v32 = vsel %vm1275_vm10, %v1270_v36, %v2183_v58 }
  0xe9   : > { %v2191_v52 = vpop.permute.xlu1 %2190  ;;  %v1284_v59 = vsel %vm1275_vm10, %v1267_v23, %v2177_v8  ;;  %v1285_v62 = vsel %vm1275_vm10, %v1268_v24, %v2178_v4 }
  0xea   : > { %v2186_v41 = vpop.permute.xlu0 %2185  ;;  %v2193_v26 = vunpack.i.h.bf16 %v2191_v52  ;;  %v2192_v30 = vunpack.i.l.bf16 %v2191_v52 }
  0xeb   : > { %v2188_v17 = vunpack.i.h.bf16 %v2186_v41  ;;  %v2187_v43 = vunpack.i.l.bf16 %v2186_v41 }
  0xec   : > { %v1303_v47 = vsel %vm1292_vm11, %v1286_v42, %v2192_v30  ;;  %v1304_v48 = vsel %vm1292_vm11, %v1287_v32, %v2193_v26 }
  0xed   : > { %v2201_v11 = vpop.permute.xlu1 %2200  ;;  %v1301_v19 = vsel %vm1292_vm11, %v1284_v59, %v2187_v43  ;;  %v1302_v12 = vsel %vm1292_vm11, %v1285_v62, %v2188_v17 }
  0xee   : > { %v2196_v13 = vpop.permute.xlu0 %2195  ;;  %v2203_v0 = vunpack.i.h.bf16 %v2201_v11  ;;  %v2202_v50 = vunpack.i.l.bf16 %v2201_v11 }
  0xef   : > { %v2198_v20 = vunpack.i.h.bf16 %v2196_v13  ;;  %v2197_v21 = vunpack.i.l.bf16 %v2196_v13 }
  0xf0   : > { %v1320_v54 = vsel %vm1309_vm12, %v1303_v47, %v2202_v50  ;;  %v1321_v1 = vsel %vm1309_vm12, %v1304_v48, %v2203_v0 }
  0xf1   : > { %v2211_v28 = vpop.permute.xlu1 %2210  ;;  %v1318_v31 = vsel %vm1309_vm12, %v1301_v19, %v2197_v21  ;;  %v1319_v29 = vsel %vm1309_vm12, %v1302_v12, %v2198_v20 }
  0xf2   : > { %v2206_v14 = vpop.permute.xlu0 %2205  ;;  %v2213_v53 = vunpack.i.h.bf16 %v2211_v28  ;;  %v2212_v6 = vunpack.i.l.bf16 %v2211_v28 }
  0xf3   : > { %v2208_v49 = vunpack.i.h.bf16 %v2206_v14  ;;  %v2207_v27 = vunpack.i.l.bf16 %v2206_v14 }
  0xf4   : > { %v1221_v20 = vsel %vm1207_vm6, %v2704_v7, %v2213_v53  ;;  %v1220_v21 = vsel %vm1207_vm6, %v2707_v10, %v2212_v6 }
  0xf5   : > { %v2221_v45 = vpop.permute.xlu1 %2220  ;;  %v1335_v39 = vsel %vm1326_vm13, %v1318_v31, %v2207_v27  ;;  %v1336_v56 = vsel %vm1326_vm13, %v1319_v29, %v2208_v49 }
  0xf6   : > { %v2216_v46 = vpop.permute.xlu0 %2215  ;;  %v1347_v33 = vpack.c.bf16 %v1336_v56, %v1335_v39  ;;  %v2223_v61 = vunpack.i.h.bf16 %v2221_v45  ;;  %v2222_v5 = vunpack.i.l.bf16 %v2221_v45 }
  0xf7   : > { %v2218_v51 = vunpack.i.h.bf16 %v2216_v46  ;;  %v2217_v52 = vunpack.i.l.bf16 %v2216_v46 }
  0xf8   : > { %1906 = vmatprep.mubr.msk.bf16.mxu1 %vm1394_vm14, %v1347_v33  ;;  %v1223_v17 = vsel %vm1207_vm6, %v2745_v40, %v2223_v61  ;;  %v1222_v43 = vsel %vm1207_vm6, %v2740_v35, %v2222_v5 }
  0xf9   : > { %v1338_v41 = vsel %vm1326_vm13, %v1321_v1, %v2218_v51  ;;  %v1337_v57 = vsel %vm1326_vm13, %v1320_v54, %v2217_v52  ;;  %v2231_v37 = vpop.permute.xlu1 %2230 }
  0xfa   : > { %v1348_v44 = vpack.c.bf16 %v1338_v41, %v1337_v57  ;;  %v2226_v34 = vpop.permute.xlu0 %2225  ;;  %v2233_v11 = vunpack.i.h.bf16 %v2231_v37  ;;  %v2232_v15 = vunpack.i.l.bf16 %v2231_v37 }
  0xfb   : > { %v2228_v4 = vunpack.i.h.bf16 %v2226_v34  ;;  %v2227_v8 = vunpack.i.l.bf16 %v2226_v34 }
  0xfc   : > { %1907 = vmatmul.mubr.msk.bf16.vlgmr.msra.gmra.mrb[0].mxu1 %vm1394_vm14, %v1348_v44  ;;  %v1239_v23 = vsel %vm1224_vm7, %v1222_v43, %v2232_v15  ;;  %v1240_v24 = vsel %vm1224_vm7, %v1223_v17, %v2233_v11 }
  0xfd   : > { %v2241_v60 = vpop.permute.xlu1 %2240  ;;  %v1238_v25 = vsel %vm1224_vm7, %v1221_v20, %v2228_v4  ;;  %v1237_v40 = vsel %vm1224_vm7, %v1220_v21, %v2227_v8 }
  0xfe   : > { %v2236_v55 = vpop.permute.xlu0 %2235  ;;  %v2243_v9 = vunpack.i.h.bf16 %v2241_v60  ;;  %v2242_v16 = vunpack.i.l.bf16 %v2241_v60 }
  0xff   : > { %v2238_v22 = vunpack.i.h.bf16 %v2236_v55  ;;  %v2237_v18 = vunpack.i.l.bf16 %v2236_v55 }
 0x100   : > { %v1256_v62 = vsel %vm1241_vm8, %v1239_v23, %v2242_v16  ;;  %v1257_v26 = vsel %vm1241_vm8, %v1240_v24, %v2243_v9  ;;  %v3076_v9 = vld [vmem:[%s3193_s6] ss:$0 sm:$0xff] }
 0x101   : > { %v2251_v63 = vpop.permute.xlu1 %2250  ;;  %v1254_v10 = vsel %vm1241_vm8, %v1237_v40, %v2237_v18  ;;  %v1255_v14 = vsel %vm1241_vm8, %v1238_v25, %v2238_v22 }
 0x102   : > { %v2246_v2 = vpop.permute.xlu0 %2245  ;;  %v2253_v28 = vunpack.i.h.bf16 %v2251_v63  ;;  %v2252_v59 = vunpack.i.l.bf16 %v2251_v63 }
 0x103   : > { %v2248_v7 = vunpack.i.h.bf16 %v2246_v2  ;;  %v2247_v30 = vunpack.i.l.bf16 %v2246_v2 }
 0x104   : > { %v1273_v29 = vsel %vm1258_vm9, %v1256_v62, %v2252_v59  ;;  %v1274_v38 = vsel %vm1258_vm9, %v1257_v26, %v2253_v28 }
 0x105   : > { %v2261_v3 = vpop.permute.xlu1 %2260  ;;  %v1271_v56 = vsel %vm1258_vm9, %v1254_v10, %v2247_v30  ;;  %v1272_v42 = vsel %vm1258_vm9, %v1255_v14, %v2248_v7 }
 0x106   : > { %v2256_v13 = vpop.permute.xlu0 %2255  ;;  %v2263_v19 = vunpack.i.h.bf16 %v2261_v3  ;;  %v2262_v12 = vunpack.i.l.bf16 %v2261_v3 }
 0x107   : > { %v2258_v49 = vunpack.i.h.bf16 %v2256_v13  ;;  %v2257_v27 = vunpack.i.l.bf16 %v2256_v13 }
 0x108   : > { %v1290_v33 = vsel %vm1275_vm10, %v1273_v29, %v2262_v12  ;;  %v1291_v47 = vsel %vm1275_vm10, %v1274_v38, %v2263_v19 }
 0x109   : > { %v2271_v58 = vpop.permute.xlu1 %2270  ;;  %v1288_v52 = vsel %vm1275_vm10, %v1271_v56, %v2257_v27  ;;  %v1289_v54 = vsel %vm1275_vm10, %v1272_v42, %v2258_v49 }
 0x10a   : > { %v2266_v35 = vpop.permute.xlu0 %2265  ;;  %v2273_v0 = vunpack.i.h.bf16 %v2271_v58  ;;  %v2272_v50 = vunpack.i.l.bf16 %v2271_v58 }
 0x10b   : > { %v2268_v36 = vunpack.i.h.bf16 %v2266_v35  ;;  %v2267_v45 = vunpack.i.l.bf16 %v2266_v35 }
 0x10c   : > { %v1307_v1 = vsel %vm1292_vm11, %v1290_v33, %v2272_v50  ;;  %v1308_v41 = vsel %vm1292_vm11, %v1291_v47, %v2273_v0 }
 0x10d   : > { %v2281_v31 = vpop.permute.xlu1 %2280  ;;  %v1305_v37 = vsel %vm1292_vm11, %v1288_v52, %v2267_v45  ;;  %v1306_v44 = vsel %vm1292_vm11, %v1289_v54, %v2268_v36 }
 0x10e   : > { %v2276_v39 = vpop.permute.xlu0 %2275  ;;  %v2283_v32 = vunpack.i.h.bf16 %v2281_v31  ;;  %v2282_v46 = vunpack.i.l.bf16 %v2281_v31 }
 0x10f   : > { %v2278_v48 = vunpack.i.h.bf16 %v2276_v39  ;;  %v2277_v51 = vunpack.i.l.bf16 %v2276_v39 }
 0x110   : > { %v1324_v63 = vsel %vm1309_vm12, %v1307_v1, %v2282_v46  ;;  %v1325_v2 = vsel %vm1309_vm12, %v1308_v41, %v2283_v32 }
 0x111   : > { %v2291_v57 = vpop.permute.xlu1 %2290  ;;  %v1322_v53 = vsel %vm1309_vm12, %v1305_v37, %v2277_v51  ;;  %v1323_v6 = vsel %vm1309_vm12, %v1306_v44, %v2278_v48 }
 0x112   : > { %v2293_v34 = vunpack.i.h.bf16 %v2291_v57  ;;  %v2292_v60 = vunpack.i.l.bf16 %v2291_v57  ;;  %v2286_v55 = vpop.permute.xlu0 %2285 }
 0x113   : > { %v2288_v61 = vunpack.i.h.bf16 %v2286_v55  ;;  %v2287_v5 = vunpack.i.l.bf16 %v2286_v55 }
 0x114   : > { %v1341_v11 = vsel %vm1326_vm13, %v1324_v63, %v2292_v60  ;;  %v1342_v15 = vsel %vm1326_vm13, %v1325_v2, %v2293_v34 }
 0x115   : > { %v1350_v3 = vpack.c.bf16 %v1342_v15, %v1341_v11  ;;  %v1339_v4 = vsel %vm1326_vm13, %v1322_v53, %v2287_v5  ;;  %v1340_v8 = vsel %vm1326_vm13, %v1323_v6, %v2288_v61 }
 0x116   : > { %v1349_v13 = vpack.c.bf16 %v1340_v8, %v1339_v4 }
 0x118   : > { %1910 = vmatprep.mubr.msk.bf16.mxu1 %vm1394_vm14, %v1349_v13 }
 0x119   : > { %1911 = vmatmul.mubr.msk.bf16.gmra.mrb[4].mxu1 %vm1394_vm14, %v1350_v3 }
 0x18f   : > { %v1900_v16 = vpop.f32.mrb[0].mxu0 }
 0x190   : > { %v1466_v17 = vadd.f32 %v1900_v16, %v3076_v9  ;;  %v1457_v43 = vpop.f32.mrb[1].mxu0 }
 0x191   : > { %v1458_v22 = vadd.f32 %v3076_v9, %v1457_v43  ;;  %v1901_v18 = vpop.f32.mrb[2].mxu0 }
 0x192   : > { %1615 = vst.msk [vmem:[%s3083_s18 + $0x10] sm:$0xff] %vm1207_vm6, %v1466_v17  ;;  %v1469_v20 = vadd.f32 %v1901_v18, %v3076_v9  ;;  %v1460_v21 = vpop.f32.mrb[3].mxu0  ;;  %v1559_v58 = vmul.f32 %v1466_v17, %v1466_v17  ;;  %v1523_v35 = vsel %vm1207_vm6, %v1466_v17, 0.0 }
 0x193   : > { %v1557_v23 = vmul.f32 %v1458_v22, %v1458_v22  ;;  %1613 = vst.msk [vmem:[%s3083_s18] sm:$0xff] %vm1207_vm6, %v1458_v22  ;;  %v1461_v24 = vadd.f32 %v3076_v9, %v1460_v21  ;;  %v1520_v25 = vsel %vm1207_vm6, %v1458_v22, 0.0 }
 0x194   : > { %1616 = vst.msk [vmem:[%s3083_s18 + $0x18] sm:$0xff] %vm1207_vm6, %v1469_v20  ;;  %v1560_v26 = vmul.f32 %v1469_v20, %v1469_v20  ;;  %v1576_v14 = vsel %vm1207_vm6, %v1559_v58, 0.0  ;;  %v1525_v19 = vsel %vm1207_vm6, %v1469_v20, 0.0 }
 0x195   : > { %v1521_v40 = vsel %vm1207_vm6, %v1461_v24, 0.0  ;;  %v1558_v28 = vmul.f32 %v1461_v24, %v1461_v24  ;;  %1614 = vst.msk [vmem:[%s3083_s18 + $0x8] sm:$0xff] %vm1207_vm6, %v1461_v24  ;;  %v1573_v62 = vsel %vm1207_vm6, %v1557_v23, 0.0 }
 0x196   : > { %v1522_v59 = vadd.f32 %v1521_v40, %v1520_v25  ;;  %v1578_v27 = vsel %vm1207_vm6, %v1560_v26, 0.0 }
 0x197   : > { %v1574_v7 = vsel %vm1207_vm6, %v1558_v28, 0.0 }
 0x198   : > { %v1524_v30 = vadd.f32 %v1523_v35, %v1522_v59  ;;  %v1575_v10 = vadd.f32 %v1574_v7, %v1573_v62 }
 0x19a   : > { %v1577_v12 = vadd.f32 %v1576_v14, %v1575_v10  ;;  %v1526_v49 = vadd.f32 %v1525_v19, %v1524_v30 }
 0x19c   : > { %v1579_v0 = vadd.f32 %v1578_v27, %v1577_v12 }
 0x1af   : > { %v1904_v50 = vpop.f32.mrb[4].mxu0 }
 0x1b0   : > { %v1482_v31 = vadd.f32 %v1904_v50, %v3076_v9  ;;  %v1473_v29 = vpop.f32.mrb[5].mxu0 }
 0x1b1   : > { %v1474_v38 = vadd.f32 %v3076_v9, %v1473_v29  ;;  %v1905_v36 = vpop.f32.mrb[6].mxu0 }
 0x1b2   : > { %1619 = vst.msk [vmem:[%s3083_s18 + $0x30] sm:$0xff] %vm1207_vm6, %v1482_v31  ;;  %v1485_v45 = vadd.f32 %v1905_v36, %v3076_v9  ;;  %v1476_v39 = vpop.f32.mrb[7].mxu0  ;;  %v1563_v33 = vmul.f32 %v1482_v31, %v1482_v31  ;;  %v1531_v1 = vsel %vm1207_vm6, %v1482_v31, 0.0 }
 0x1b3   : > { %v1527_v56 = vsel %vm1207_vm6, %v1474_v38, 0.0  ;;  %v1561_v42 = vmul.f32 %v1474_v38, %v1474_v38  ;;  %1617 = vst.msk [vmem:[%s3083_s18 + $0x20] sm:$0xff] %vm1207_vm6, %v1474_v38  ;;  %v1477_v32 = vadd.f32 %v3076_v9, %v1476_v39 }
 0x1b4   : > { %v1528_v46 = vadd.f32 %v1527_v56, %v1526_v49  ;;  %1620 = vst.msk [vmem:[%s3083_s18 + $0x38] sm:$0xff] %vm1207_vm6, %v1485_v45  ;;  %v1564_v41 = vmul.f32 %v1485_v45, %v1485_v45  ;;  %v1584_v34 = vsel %vm1207_vm6, %v1563_v33, 0.0  ;;  %v1533_v60 = vsel %vm1207_vm6, %v1485_v45, 0.0 }
 0x1b5   : > { %v1580_v47 = vsel %vm1207_vm6, %v1561_v42, 0.0  ;;  %v1529_v48 = vsel %vm1207_vm6, %v1477_v32, 0.0  ;;  %v1562_v51 = vmul.f32 %v1477_v32, %v1477_v32  ;;  %1618 = vst.msk [vmem:[%s3083_s18 + $0x28] sm:$0xff] %vm1207_vm6, %v1477_v32 }
 0x1b6   : > { %v1581_v52 = vadd.f32 %v1580_v47, %v1579_v0  ;;  %v1530_v54 = vadd.f32 %v1529_v48, %v1528_v46  ;;  %v1586_v2 = vsel %vm1207_vm6, %v1564_v41, 0.0 }
 0x1b7   : > { %v1582_v57 = vsel %vm1207_vm6, %v1562_v51, 0.0 }
 0x1b8   : > { %v1532_v37 = vadd.f32 %v1531_v1, %v1530_v54  ;;  %v1583_v44 = vadd.f32 %v1582_v57, %v1581_v52 }
 0x1ba   : > { %v1585_v55 = vadd.f32 %v1584_v34, %v1583_v44  ;;  %v1534_v63 = vadd.f32 %v1533_v60, %v1532_v37 }
 0x1bc   : > { %v1587_v61 = vadd.f32 %v1586_v2, %v1585_v55 }
 0x1cf   : > { %v1908_v5 = vpop.f32.mrb[0].mxu1 }
 0x1d0   : > { %v1498_v53 = vadd.f32 %v1908_v5, %v3076_v9  ;;  %v1489_v6 = vpop.f32.mrb[1].mxu1 }
 0x1d1   : > { %v1490_v11 = vadd.f32 %v3076_v9, %v1489_v6  ;;  %v1909_v15 = vpop.f32.mrb[2].mxu1 }
 0x1d2   : > { %1623 = vst.msk [vmem:[%s3083_s18 + $0x50] sm:$0xff] %vm1207_vm6, %v1498_v53  ;;  %v1501_v3 = vadd.f32 %v1909_v15, %v3076_v9  ;;  %v1492_v4 = vpop.f32.mrb[3].mxu1  ;;  %v1567_v43 = vmul.f32 %v1498_v53, %v1498_v53  ;;  %v1539_v24 = vsel %vm1207_vm6, %v1498_v53, 0.0 }
 0x1d3   : > { %v1535_v8 = vsel %vm1207_vm6, %v1490_v11, 0.0  ;;  %v1565_v13 = vmul.f32 %v1490_v11, %v1490_v11  ;;  %1621 = vst.msk [vmem:[%s3083_s18 + $0x40] sm:$0xff] %vm1207_vm6, %v1490_v11  ;;  %v1493_v16 = vadd.f32 %v3076_v9, %v1492_v4 }
 0x1d4   : > { %v1536_v17 = vadd.f32 %v1535_v8, %v1534_v63  ;;  %1624 = vst.msk [vmem:[%s3083_s18 + $0x58] sm:$0xff] %vm1207_vm6, %v1501_v3  ;;  %v1568_v58 = vmul.f32 %v1501_v3, %v1501_v3  ;;  %v1592_v59 = vsel %vm1207_vm6, %v1567_v43, 0.0  ;;  %v1541_v35 = vsel %vm1207_vm6, %v1501_v3, 0.0 }
 0x1d5   : > { %v1588_v22 = vsel %vm1207_vm6, %v1565_v13, 0.0  ;;  %v1537_v18 = vsel %vm1207_vm6, %v1493_v16, 0.0  ;;  %v1566_v20 = vmul.f32 %v1493_v16, %v1493_v16  ;;  %1622 = vst.msk [vmem:[%s3083_s18 + $0x48] sm:$0xff] %vm1207_vm6, %v1493_v16 }
 0x1d6   : > { %v1589_v21 = vadd.f32 %v1588_v22, %v1587_v61  ;;  %v1538_v23 = vadd.f32 %v1537_v18, %v1536_v17  ;;  %v1594_v7 = vsel %vm1207_vm6, %v1568_v58, 0.0 }
 0x1d7   : > { %v1590_v25 = vsel %vm1207_vm6, %v1566_v20, 0.0 }
 0x1d8   : > { %v1540_v40 = vadd.f32 %v1539_v24, %v1538_v23  ;;  %v1591_v28 = vadd.f32 %v1590_v25, %v1589_v21 }
 0x1da   : > { %v1593_v62 = vadd.f32 %v1592_v59, %v1591_v28  ;;  %v1542_v26 = vadd.f32 %v1541_v35, %v1540_v40 }
 0x1dc   : > { %v1595_v30 = vadd.f32 %v1594_v7, %v1593_v62 }
 0x1ec   : > { %v1912_v10 = vpop.f32.mrb[4].mxu1 }
 0x1ed   : > { %v1514_v14 = vadd.f32 %v1912_v10, %v3076_v9  ;;  %v1505_v19 = vpop.f32.mrb[5].mxu1 }
 0x1ee   : > { %v1506_v12 = vadd.f32 %v3076_v9, %v1505_v19  ;;  %v1913_v49 = vpop.f32.mrb[6].mxu1 }
 0x1ef   : > { %1627 = vst.msk [vmem:[%s3083_s18 + $0x70] sm:$0xff] %vm1207_vm6, %v1514_v14  ;;  %v1517_v27 = vadd.f32 %v1913_v49, %v3076_v9  ;;  %v1508_v0 = vpop.f32.mrb[7].mxu1  ;;  %v1571_v36 = vmul.f32 %v1514_v14, %v1514_v14  ;;  %v1547_v46 = vsel %vm1207_vm6, %v1514_v14, 0.0 }
 0x1f0   : > { %v1543_v50 = vsel %vm1207_vm6, %v1506_v12, 0.0  ;;  %v1569_v31 = vmul.f32 %v1506_v12, %v1506_v12  ;;  %1625 = vst.msk [vmem:[%s3083_s18 + $0x60] sm:$0xff] %vm1207_vm6, %v1506_v12  ;;  %v1509_v29 = vadd.f32 %v3076_v9, %v1508_v0 }
 0x1f1   : > { %v1544_v38 = vadd.f32 %v1543_v50, %v1542_v26  ;;  %1628 = vst.msk [vmem:[%s3083_s18 + $0x78] sm:$0xff] %vm1207_vm6, %v1517_v27  ;;  %v1572_v33 = vmul.f32 %v1517_v27, %v1517_v27  ;;  %v1600_v51 = vsel %vm1207_vm6, %v1571_v36, 0.0  ;;  %v1549_v52 = vsel %vm1207_vm6, %v1517_v27, 0.0 }
 0x1f2   : > { %v1596_v45 = vsel %vm1207_vm6, %v1569_v31, 0.0  ;;  %v1545_v39 = vsel %vm1207_vm6, %v1509_v29, 0.0  ;;  %v1570_v56 = vmul.f32 %v1509_v29, %v1509_v29  ;;  %1626 = vst.msk [vmem:[%s3083_s18 + $0x68] sm:$0xff] %vm1207_vm6, %v1509_v29 }
 0x1f3   : > { %v1597_v42 = vadd.f32 %v1596_v45, %v1595_v30  ;;  %v1546_v32 = vadd.f32 %v1545_v39, %v1544_v38  ;;  %v1602_v41 = vsel %vm1207_vm6, %v1572_v33, 0.0 }
 0x1f4   : > { %v1598_v9 = vsel %vm1207_vm6, %v1570_v56, 0.0 }
 0x1f5   : > { %v1548_v47 = vadd.f32 %v1547_v46, %v1546_v32  ;;  %v1599_v48 = vadd.f32 %v1598_v9, %v1597_v42 }
 0x1f7   : > { %v1550_v54 = vadd.f32 %v1549_v52, %v1548_v47  ;;  %v1601_v1 = vadd.f32 %v1600_v51, %v1599_v48 }
 0x1f9   : > { %v1551_v57 = vrot.slane %v1550_v54, 4  ;;  %v1603_v37 = vadd.f32 %v1602_v41, %v1601_v1 }
 0x1fb   : > { %v1552_v44 = vadd.f32 %v1551_v57, %v1550_v54  ;;  %v1604_v34 = vrot.slane %v1603_v37, 4 }
 0x1fd   : > { %v1553_v60 = vrot.slane %v1552_v44, 2  ;;  %v1605_v55 = vadd.f32 %v1604_v34, %v1603_v37 }
 0x1ff   : > { %v1554_v63 = vadd.f32 %v1553_v60, %v1552_v44  ;;  %v1606_v2 = vrot.slane %v1605_v55, 2 }
 0x201   : > { %v1555_v61 = vrot.slane %v1554_v63, 1  ;;  %v1607_v5 = vadd.f32 %v1606_v2, %v1605_v55 }
 0x203   : > { %v1608_v53 = vrot.slane %v1607_v5, 1  ;;  %v1556_v6 = vadd.f32 %v1555_v61, %v1554_v63 }
 0x205   : > { %v1609_v11 = vadd.f32 %v1608_v53, %v1607_v5 }
 0x207   : > { %v1610_v15 = vsel %vm622_vm0, %v1556_v6, %v1609_v11 }
 0x208   : > { %1612 = vst.msk [vmem:[%s494_s26] sm:$0x3] %vm1611_vm15, %v1610_v15 }
 0x209 PF: > { %s19_s9 = sadd.s32 1, %s2337_s9   ;;  %s3199_s27 = smov %s2329_s29 }
 0x20a   : > { %p16_p13 = scmp.ge.s32.totalorder %s19_s9, 6   ;;  %s3200_s28 = smov %s2333_s30 }
 0x20b   : > { %s3201_s29 = smov %s3204_s10  ;;  %s3202_s30 = smov %s3208_s11 }
 0x20c   :  { %18 = sbr.rel (!%p16_p13) target bundleno = 3 (0x3), region = 96 }

// kernel: up_forward.4
= control target key start
LH: loop header
LB: loop body
LE: loop exit
PB: predicated region body
PF: predicated region fallthrough
CT: control target
= control target key end

     0   :  { %s3928_s13 = smov 0   ;;  %s3930_s14 = smov 0   ;;  %s5580_s0 = inlined_call_operand.vmem [shape: f32[2,16,16,4], index: 0, kind: input, shape index: {}, may-alias: {0,1,2}]   ;;  %s5581_s1 = inlined_call_operand.vmem [shape: f32[2,16,16,4], index: 1, kind: input, shape index: {}, may-alias: {0,1,2}]   ;;  %s5582_s2 = inlined_call_operand.vmem [shape: f32[2,16,16,4], index: 2, kind: input, shape index: {}, may-alias: {0,1,2}]   ;;  %s5583_s3 = inlined_call_operand.vmem [shape: f32[2,16,16,4], index: 3, kind: input, shape index: {}, may-alias: {3,4,5}]   ;;  %s5584_s4 = inlined_call_operand.vmem [shape: f32[2,16,16,4], index: 4, kind: input, shape index: {}, may-alias: {3,4,5}]   ;;  %s5585_s5 = inlined_call_operand.vmem [shape: f32[2,16,16,4], index: 5, kind: input, shape index: {}, may-alias: {3,4,5}]   ;;  %s5586_s6 = inlined_call_operand.vmem [shape: bf16[36,8], index: 6, kind: input, shape index: {}]   ;;  %s5587_s7 = inlined_call_operand.vmem [shape: bf16[36,8], index: 7, kind: input, shape index: {}]   ;;  %s5588_s8 = inlined_call_operand.vmem [shape: f32[1,8], index: 8, kind: input, shape index: {}]   ;;  %s5589_s9 = inlined_call_operand.vmem [shape: f32[2,16,16,8], index: 9, kind: output, shape index: {0}]   ;;  %s5590_s10 = inlined_call_operand.vmem [shape: f32[2,2,2,8], index: 10, kind: output, shape index: {1}]  }
   0x1   :  { %s3932_s15 = smov 0   ;;  %s3934_s16 = smov 0  }
   0x2   :  { %s3936_s17 = smov 0  }
   0x3 LB: > { %s30_s18 = sadd.s32 1, %s3855_s15  ;;  %s33_s19 = sadd.s32 1, %s3859_s16  ;;  %s3863_s17 = sphi %s3936_s17, %s21_s17   ;;  %s3859_s16 = sphi %s3934_s16, %s5737_s16   ;;  %s3855_s15 = sphi %s3932_s15, %s5736_s15   ;;  %s3851_s14 = sphi %s3930_s14, %s5735_s14   ;;  %s3847_s13 = sphi %s3928_s13, %s5734_s13  }
   0x4   : > { %p31_p0 = scmp.ge.s32.totalorder %s30_s18, 2  ;;  %p2945_p1 = scmp.ge.s32.totalorder %s3863_s17, 1 }
   0x5   : > { %p485_p2 = scmp.lt.s32.totalorder %s3863_s17, 5 }
   0x6   : > { %s5739_s18 = smov (%p31_p0, %s30_s18), 0  ;;  %s5741_s19 = smov (!%p31_p0, %s33_s19), %s3859_s16 }
   0x7   : > { %p486_p3 = pnand %p2945_p1, %p485_p2  ;;  %p35_p4 = scmp.ge.s32.totalorder %s5741_s19, 2 }
   0x9   : > { %s5743_s19 = smov (%p35_p4, %s5741_s19), 0  ;;  %489 = sbr.rel (%p486_p3) target bundleno = 654 (0x28e), region = 56 }
  0x10   : > { %s3961_s20 = sshll.u32 %s3847_s13, 3  ;;  %p604_p5 = scmp.lt.s32.totalorder %s3851_s14, 1  ;;  %vm765_vm0 = vcmask 1040384   ;;  %vm860_vm1 = vcmask 1046528   ;;  %vm901_vm2 = vcmask 1045504   ;;  %vm2306_vm3 = vcmask 1041408  }
  0x11   : > { %p606_p6 = scmp.lt.s32.totalorder %s3961_s20, 15  ;;  %s3971_s24 = sadd.s32 4294967295, %s3961_s20  ;;  %vm1350_vm4 = vcmask 31744   ;;  %vm1367_vm5 = vcmask 64512   ;;  %vm1384_vm6 = vcmask 97280   ;;  %vm1401_vm7 = vcmask 130048  }
  0x12   : > { %s5745_s14 = smov (!%p604_p5, %s3851_s14), 1  ;;  %p616_p7 = scmp.gt.s32.totalorder %s3971_s24, 0  ;;  %vm1418_vm8 = vcmask 162816   ;;  %vm1435_vm9 = vcmask 195584   ;;  %vm1452_vm10 = vcmask 228352   ;;  %vm1469_vm11 = vcmask 261120  }
  0x13   : > { %s607_s21 = scalar_select %p606_p6, %s3961_s20, 15  ;;  %vm2281_vm12 = vcmask 293888   ;;  %vm2660_vm13 = vcmask 58368  }
  0x14   : > { %s3968_s22 = sshll.u32 %s5745_s14, 5  ;;  %p2952_p8 = scmp.lt.s32.totalorder %s3971_s24, 15 }
  0x15   : > { %s2947_s23 = sshll.u32 %s607_s21, 1  ;;  %p713_p9 = scmp.eq.s32.totalorder %s3847_s13, 0 }
  0x16   : > { %s610_s25 = sadd.s32 %s3968_s22, %s2947_s23  ;;  %s5630_s21 = smov 4  }
  0x17   : > { %s3975_s26 = sshll.u32 %s610_s25, 3  ;;  %s5593_s25 = smov 20  }
  0x18   : > { %s3981_s29 = scalar_lea.vmem %s5580_s0, %s3975_s26  ;;  %p714_p10 = scmp.eq.s32.totalorder %s3847_s13, 1 }
  0x19   : > { %v719_v0 = vld [vmem:[%s3981_s29 + $0x10] sm:$0xff]  ;;  %v720_v1 = vld [vmem:[%s3981_s29 + $0x18] sm:$0xff]  ;;  %v717_v2 = vld [vmem:[%s3981_s29] sm:$0xff]  ;;  %s617_s30 = scalar_select %p616_p7, %s3971_s24, 0 }
  0x1a   : > { %v772_v3 = vrot.slane %v719_v0, 7  ;;  %v773_v4 = vrot.slane %v720_v1, 7  ;;  %v718_v5 = vld [vmem:[%s3981_s29 + $0x8] sm:$0xff]  ;;  %v769_v6 = vrot.slane %v717_v2, 7  ;;  %v721_v7 = vld [vmem:[%s3981_s29 + $0x20] sm:$0xff]  ;;  %v723_v27 = vld [vmem:[%s3981_s29 + $0x30] sm:$0xff] }
  0x1b   : > { %v722_v8 = vld [vmem:[%s3981_s29 + $0x28] sm:$0xff]  ;;  %v770_v9 = vrot.slane %v718_v5, 7  ;;  %v775_v10 = vrot.slane %v721_v7, 7  ;;  %s5747_s30 = smov (!%p2952_p8, %s617_s30), 15  ;;  %v724_v28 = vld [vmem:[%s3981_s29 + $0x38] sm:$0xff]  ;;  %v725_v33 = vld [vmem:[%s3981_s29 + $0x40] sm:$0xff] }
  0x1c   : > { %v776_v11 = vrot.slane %v722_v8, 7  ;;  %v3993_v12 = vsel %vm765_vm0, %v772_v3, %v773_v4  ;;  %v3996_v13 = vsel %vm765_vm0, 0.0, %v772_v3  ;;  %v3999_v14 = vsel %vm765_vm0, %v773_v4, 0.0  ;;  %v726_v34 = vld [vmem:[%s3981_s29 + $0x48] sm:$0xff]  ;;  %s2957_s11 = sshll.u32 %s5747_s30, 1  ;;  %v727_v39 = vld [vmem:[%s3981_s29 + $0x50] sm:$0xff]  ;;  %s4318_s30 = scalar_lea.vmem %s5583_s3, %s3975_s26 }
  0x1d   : > { %v4002_v15 = vsel %vm765_vm0, 0.0, %v769_v6  ;;  %v871_v16 = vrot.slane %v3996_v13, 1  ;;  %v872_v17 = vrot.slane %v3993_v12, 1  ;;  %v874_v18 = vrot.slane %v3999_v14, 1  ;;  %v728_v40 = vld [vmem:[%s3981_s29 + $0x58] sm:$0xff]  ;;  %s4043_s12 = sadd.s32 %s2957_s11, %s3968_s22  ;;  %v729_v1 = vld [vmem:[%s3981_s29 + $0x60] sm:$0xff] }
  0x1e   : > { %5637 = vst [vmem:[#allocation2_spill] sm:$0xff] %v4002_v15  ;;  %v4008_v19 = vsel %vm765_vm0, %v769_v6, %v770_v9  ;;  %v4011_v20 = vsel %vm765_vm0, %v770_v9, 0.0  ;;  %v866_v21 = vrot.slane %v4002_v15, 1  ;;  %v4015_v22 = vsel %vm765_vm0, %v775_v10, %v776_v11  ;;  %s2959_s23 = sshll.u32 %s4043_s12, 3  ;;  %v730_v6 = vld [vmem:[%s3981_s29 + $0x68] sm:$0xff]  ;;  %s3870_s11 = smov 24  }
  0x1f   : > { %v873_v23 = vsel %vm860_vm1, %v871_v16, %v872_v17  ;;  %v875_v24 = vsel %vm860_vm1, %v872_v17, %v874_v18  ;;  %v867_v25 = vrot.slane %v4008_v19, 1  ;;  %v869_v26 = vrot.slane %v4011_v20, 1  ;;  %s4070_s24 = scalar_select %p713_p9, 0, 255 }
  0x20   : > { %v915_v29 = vrot.slane %v3999_v14, 2  ;;  %v4026_v30 = vpack.i.bf16 %v875_v24, %v873_v23  ;;  %v4029_v31 = vsel %vm765_vm0, 0.0, %v775_v10  ;;  %v4032_v32 = vsel %vm765_vm0, %v776_v11, 0.0  ;;  %s4094_s28 = scalar_lea.vmem %s5581_s1, %s2959_s23  ;;  %s671_s12 = scalar_lea.vmem %s5584_s4, %s2959_s23 }
  0x21   : > { %v868_v35 = vsel %vm860_vm1, %v866_v21, %v867_v25  ;;  %v870_v36 = vsel %vm860_vm1, %v867_v25, %v869_v26  ;;  %v876_v37 = vrot.slane %v4029_v31, 1  ;;  %v877_v38 = vrot.slane %v4015_v22, 1  ;;  %v4123_v26 = vld [vmem:[%s671_s12] sm:%s4070_s24]  ;;  %s3866_s23 = smov 8   ;;  %s5662_s27 = smov 16  }
  0x22   : > { %3161 = vrot.lane.b32.xlu1 %v4026_v30, %s5630_s21  ;;  %v910_v41 = vrot.slane %v4011_v20, 2  ;;  %v4048_v42 = vpack.i.bf16 %v870_v36, %v868_v35  ;;  %v879_v43 = vrot.slane %v4032_v32, 1  ;;  %v778_v44 = vrot.slane %v723_v27, 7  ;;  %v3797_v35 = vld [vmem:[%s4094_s28] sm:%s4070_s24]  ;;  %p706_p12 = scmp.lt.s32.totalorder %s3847_s13, 1 }
  0x23   : > { %v878_v45 = vsel %vm860_vm1, %v876_v37, %v877_v38  ;;  %v779_v46 = vrot.slane %v724_v28, 7  ;;  %v781_v47 = vrot.slane %v725_v33, 7  ;;  %v782_v48 = vrot.slane %v726_v34, 7  ;;  %v4134_v36 = vld [vmem:[%s671_s12 + $0x8] sm:%s4070_s24]  ;;  %s3872_s12 = smov 32  }
  0x24   : > { %3156 = vrot.lane.b32.xlu0 %v4048_v42, %s5630_s21  ;;  %v880_v49 = vsel %vm860_vm1, %v877_v38, %v879_v43  ;;  %v4056_v50 = vsel %vm765_vm0, 0.0, %v778_v44  ;;  %v784_v51 = vrot.slane %v727_v39, 7  ;;  %v785_v52 = vrot.slane %v728_v40, 7  ;;  %v3800_v43 = vld [vmem:[%s4094_s28 + $0x8] sm:%s4070_s24]  ;;  %s5591_s24 = smov 16   ;;  %s632_s28 = sadd.s32 8, %s3961_s20 }
  0x25   : > { %v4059_v53 = vpack.i.bf16 %v880_v49, %v878_v45  ;;  %v4062_v54 = vsel %vm765_vm0, %v778_v44, %v779_v46  ;;  %v4065_v55 = vsel %vm765_vm0, %v779_v46, 0.0  ;;  %v881_v56 = vrot.slane %v4056_v50, 1  ;;  %p4563_p11 = scmp.lt.s32.totalorder %s632_s28, 15  ;;  %s5753_s13 = smov (!%p706_p12, %s3847_s13), 1 }
  0x26   : > { %5638 = vst [vmem:[#allocation3_spill] sm:$0xff] %v4062_v54  ;;  %v882_v57 = vrot.slane %v4062_v54, 1  ;;  %v884_v58 = vrot.slane %v4065_v55, 1  ;;  %v4075_v59 = vsel %vm765_vm0, %v781_v47, %v782_v48  ;;  %v4078_v60 = vsel %vm765_vm0, 0.0, %v781_v47 }
  0x27   : > { %5639 = vst [vmem:[#allocation4_spill] sm:$0xff] %v4075_v59  ;;  %5640 = vst [vmem:[#allocation5_spill] sm:$0xff] %v4078_v60  ;;  %3166 = vrot.lane.b32.xlu1 %v4059_v53, %s5630_s21  ;;  %v4083_v61 = vsel %vm765_vm0, %v782_v48, 0.0  ;;  %v886_v62 = vrot.slane %v4078_v60, 1  ;;  %v887_v63 = vrot.slane %v4075_v59, 1  ;;  %v4088_v0 = vsel %vm765_vm0, %v784_v51, %v785_v52  ;;  %s5749_s28 = smov (!%p4563_p11, %s632_s28), 15 }
  0x28   : > { %v883_v2 = vsel %vm860_vm1, %v881_v56, %v882_v57  ;;  %v885_v3 = vsel %vm860_vm1, %v882_v57, %v884_v58  ;;  %v889_v4 = vrot.slane %v4083_v61, 1  ;;  %v4100_v5 = vsel %vm765_vm0, 0.0, %v784_v51  ;;  %s5751_s28 = smov (!%p4563_p11, %s5749_s28), 15 }
  0x29   : > { %v4106_v7 = vpack.i.bf16 %v885_v3, %v883_v2  ;;  %v888_v8 = vsel %vm860_vm1, %v886_v62, %v887_v63  ;;  %v4110_v9 = vsel %vm765_vm0, %v785_v52, 0.0  ;;  %v891_v10 = vrot.slane %v4100_v5, 1  ;;  %s4626_s20 = sshll.u32 %s5751_s28, 1 }
  0x2a   : > { %v890_v11 = vsel %vm860_vm1, %v887_v63, %v889_v4  ;;  %v892_v16 = vrot.slane %v4088_v0, 1  ;;  %v894_v17 = vrot.slane %v4110_v9, 1  ;;  %v787_v18 = vrot.slane %v729_v1, 7 }
  0x2b   : > { %3171 = vrot.lane.b32.xlu0 %v4106_v7, %s5630_s21  ;;  %v4118_v21 = vpack.i.bf16 %v890_v11, %v888_v8  ;;  %v788_v23 = vrot.slane %v730_v6, 7  ;;  %v912_v24 = vrot.slane %v3996_v13, 2  ;;  %v913_v25 = vrot.slane %v3993_v12, 2 }
  0x2c   : > { %v893_v27 = vsel %vm860_vm1, %v891_v10, %v892_v16  ;;  %v895_v28 = vsel %vm860_vm1, %v892_v16, %v894_v17  ;;  %v4128_v33 = vsel %vm765_vm0, 0.0, %v787_v18  ;;  %v907_v34 = vrot.slane %v4002_v15, 2 }
  0x2d   : > { %3176 = vrot.lane.b32.xlu1 %v4118_v21, %s5630_s21  ;;  %v4138_v37 = vpack.i.bf16 %v895_v28, %v893_v27  ;;  %v4141_v38 = vsel %vm765_vm0, %v787_v18, %v788_v23  ;;  %v4144_v39 = vsel %vm765_vm0, %v788_v23, 0.0  ;;  %v896_v40 = vrot.slane %v4128_v33, 1 }
  0x2e   : > { %v897_v44 = vrot.slane %v4141_v38, 1  ;;  %v899_v45 = vrot.slane %v4144_v39, 1  ;;  %v914_v46 = vsel %vm901_vm2, %v912_v24, %v913_v25  ;;  %v916_v47 = vsel %vm901_vm2, %v913_v25, %v915_v29 }
  0x2f   : > { %3181 = vrot.lane.b32.xlu0 %v4138_v37, %s5630_s21  ;;  %v4157_v48 = vpack.i.bf16 %v916_v47, %v914_v46  ;;  %v908_v49 = vrot.slane %v4008_v19, 2  ;;  %v766_v51 = vrot.slane %v3797_v35, 7  ;;  %v767_v57 = vrot.slane %v3800_v43, 7 }
  0x30   : > { %v898_v52 = vsel %vm860_vm1, %v896_v40, %v897_v44  ;;  %v900_v56 = vsel %vm860_vm1, %v897_v44, %v899_v45  ;;  %v917_v4 = vrot.slane %v4029_v31, 2  ;;  %v918_v6 = vrot.slane %v4015_v22, 2 }
  0x31   : > { %v4162_v58 = vpack.i.bf16 %v900_v56, %v898_v52  ;;  %v909_v62 = vsel %vm901_vm2, %v907_v34, %v908_v49  ;;  %v911_v14 = vsel %vm901_vm2, %v908_v49, %v910_v41  ;;  %v4169_v29 = vsel %vm765_vm0, 0.0, %v766_v51 }
  0x32   : > { %5641 = vst [vmem:[#allocation6_spill] sm:$0xff] %v4169_v29  ;;  %v4171_v63 = vpack.i.bf16 %v911_v14, %v909_v62  ;;  %v4174_v1 = vsel %vm765_vm0, %v766_v51, %v767_v57  ;;  %v834_v2 = vsel %vm765_vm0, %v767_v57, 0.0  ;;  %v861_v3 = vrot.slane %v4169_v29, 1 }
  0x33   : > { %5642 = vst [vmem:[#allocation7_spill] sm:$0xff] %v4174_v1  ;;  %3186 = vrot.lane.b32.xlu1 %v4162_v58, %s5630_s21  ;;  %3196 = vrot.lane.b32.xlu0 %v4157_v48, %s3866_s23  ;;  %v862_v20 = vrot.slane %v4174_v1, 1  ;;  %v864_v41 = vrot.slane %v834_v2, 1  ;;  %v920_v8 = vrot.slane %v4032_v32, 2  ;;  %v902_v10 = vrot.slane %v4169_v29, 2 }
  0x34   : > { %v903_v11 = vrot.slane %v4174_v1, 2  ;;  %v905_v16 = vrot.slane %v834_v2, 2  ;;  %v919_v23 = vsel %vm901_vm2, %v917_v4, %v918_v6  ;;  %v927_v24 = vrot.slane %v4078_v60, 2  ;;  %v731_v2 = vld [vmem:[%s3981_s29 + $0x70] sm:$0xff] }
  0x35   : > { %v863_v17 = vsel %vm860_vm1, %v861_v3, %v862_v20  ;;  %v865_v18 = vsel %vm860_vm1, %v862_v20, %v864_v41  ;;  %v921_v27 = vsel %vm901_vm2, %v918_v6, %v920_v8  ;;  %v928_v40 = vrot.slane %v4075_v59, 2  ;;  %v732_v3 = vld [vmem:[%s3981_s29 + $0x78] sm:$0xff]  ;;  %s5601_s29 = smov 12  }
  0x36   : > { %v3205_v25 = vpack.i.bf16 %v865_v18, %v863_v17  ;;  %v904_v28 = vsel %vm901_vm2, %v902_v10, %v903_v11  ;;  %v906_v32 = vsel %vm901_vm2, %v903_v11, %v905_v16  ;;  %v4197_v34 = vpack.i.bf16 %v921_v27, %v919_v23 }
  0x37   : > { %3191 = vrot.lane.b32.xlu1 %v4171_v63, %s3866_s23  ;;  %v3210_v35 = vpack.i.bf16 %v906_v32, %v904_v28  ;;  %v930_v43 = vrot.slane %v4083_v61, 2  ;;  %v922_v44 = vrot.slane %v4056_v50, 2  ;;  %v923_v45 = vrot.slane %v4062_v54, 2 }
  0x38   : > { %3206 = vrot.lane.b32.xlu0 %v3205_v25, %s5630_s21  ;;  %v925_v46 = vrot.slane %v4065_v55, 2  ;;  %v937_v47 = vrot.slane %v4128_v33, 2  ;;  %v929_v49 = vsel %vm901_vm2, %v927_v24, %v928_v40  ;;  %v938_v52 = vrot.slane %v4141_v38, 2 }
  0x39   : > { %v931_v51 = vsel %vm901_vm2, %v928_v40, %v930_v43  ;;  %v940_v61 = vrot.slane %v4144_v39, 2  ;;  %v924_v56 = vsel %vm901_vm2, %v922_v44, %v923_v45  ;;  %v932_v62 = vrot.slane %v4100_v5, 2 }
  0x3a   : > { %v926_v57 = vsel %vm901_vm2, %v923_v45, %v925_v46  ;;  %v4215_v55 = vpack.i.bf16 %v931_v51, %v929_v49  ;;  %v933_v14 = vrot.slane %v4088_v0, 2  ;;  %v939_v39 = vsel %vm901_vm2, %v937_v47, %v938_v52 }
  0x3b   : > { %3201 = vrot.lane.b32.xlu1 %v4197_v34, %s3866_s23  ;;  %v4221_v20 = vpack.i.bf16 %v926_v57, %v924_v56  ;;  %v941_v41 = vsel %vm901_vm2, %v938_v52, %v940_v61  ;;  %v935_v4 = vrot.slane %v4110_v9, 2  ;;  %v790_v10 = vrot.slane %v731_v2, 7 }
  0x3c   : > { %3211 = vrot.lane.b32.xlu0 %v3210_v35, %s3866_s23  ;;  %v934_v6 = vsel %vm901_vm2, %v932_v62, %v933_v14  ;;  %v791_v11 = vrot.slane %v732_v3, 7  ;;  %v4230_v16 = vpack.i.bf16 %v941_v41, %v939_v39  ;;  %v4243_v28 = vpack.i.bf16 %v3993_v12, %v3996_v13  ;;  %v1502_v3 = vld [vmem:[%s4318_s30 + $0x8] sm:$0xff]  ;;  %v1503_v41 = vld [vmem:[%s4318_s30 + $0x10] sm:$0xff] }
  0x3d   : > { %v936_v8 = vsel %vm901_vm2, %v933_v14, %v935_v4  ;;  %v832_v18 = vsel %vm765_vm0, 0.0, %v790_v10  ;;  %v3235_v32 = vpack.i.bf16 %v4008_v19, %v4002_v15  ;;  %v4257_v47 = vpack.i.bf16 %v4062_v54, %v4056_v50  ;;  %v1510_v54 = vld [vmem:[%s4318_s30 + $0x48] sm:$0xff] }
  0x3e   : > { %5643 = vst [vmem:[#allocation8_spill] sm:$0xff] %v4230_v16  ;;  %v4234_v17 = vpack.i.bf16 %v936_v8, %v934_v6  ;;  %v792_v9 = vsel %vm765_vm0, %v790_v10, %v791_v11  ;;  %v842_v23 = vsel %vm765_vm0, %v791_v11, 0.0  ;;  %v944_v24 = vrot.slane %v832_v18, 1 }
  0x3f   : > { %3221 = vrot.lane.b32.xlu1 %v4215_v55, %s3866_s23  ;;  %v945_v25 = vrot.slane %v792_v9, 1  ;;  %v947_v27 = vrot.slane %v842_v23, 1  ;;  %v949_v43 = vrot.slane %v832_v18, 2  ;;  %v950_v45 = vrot.slane %v792_v9, 2 }
  0x40   : > { %3216 = vrot.lane.b32.xlu0 %v4221_v20, %s3866_s23  ;;  %v952_v46 = vrot.slane %v842_v23, 2  ;;  %v1543_v52 = vrot.slane %v4123_v26, 7  ;;  %v3245_v61 = vpack.i.bf16 %v4015_v22, %v4029_v31  ;;  %v1544_v57 = vrot.slane %v4134_v36, 7 }
  0x41   : > { %v946_v35 = vsel %vm860_vm1, %v944_v24, %v945_v25  ;;  %v948_v40 = vsel %vm860_vm1, %v945_v25, %v947_v27  ;;  %v951_v49 = vsel %vm901_vm2, %v949_v43, %v950_v45  ;;  %v3260_v14 = vpack.i.bf16 %v4088_v0, %v4100_v5 }
  0x42   : > { %v4251_v44 = vpack.i.bf16 %v948_v40, %v946_v35  ;;  %v953_v51 = vsel %vm901_vm2, %v950_v45, %v952_v46  ;;  %v4269_v62 = vsel %vm765_vm0, %v1543_v52, %v1544_v57  ;;  %v3255_v26 = vpack.i.bf16 %v4075_v59, %v4078_v60 }
  0x43   : > { %3231 = vrot.lane.b32.xlu1 %v4230_v16, %s3866_s23  ;;  %v4265_v56 = vpack.i.bf16 %v953_v51, %v951_v49  ;;  %5646 = vst [vmem:[#allocation11_spill] sm:$0xff] %v4269_v62  ;;  %v4279_v2 = vpack.i.bf16 %v792_v9, %v832_v18  ;;  %v4284_v36 = vpack.i.bf16 %v4141_v38, %v4128_v33  ;;  %v1611_v39 = vsel %vm765_vm0, %v1544_v57, 0.0 }
  0x44   : > { %3226 = vrot.lane.b32.xlu0 %v4234_v17, %s3866_s23  ;;  %5644 = vst [vmem:[#allocation9_spill] sm:$0xff] %v4251_v44  ;;  %v1547_v6 = vrot.slane %v1502_v3, 7  ;;  %v1638_v10 = vrot.slane %v4269_v62, 1  ;;  %v1640_v11 = vrot.slane %v1611_v39, 1  ;;  %v1549_v18 = vrot.slane %v1503_v41, 7 }
  0x45   : > { %5645 = vst [vmem:[#allocation10_spill] sm:$0xff] %v4265_v56  ;;  %5647 = vst [vmem:[#allocation12_spill] sm:$0xff] %v4279_v2  ;;  %v1678_v35 = vrot.slane %v4269_v62, 2  ;;  %v1680_v40 = vrot.slane %v1611_v39, 2 }
  0x46   : > { %v1612_v24 = vsel %vm765_vm0, %v1547_v6, 0.0  ;;  %v4352_v43 = vsel %vm765_vm0, 0.0, %v1549_v18 }
  0x47   : > { %3241 = vrot.lane.b32.xlu1 %v4243_v28, %s5601_s29  ;;  %5651 = vst [vmem:[#allocation16_spill] sm:$0xff] %v4352_v43  ;;  %v1645_v49 = vrot.slane %v1612_v24, 1  ;;  %v1681_v57 = vsel %vm901_vm2, %v1678_v35, %v1680_v40  ;;  %v1685_v39 = vrot.slane %v1612_v24, 2  ;;  %v1505_v40 = vld [vmem:[%s4318_s30 + $0x20] sm:$0xff] }
  0x48   : > { %3236 = vrot.lane.b32.xlu0 %v3235_v32, %s5601_s29  ;;  %v1641_v32 = vsel %vm860_vm1, %v1638_v10, %v1640_v11 }
  0x4b   : > { %3251 = vrot.lane.b32.xlu1 %v4257_v47, %s5601_s29 }
  0x4c   : > { %3246 = vrot.lane.b32.xlu0 %v3245_v61, %s5601_s29 }
  0x4f   : > { %3261 = vrot.lane.b32.xlu1 %v3260_v14, %s5601_s29 }
  0x50   : > { %3256 = vrot.lane.b32.xlu0 %v3255_v26, %s5601_s29 }
  0x53   : > { %3271 = vrot.lane.b32.xlu1 %v4279_v2, %s5601_s29 }
  0x54   : > { %3266 = vrot.lane.b32.xlu0 %v4284_v36, %s5601_s29 }
  0x57   : > { %3281 = vrot.lane.b32.xlu1 %v4026_v30, %s5591_s24 }
  0x58   : > { %3276 = vrot.lane.b32.xlu0 %v4048_v42, %s5591_s24  ;;  %v1501_v42 = vld [vmem:[%s4318_s30] sm:$0xff] }
  0x59   : > { %v1546_v4 = vrot.slane %v1501_v42, 7 }
  0x5b   : > { %3291 = vrot.lane.b32.xlu1 %v4106_v7, %s5591_s24  ;;  %v4338_v9 = vsel %vm765_vm0, %v1546_v4, %v1547_v6  ;;  %v4341_v23 = vsel %vm765_vm0, 0.0, %v1546_v4 }
  0x5c   : > { %3286 = vrot.lane.b32.xlu0 %v4059_v53, %s5591_s24  ;;  %5649 = vst [vmem:[#allocation14_spill] sm:$0xff] %v4338_v9  ;;  %5650 = vst [vmem:[#allocation15_spill] sm:$0xff] %v4341_v23  ;;  %v1642_v45 = vrot.slane %v4341_v23, 1  ;;  %v1643_v46 = vrot.slane %v4338_v9, 1  ;;  %v1682_v14 = vrot.slane %v4341_v23, 2  ;;  %v3400_v24 = vpack.i.bf16 %v4338_v9, %v4341_v23 }
  0x5e   : > { %v1644_v42 = vsel %vm860_vm1, %v1642_v45, %v1643_v46  ;;  %v1646_v3 = vsel %vm860_vm1, %v1643_v46, %v1645_v49  ;;  %v1552_v45 = vrot.slane %v1505_v40, 7  ;;  %v1687_v46 = vrot.slane %v4352_v43, 2 }
  0x5f   : > { %3301 = vrot.lane.b32.xlu1 %v4138_v37, %s5591_s24  ;;  %v3385_v4 = vpack.i.bf16 %v1646_v3, %v1644_v42 }
  0x60   : > { %3296 = vrot.lane.b32.xlu0 %v4118_v21, %s5591_s24  ;;  %v4400_v42 = vsel %vm765_vm0, 0.0, %v1552_v45 }
  0x61   : > { %5653 = vst [vmem:[#allocation18_spill] sm:$0xff] %v4400_v42  ;;  %v1652_v40 = vrot.slane %v4400_v42, 1 }
  0x63   : > { %3311 = vrot.lane.b32.xlu1 %v4251_v44, %s5591_s24  ;;  %v1516_v44 = vld [vmem:[%s4318_s30 + $0x78] sm:$0xff] }
  0x64   : > { %3306 = vrot.lane.b32.xlu0 %v4162_v58, %s5591_s24  ;;  %v1568_v1 = vrot.slane %v1516_v44, 7 }
  0x67   : > { %3321 = vrot.lane.b32.xlu1 %v4157_v48, %s5593_s25 }
  0x68   : > { %3316 = vrot.lane.b32.xlu0 %v4171_v63, %s5593_s25  ;;  %v4327_v63 = vsel %vm765_vm0, 0.0, %v1543_v52  ;;  %v1504_v52 = vld [vmem:[%s4318_s30 + $0x18] sm:$0xff] }
  0x69   : > { %5648 = vst [vmem:[#allocation13_spill] sm:$0xff] %v4327_v63  ;;  %v1637_v8 = vrot.slane %v4327_v63, 1  ;;  %v1677_v25 = vrot.slane %v4327_v63, 2  ;;  %v1550_v41 = vrot.slane %v1504_v52, 7 }
  0x6b   : > { %3331 = vrot.lane.b32.xlu1 %v4221_v20, %s5593_s25  ;;  %v1639_v27 = vsel %vm860_vm1, %v1637_v8, %v1638_v10  ;;  %v4373_v10 = vsel %vm765_vm0, %v1549_v18, %v1550_v41  ;;  %v1613_v11 = vsel %vm765_vm0, %v1550_v41, 0.0 }
  0x6c   : > { %3326 = vrot.lane.b32.xlu0 %v4197_v34, %s5593_s25  ;;  %v3380_v51 = vpack.i.bf16 %v1641_v32, %v1639_v27  ;;  %5652 = vst [vmem:[#allocation17_spill] sm:$0xff] %v4373_v10  ;;  %v1647_v27 = vrot.slane %v4352_v43, 1  ;;  %v1648_v32 = vrot.slane %v4373_v10, 1  ;;  %v3405_v18 = vpack.i.bf16 %v4373_v10, %v4352_v43 }
  0x6d   : > { %v1688_v52 = vrot.slane %v4373_v10, 2 }
  0x6e   : > { %v1649_v49 = vsel %vm860_vm1, %v1647_v27, %v1648_v32  ;;  %v3809_v27 = vld [vmem:[%s5586_s6 + $0x8] sm:$0xff]  }
  0x6f   : > { %3341 = vrot.lane.b32.xlu1 %v4234_v17, %s5593_s25 }
  0x70   : > { %3336 = vrot.lane.b32.xlu0 %v4215_v55, %s5593_s25 }
  0x73   : > { %3351 = vrot.lane.b32.xlu1 %v4265_v56, %s5593_s25 }
  0x74   : > { %3346 = vrot.lane.b32.xlu0 %v4230_v16, %s5593_s25 }
  0x77   : > { %3361 = vrot.lane.b32.xlu1 %v3245_v61, %s3870_s11  ;;  %v1679_v61 = vsel %vm901_vm2, %v1677_v25, %v1678_v35  ;;  %v1650_v35 = vrot.slane %v1613_v11, 1 }
  0x78   : > { %3356 = vrot.lane.b32.xlu0 %v4243_v28, %s3870_s11  ;;  %v3375_v28 = vpack.i.bf16 %v4352_v43, %v4100_v5 }
  0x7b   : > { %3371 = vrot.lane.b32.xlu1 %v3255_v26, %s3870_s11  ;;  %v1683_v26 = vrot.slane %v4338_v9, 2 }
  0x7c   : > { %3366 = vrot.lane.b32.xlu0 %v4257_v47, %s3870_s11  ;;  %v3390_v47 = vpack.i.bf16 %v1681_v57, %v1679_v61  ;;  %v1506_v61 = vld [vmem:[%s4318_s30 + $0x28] sm:$0xff]  ;;  %v4393_v57 = vld [vmem:[%s4318_s30 + $0x30] sm:$0xff] }
  0x7d   : > { %v1684_v6 = vsel %vm901_vm2, %v1682_v14, %v1683_v26  ;;  %v1686_v8 = vsel %vm901_vm2, %v1683_v26, %v1685_v39  ;;  %v1553_v3 = vrot.slane %v1506_v61, 7  ;;  %v1555_v26 = vrot.slane %v4393_v57, 7 }
  0x7e   : > { %v3395_v25 = vpack.i.bf16 %v1686_v8, %v1684_v6  ;;  %v1689_v39 = vsel %vm901_vm2, %v1687_v46, %v1688_v52  ;;  %v3816_v46 = vld [vmem:[%s5587_s7 + $0x8] sm:$0xff]  }
  0x7f   : > { %3381 = vrot.lane.b32.xlu1 %v3380_v51, %s5630_s21  ;;  %v1651_v51 = vsel %vm860_vm1, %v1648_v32, %v1650_v35  ;;  %v4417_v8 = vsel %vm765_vm0, %v1552_v45, %v1553_v3 }
  0x80   : > { %3376 = vrot.lane.b32.xlu0 %v3375_v28, %s3870_s11  ;;  %v1690_v28 = vrot.slane %v1613_v11, 2  ;;  %v4397_v14 = vpack.i.bf16 %v1651_v51, %v1649_v49  ;;  %5654 = vst [vmem:[#allocation19_spill] sm:$0xff] %v4417_v8  ;;  %v4422_v11 = vsel %vm765_vm0, 0.0, %v1555_v26  ;;  %v3817_v51 = vld [vmem:[%s5586_s6 + $0x10] ss:$0 sps:$4 sm:$0x33]  }
  0x81   : > { %5655 = vst [vmem:[#allocation20_spill] sm:$0xff] %v4422_v11  ;;  %v3440_v32 = vpack.i.bf16 %v4422_v11, %v4417_v8 }
  0x82   : > { %v1691_v41 = vsel %vm901_vm2, %v1688_v52, %v1690_v28 }
  0x83   : > { %3391 = vrot.lane.b32.xlu1 %v3390_v47, %s3866_s23  ;;  %v3807_v47 = vld [vmem:[%s5586_s6] sm:$0xff]   ;;  %v4414_v6 = vpack.i.bf16 %v1691_v41, %v1689_v39  ;;  %v3824_v39 = vld [vmem:[%s5587_s7 + $0x10] ss:$0 sps:$4 sm:$0x33]   ;;  %v1692_v41 = vrot.slane %v4400_v42, 2 }
  0x84   : > { %3386 = vrot.lane.b32.xlu0 %v3385_v4, %s5630_s21  ;;  %3067 = vmatprep.subr.bf16.mxu0 %v3807_v47 }
  0x85   : > { %3068 = vmatpush3.bf16.msra.mxu0 %v3807_v47  ;;  %v1693_v47 = vrot.slane %v4417_v8, 2 }
  0x86   : > { %3069 = vmatprep.subr.bf16.mxu0 %v3809_v27 }
  0x87   : > { %3401 = vrot.lane.b32.xlu1 %v3400_v24, %s5601_s29  ;;  %v1614_v24 = vsel %vm765_vm0, %v1553_v3, 0.0  ;;  %v2447_v3 = vsel %vm2306_vm3, %v3817_v51, 0 }
  0x88   : > { %3396 = vrot.lane.b32.xlu0 %v3395_v25, %s3866_s23  ;;  %v1655_v45 = vrot.slane %v1614_v24, 1 }
  0x89   : > { %3070 = vmatpush3.bf16.msra.mxu0 %v3809_v27  ;;  %v2308_v27 = vsel %vm2306_vm3, %v3824_v39, 0 }
  0x8a   : > { %3106 = vmatprep.subr.msk.bf16.mxu0 %vm2306_vm3, %v3817_v51 }
  0x8b   : > { %3411 = vrot.lane.b32.xlu1 %v3385_v4, %s5591_s24  ;;  %v3430_v4 = vpack.i.bf16 %v4400_v42, %v4373_v10 }
  0x8c   : > { %3406 = vrot.lane.b32.xlu0 %v3405_v18, %s5601_s29  ;;  %v1653_v18 = vrot.slane %v4417_v8, 1 }
  0x8d   : > { %3072 = vmatpush3.bf16.msra.mxu0 %v2447_v3 }
  0x8e   : > { %v1654_v52 = vsel %vm860_vm1, %v1652_v40, %v1653_v18  ;;  %v1656_v28 = vsel %vm860_vm1, %v1653_v18, %v1655_v45  ;;  %v1508_v45 = vld [vmem:[%s4318_s30 + $0x38] sm:$0xff] }
  0x8f   : > { %3421 = vrot.lane.b32.xlu1 %v3395_v25, %s5593_s25  ;;  %v3808_v25 = vld [vmem:[%s5587_s7] sm:$0xff]  }
  0x90   : > { %3416 = vrot.lane.b32.xlu0 %v4397_v14, %s5591_s24  ;;  %3045 = vmatprep.subr.bf16.mxu1 %v3808_v25  ;;  %s5664_s24 = smov 20  }
  0x91   : > { %3046 = vmatpush3.bf16.msra.mxu1 %v3808_v25 }
  0x92   : > { %3047 = vmatprep.subr.bf16.mxu1 %v3816_v46 }
  0x93   : > { %3431 = vrot.lane.b32.xlu1 %v3430_v4, %s3870_s11  ;;  %v1695_v4 = vrot.slane %v1614_v24, 2 }
  0x94   : > { %3426 = vrot.lane.b32.xlu0 %v4414_v6, %s5593_s25  ;;  %v4436_v35 = vpop.permute.xlu1 %3161  ;;  %s3871_s25 = smov 28  }
  0x95   : > { %3048 = vmatpush3.bf16.msra.mxu1 %v3816_v46  ;;  %v1696_v40 = vsel %vm901_vm2, %v1693_v47, %v1695_v4 }
  0x96   : > { %v4444_v49 = vpop.permute.xlu0 %3156  ;;  %3105 = vmatprep.subr.msk.bf16.mxu1 %vm2306_vm3, %v3824_v39  ;;  %v3500_v39 = vpack.i.bf16 %v4417_v8, %v4400_v42 }
  0x97   : > { %3441 = vrot.lane.b32.xlu1 %v3440_v32, %s3870_s11 }
  0x98   : > { %3436 = vrot.lane.b32.xlu0 %v4026_v30, %s3871_s25  ;;  %v3460_v30 = vpack.i.bf16 %v1656_v28, %v1654_v52 }
  0x99   : > { %v4453_v61 = vpop.permute.xlu1 %3166  ;;  %3050 = vmatpush3.bf16.msra.mxu1 %v2308_v27 }
  0x9b   : > { %3451 = vrot.lane.b32.xlu1 %v4059_v53, %s3871_s25  ;;  %v1694_v53 = vsel %vm901_vm2, %v1692_v41, %v1693_v47  ;;  %v1657_v41 = vrot.slane %v4422_v11, 1 }
  0x9c   : > { %3446 = vrot.lane.b32.xlu0 %v4397_v14, %s3871_s25  ;;  %v3480_v24 = vpack.i.bf16 %v1696_v40, %v1694_v53  ;;  %v1697_v53 = vrot.slane %v4422_v11, 2 }
  0x9d   : > { %v4464_v25 = vpop.permute.xlu0 %3171 }
  0x9f   : > { %3461 = vrot.lane.b32.xlu1 %v3460_v30, %s3871_s25  ;;  %v4467_v32 = vpop.permute.xlu1 %3176 }
  0xa0   : > { %5656 = vst [vmem:[#allocation21_spill] sm:$0xff] %v4467_v32  ;;  %3456 = vrot.lane.b32.xlu0 %v4157_v48, %s3872_s12  ;;  %v1556_v48 = vrot.slane %v1508_v45, 7 }
  0xa1   : > { %v4473_v18 = vpop.permute.xlu0 %3181 }
  0xa2   : > { %v1615_v3 = vsel %vm765_vm0, %v1556_v48, 0.0 }
  0xa3   : > { %3471 = vrot.lane.b32.xlu1 %v4197_v34, %s3872_s12  ;;  %v4494_v34 = vsel %vm765_vm0, %v1555_v26, %v1556_v48  ;;  %v1660_v47 = vrot.slane %v1615_v3, 1  ;;  %v1509_v26 = vld [vmem:[%s4318_s30 + $0x40] sm:$0xff]  ;;  %v1700_v59 = vrot.slane %v1615_v3, 2 }
  0xa4   : > { %3466 = vrot.lane.b32.xlu0 %v4414_v6, %s3872_s12  ;;  %5659 = vst [vmem:[#allocation24_spill] sm:$0xff] %v4494_v34  ;;  %v1658_v57 = vrot.slane %v4494_v34, 1  ;;  %v1558_v27 = vrot.slane %v1509_v26, 7  ;;  %v1698_v60 = vrot.slane %v4494_v34, 2 }
  0xa5   : > { %v4480_v46 = vpop.permute.xlu1 %3186  ;;  %v4482_v51 = vpop.permute.xlu0 %3196 }
  0xa6   : > { %v1659_v45 = vsel %vm860_vm1, %v1657_v41, %v1658_v57  ;;  %v1661_v48 = vsel %vm860_vm1, %v1658_v57, %v1660_v47  ;;  %v4527_v26 = vsel %vm765_vm0, 0.0, %v1558_v27  ;;  %v1699_v41 = vsel %vm901_vm2, %v1697_v53, %v1698_v60 }
  0xa7   : > { %3481 = vrot.lane.b32.xlu1 %v3480_v24, %s3872_s12  ;;  %5663 = vst [vmem:[#allocation27_spill] sm:$0xff] %v4527_v26  ;;  %v1701_v57 = vsel %vm901_vm2, %v1698_v60, %v1700_v59  ;;  %v1662_v53 = vrot.slane %v4527_v26, 1 }
  0xa8   : > { %3476 = vrot.lane.b32.xlu0 %v4397_v14, %s5630_s21  ;;  %v4540_v47 = vpack.i.bf16 %v1701_v57, %v1699_v41 }
  0xa9   : > { %v4487_v52 = vpop.permute.xlu1 %3191 }
  0xaa   : > { %5657 = vst [vmem:[#allocation22_spill] sm:$0xff] %v4487_v52  ;;  %v4489_v28 = vpop.permute.xlu0 %3206 }
  0xab   : > { %5658 = vst [vmem:[#allocation23_spill] sm:$0xff] %v4489_v28  ;;  %3491 = vrot.lane.b32.xlu1 %v4414_v6, %s3866_s23  ;;  %v3505_v6 = vpack.i.bf16 %v4494_v34, %v4422_v11  ;;  %v1559_v11 = vrot.slane %v1510_v54, 7 }
  0xac   : > { %3486 = vrot.lane.b32.xlu0 %v3460_v30, %s5630_s21 }
  0xad   : > { %v4502_v14 = vpop.permute.xlu1 %3201  ;;  %v4543_v54 = vsel %vm765_vm0, %v1558_v27, %v1559_v11  ;;  %v1616_v59 = vsel %vm765_vm0, %v1559_v11, 0.0 }
  0xae   : > { %v4507_v4 = vpop.permute.xlu0 %3211  ;;  %5665 = vst [vmem:[#allocation28_spill] sm:$0xff] %v4543_v54  ;;  %v1663_v27 = vrot.slane %v4543_v54, 1  ;;  %v1703_v43 = vrot.slane %v4543_v54, 2  ;;  %v1705_v10 = vrot.slane %v1616_v59, 2  ;;  %v3600_v44 = vpack.i.bf16 %v4543_v54, %v4527_v26 }
  0xaf   : > { %5660 = vst [vmem:[#allocation25_spill] sm:$0xff] %v4507_v4  ;;  %3501 = vrot.lane.b32.xlu1 %v3500_v39, %s5601_s29  ;;  %v4524_v39 = vpack.i.bf16 %v1661_v48, %v1659_v45  ;;  %v1665_v45 = vrot.slane %v1616_v59, 1  ;;  %v1513_v59 = vld [vmem:[%s4318_s30 + $0x60] sm:$0xff] }
  0xb0   : > { %3496 = vrot.lane.b32.xlu0 %v3480_v24, %s3866_s23  ;;  %v1664_v41 = vsel %vm860_vm1, %v1662_v53, %v1663_v27  ;;  %v1564_v23 = vrot.slane %v1513_v59, 7 }
  0xb1   : > { %v4514_v40 = vpop.permute.xlu1 %3221  ;;  %v1666_v57 = vsel %vm860_vm1, %v1663_v27, %v1665_v45 }
  0xb2   : > { %5661 = vst [vmem:[#allocation26_spill] sm:$0xff] %v4514_v40  ;;  %v4520_v32 = vpop.permute.xlu0 %3216 }
  0xb3   : > { %3511 = vrot.lane.b32.xlu1 %v3460_v30, %s5662_s27  ;;  %v3530_v30 = vpack.i.bf16 %v4527_v26, %v4494_v34  ;;  %v1512_v34 = vld [vmem:[%s4318_s30 + $0x58] sm:$0xff] }
  0xb4   : > { %3506 = vrot.lane.b32.xlu0 %v3505_v6, %s5601_s29  ;;  %v1562_v27 = vrot.slane %v1512_v34, 7  ;;  %s641_s29 = sadd.s32 %s4626_s20, %s3968_s22 }
  0xb5   : > { %v4529_v40 = vpop.permute.xlu1 %3231  ;;  %s4661_s22 = sshll.u32 %s641_s29, 3 }
  0xb6   : > { %v4533_v3 = vpop.permute.xlu0 %3226  ;;  %s643_s29 = scalar_lea.vmem %s5582_s2, %s4661_s22 }
  0xb7   : > { %3521 = vrot.lane.b32.xlu1 %v3480_v24, %s5664_s24  ;;  %v3540_v24 = vpack.i.bf16 %v4088_v0, %v4543_v54 }
  0xb8   : > { %3516 = vrot.lane.b32.xlu0 %v4524_v39, %s5662_s27 }
  0xb9   : > { %v4545_v6 = vpop.permute.xlu1 %3241 }
  0xba   : > { %5666 = vst [vmem:[#allocation29_spill] sm:$0xff] %v4545_v6  ;;  %v4548_v60 = vpop.permute.xlu0 %3236 }
  0xbb   : > { %5667 = vst [vmem:[#allocation30_spill] sm:$0xff] %v4548_v60  ;;  %3531 = vrot.lane.b32.xlu1 %v3530_v30, %s3870_s11  ;;  %v1511_v30 = vld [vmem:[%s4318_s30 + $0x50] sm:$0xff] }
  0xbc   : > { %3526 = vrot.lane.b32.xlu0 %v4540_v47, %s5664_s24  ;;  %v1561_v53 = vrot.slane %v1511_v30, 7  ;;  %v1515_v30 = vld [vmem:[%s4318_s30 + $0x70] sm:$0xff] }
  0xbd   : > { %v4558_v48 = vpop.permute.xlu1 %3251  ;;  %v1567_v62 = vrot.slane %v1515_v30, 7 }
  0xbe   : > { %v4560_v11 = vpop.permute.xlu0 %3246  ;;  %v4600_v34 = vsel %vm765_vm0, %v1561_v53, %v1562_v27 }
  0xbf   : > { %3541 = vrot.lane.b32.xlu1 %v3540_v24, %s3870_s11  ;;  %v1702_v24 = vrot.slane %v4527_v26, 2  ;;  %5670 = vst [vmem:[#allocation32_spill] sm:$0xff] %v4600_v34  ;;  %v1668_v63 = vrot.slane %v4600_v34, 1  ;;  %v1569_v6 = vsel %vm765_vm0, %v1567_v62, %v1568_v1  ;;  %v1609_v26 = vsel %vm765_vm0, 0.0, %v1567_v62 }
  0xc0   : > { %3536 = vrot.lane.b32.xlu0 %v4106_v7, %s3871_s25  ;;  %v4581_v7 = vpack.i.bf16 %v1666_v57, %v1664_v41  ;;  %v1706_v41 = vsel %vm901_vm2, %v1703_v43, %v1705_v10  ;;  %v4603_v57 = vsel %vm765_vm0, 0.0, %v1561_v53  ;;  %v1719_v15 = vrot.slane %v1609_v26, 1 }
  0xc1   : > { %v4573_v42 = vpop.permute.xlu1 %3261  ;;  %5671 = vst [vmem:[#allocation33_spill] sm:$0xff] %v4603_v57  ;;  %v1667_v53 = vrot.slane %v4603_v57, 1 }
  0xc2   : > { %5669 = vst [vmem:[#allocation31_spill] sm:$0xff] %v4573_v42  ;;  %v4575_v8 = vpop.permute.xlu0 %3256  ;;  %v1514_v42 = vld [vmem:[%s4318_s30 + $0x68] sm:$0xff]  ;;  %s4679_s30 = scalar_select %p714_p10, 0, 255 }
  0xc3   : > { %3551 = vrot.lane.b32.xlu1 %v4118_v21, %s3871_s25  ;;  %v1704_v21 = vsel %vm901_vm2, %v1702_v24, %v1703_v43  ;;  %v1617_v24 = vsel %vm765_vm0, %v1562_v27, 0.0  ;;  %v1565_v43 = vrot.slane %v1514_v42, 7  ;;  %v1707_v27 = vrot.slane %v4603_v57, 2 }
  0xc4   : > { %3546 = vrot.lane.b32.xlu0 %v4524_v39, %s3871_s25  ;;  %v4615_v2 = vpack.i.bf16 %v1706_v41, %v1704_v21  ;;  %v1708_v42 = vrot.slane %v4600_v34, 2  ;;  %v1710_v21 = vrot.slane %v1617_v24, 2  ;;  %v4636_v41 = vsel %vm765_vm0, 0.0, %v1564_v23 }
  0xc5   : > { %v4589_v45 = vpop.permute.xlu1 %3271  ;;  %v1618_v59 = vsel %vm765_vm0, %v1565_v43, 0.0  ;;  %5675 = vst [vmem:[#allocation37_spill] sm:$0xff] %v4636_v41  ;;  %v1712_v28 = vrot.slane %v4636_v41, 2 }
  0xc6   : > { %v4593_v56 = vpop.permute.xlu0 %3266  ;;  %v1675_v29 = vrot.slane %v1618_v59, 1  ;;  %v1709_v54 = vsel %vm901_vm2, %v1707_v27, %v1708_v42  ;;  %v1711_v4 = vsel %vm901_vm2, %v1708_v42, %v1710_v21  ;;  %v1715_v62 = vrot.slane %v1618_v59, 2 }
  0xc7   : > { %3561 = vrot.lane.b32.xlu1 %v4581_v7, %s3871_s25  ;;  %v4675_v59 = vpack.i.bf16 %v1711_v4, %v1709_v54 }
  0xc8   : > { %3556 = vrot.lane.b32.xlu0 %v4221_v20, %s3872_s12  ;;  %v1670_v20 = vrot.slane %v1617_v24, 1  ;;  %v1619_v24 = vsel %vm765_vm0, %v1568_v1, 0.0 }
  0xc9   : > { %v4613_v10 = vpop.permute.xlu1 %3281  ;;  %v1722_v16 = vrot.slane %v1619_v24, 1 }
  0xca   : > { %5672 = vst [vmem:[#allocation34_spill] sm:$0xff] %v4613_v10  ;;  %v4617_v9 = vpop.permute.xlu0 %3276 }
  0xcb   : > { %5673 = vst [vmem:[#allocation35_spill] sm:$0xff] %v4617_v9  ;;  %3571 = vrot.lane.b32.xlu1 %v4215_v55, %s3872_s12  ;;  %v4633_v55 = vsel %vm765_vm0, %v1564_v23, %v1565_v43  ;;  %v1672_v9 = vrot.slane %v4636_v41, 1  ;;  %v1669_v23 = vsel %vm860_vm1, %v1667_v53, %v1668_v63  ;;  %v1671_v43 = vsel %vm860_vm1, %v1668_v63, %v1670_v20 }
  0xcc   : > { %3566 = vrot.lane.b32.xlu0 %v4540_v47, %s3872_s12  ;;  %5674 = vst [vmem:[#allocation36_spill] sm:$0xff] %v4633_v55  ;;  %v1673_v10 = vrot.slane %v4633_v55, 1  ;;  %v1713_v1 = vrot.slane %v4633_v55, 2  ;;  %v1720_v53 = vrot.slane %v1569_v6, 1  ;;  %v4673_v42 = vpack.i.bf16 %v1671_v43, %v1669_v23 }
  0xcd   : > { %v4638_v30 = vpop.permute.xlu1 %3291  ;;  %v4685_v21 = vpack.i.bf16 %v4633_v55, %v4636_v41  ;;  %v1724_v43 = vrot.slane %v1609_v26, 2  ;;  %v1727_v41 = vrot.slane %v1619_v24, 2  ;;  %v4707_v55 = vld [vmem:[%s643_s29] sm:%s4679_s30]  ;;  %v3168_v24 = vunpack.i.l.bf16 %v4453_v61 }
  0xce   : > { %v4642_v60 = vpop.permute.xlu0 %3286  ;;  %v1674_v20 = vsel %vm860_vm1, %v1672_v9, %v1673_v10  ;;  %v1676_v27 = vsel %vm860_vm1, %v1673_v10, %v1675_v29  ;;  %v1714_v29 = vsel %vm901_vm2, %v1712_v28, %v1713_v1  ;;  %v1716_v9 = vsel %vm901_vm2, %v1713_v1, %v1715_v62 }
  0xcf   : > { %3581 = vrot.lane.b32.xlu1 %v4615_v2, %s3872_s12  ;;  %v1721_v54 = vsel %vm860_vm1, %v1719_v15, %v1720_v53  ;;  %v1723_v10 = vsel %vm860_vm1, %v1720_v53, %v1722_v16  ;;  %v1725_v28 = vrot.slane %v1569_v6, 2  ;;  %v4702_v1 = vpack.i.bf16 %v1716_v9, %v1714_v29 }
  0xd0   : > { %3576 = vrot.lane.b32.xlu0 %v4524_v39, %s5630_s21  ;;  %v4667_v39 = vpack.i.bf16 %v4600_v34, %v4603_v57  ;;  %v4704_v62 = vpack.i.bf16 %v1569_v6, %v1609_v26  ;;  %v4712_v15 = vpack.i.bf16 %v1723_v10, %v1721_v54  ;;  %v3163_v16 = vunpack.i.l.bf16 %v4436_v35  ;;  %v4721_v26 = vld [vmem:[%s643_s29 + $0x8] sm:%s4679_s30]  ;;  %s4843_s29 = scalar_lea.vmem %s5585_s5, %s4661_s22  ;;  %s5685_s22 = smov 4  }
  0xd1   : > { %v4659_v52 = vpop.permute.xlu1 %3301  ;;  %v3169_v53 = vunpack.i.h.bf16 %v4453_v61  ;;  %v4726_v29 = vsel %vm901_vm2, %v1724_v43, %v1725_v28  ;;  %v4729_v9 = vsel %vm901_vm2, %v1725_v28, %v1727_v41  ;;  %v3184_v54 = vunpack.i.h.bf16 %v4473_v18 }
  0xd2   : > { %v4663_v63 = vpop.permute.xlu0 %3296  ;;  %v3183_v61 = vunpack.i.l.bf16 %v4473_v18  ;;  %v3189_v10 = vunpack.i.h.bf16 %v4480_v46  ;;  %v3188_v57 = vunpack.i.l.bf16 %v4480_v46  ;;  %v3199_v34 = vunpack.i.h.bf16 %v4482_v51 }
  0xd3   : > { %3591 = vrot.lane.b32.xlu1 %v4540_v47, %s3866_s23  ;;  %v4695_v47 = vpack.i.bf16 %v1676_v27, %v1674_v20  ;;  %v3164_v20 = vunpack.i.h.bf16 %v4436_v35  ;;  %v3198_v41 = vunpack.i.l.bf16 %v4482_v51  ;;  %v1355_v28 = vsel %vm1350_vm4, %v3996_v13, %v3163_v16 }
  0xd4   : > { %3586 = vrot.lane.b32.xlu0 %v4581_v7, %s5630_s21  ;;  %s5676_s21 = smov 12   ;;  %v4749_v46 = vsel %vm1350_vm4, %v4015_v22, %v3169_v53  ;;  %v3233_v35 = vunpack.i.l.bf16 %v4529_v40  ;;  %v3229_v13 = vunpack.i.h.bf16 %v4533_v3  ;;  %v3228_v16 = vunpack.i.l.bf16 %v4533_v3 }
  0xd5   : > { %v4693_v4 = vpop.permute.xlu1 %3311  ;;  %v1356_v43 = vsel %vm1350_vm4, %v3993_v12, %v3164_v20  ;;  %v4753_v12 = vsel %vm1350_vm4, %v4029_v31, %v3168_v24  ;;  %v3234_v20 = vunpack.i.h.bf16 %v4529_v40  ;;  %v1364_v31 = vsel %vm1350_vm4, %v4088_v0, %v3184_v54 }
  0xd6   : > { %v4699_v23 = vpop.permute.xlu0 %3306  ;;  %v1366_v53 = vsel %vm1350_vm4, %v4141_v38, %v3189_v10  ;;  %v1365_v24 = vsel %vm1350_vm4, %v4128_v33, %v3188_v57  ;;  %v4778_v40 = vsel %vm1367_vm5, %v1356_v43, %v3199_v34  ;;  %v1372_v3 = vsel %vm1367_vm5, %v1355_v28, %v3198_v41 }
  0xd7   : > { %3601 = vrot.lane.b32.xlu1 %v3600_v44, %s5676_s21  ;;  %v3173_v44 = vunpack.i.l.bf16 %v4464_v25  ;;  %v3204_v0 = vunpack.i.h.bf16 %v4502_v14  ;;  %v3273_v33 = vunpack.i.l.bf16 %v4589_v45  ;;  %v3269_v38 = vunpack.i.h.bf16 %v4593_v56 }
  0xd8   : > { %3596 = vrot.lane.b32.xlu0 %v4615_v2, %s3866_s23  ;;  %v1383_v34 = vsel %vm1367_vm5, %v1366_v53, %v3234_v20  ;;  %v1382_v54 = vsel %vm1367_vm5, %v1365_v24, %v3233_v35  ;;  %v3254_v43 = vunpack.i.h.bf16 %v4558_v48  ;;  %v3314_v41 = vunpack.i.h.bf16 %v4693_v4 }
  0xd9   : > { %v4718_v27 = vpop.permute.xlu1 %3321  ;;  %v4757_v51 = vsel %vm1350_vm4, %v4056_v50, %v3173_v44  ;;  %v1363_v50 = vsel %vm1350_vm4, %v4100_v5, %v3183_v61  ;;  %v3203_v44 = vunpack.i.l.bf16 %v4502_v14  ;;  %v3274_v5 = vunpack.i.h.bf16 %v4589_v45 }
  0xda   : > { %v4723_v6 = vpop.permute.xlu0 %3316  ;;  %v1380_v61 = vsel %vm1367_vm5, %v1363_v50, %v3228_v16  ;;  %v1381_v14 = vsel %vm1367_vm5, %v1364_v31, %v3229_v13  ;;  %v3253_v45 = vunpack.i.l.bf16 %v4558_v48  ;;  %v3249_v28 = vunpack.i.h.bf16 %v4560_v11 }
  0xdb   : > { %3611 = vrot.lane.b32.xlu1 %v4581_v7, %s5662_s27  ;;  %v3248_v35 = vunpack.i.l.bf16 %v4560_v11  ;;  %v3309_v20 = vunpack.i.h.bf16 %v4699_v23  ;;  %v3308_v13 = vunpack.i.l.bf16 %v4699_v23  ;;  %v1399_v48 = vsel %vm1384_vm6, %v1382_v54, %v3273_v33 }
  0xdc   : > { %3606 = vrot.lane.b32.xlu0 %v4667_v39, %s5676_s21  ;;  %v1400_v16 = vsel %vm1384_vm6, %v1383_v34, %v3274_v5  ;;  %v1398_v31 = vsel %vm1384_vm6, %v1381_v14, %v3269_v38  ;;  %v3294_v50 = vunpack.i.h.bf16 %v4638_v30  ;;  %v3293_v11 = vunpack.i.l.bf16 %v4638_v30 }
  0xdd   : > { %v4759_v7 = vpop.permute.xlu1 %3331  ;;  %v1415_v38 = vsel %vm1401_vm7, %v1398_v31, %v3309_v20  ;;  %v3289_v34 = vunpack.i.h.bf16 %v4642_v60 }
  0xde   : > { %v4765_v22 = vpop.permute.xlu0 %3326 }
  0xdf   : > { %3621 = vrot.lane.b32.xlu1 %v4615_v2, %s5664_s24  ;;  %v3268_v2 = vunpack.i.l.bf16 %v4593_v56  ;;  %v3313_v56 = vunpack.i.l.bf16 %v4693_v4 }
  0xe0   : > { %3616 = vrot.lane.b32.xlu0 %v4673_v42, %s5662_s27 }
  0xe1   : > { %v4789_v57 = vpop.permute.xlu1 %3341  ;;  %v1397_v4 = vsel %vm1384_vm6, %v1380_v61, %v3268_v2  ;;  %v1416_v23 = vsel %vm1401_vm7, %v1399_v48, %v3313_v56  ;;  %v3334_v48 = vunpack.i.h.bf16 %v4759_v7 }
  0xe2   : > { %5677 = vst [vmem:[#allocation38_spill] sm:$0xff] %v4789_v57  ;;  %v4795_v10 = vpop.permute.xlu0 %3336  ;;  %v1417_v57 = vsel %vm1401_vm7, %v1400_v16, %v3314_v41  ;;  %v1414_v5 = vsel %vm1401_vm7, %v1397_v4, %v3308_v13  ;;  %v3333_v41 = vunpack.i.l.bf16 %v4759_v7  ;;  %v3328_v16 = vunpack.i.l.bf16 %v4765_v22 }
  0xe3   : > { %3631 = vrot.lane.b32.xlu1 %v4667_v39, %s3870_s11 }
  0xe4   : > { %3626 = vrot.lane.b32.xlu0 %v4675_v59, %s5664_s24 }
  0xe5   : > { %v3352_v39 = vpop.permute.xlu1 %3351 }
  0xe6   : > { %v3354_v53 = vunpack.i.h.bf16 %v3352_v39  ;;  %v3353_v24 = vunpack.i.l.bf16 %v3352_v39  ;;  %v3347_v18 = vpop.permute.xlu0 %3346  ;;  %v3820_v39 = vld [vmem:[%s4843_s29] sm:%s4679_s30] }
  0xe7   : > { %v3349_v33 = vunpack.i.h.bf16 %v3347_v18  ;;  %v3348_v54 = vunpack.i.l.bf16 %v3347_v18  ;;  %3641 = vrot.lane.b32.xlu1 %v4138_v37, %s3871_s25  ;;  %v3288_v18 = vunpack.i.l.bf16 %v4642_v60  ;;  %v3218_v60 = vunpack.i.l.bf16 %v4520_v32 }
  0xe8   : > { %v4822_v30 = vsel %vm1418_vm8, %v1416_v23, %v3353_v24  ;;  %v4825_v2 = vsel %vm1418_vm8, %v1417_v57, %v3354_v53  ;;  %3636 = vrot.lane.b32.xlu0 %v4284_v36, %s3870_s11  ;;  %v1375_v36 = vsel %vm1367_vm5, %v4749_v46, %v3204_v0  ;;  %v1374_v57 = vsel %vm1367_vm5, %v4753_v12, %v3203_v44 }
  0xe9   : > { %5678 = vst [vmem:[#allocation39_spill] sm:$0xff] %v4822_v30  ;;  %5679 = vst [vmem:[#allocation40_spill] sm:$0xff] %v4825_v2  ;;  %v4832_v37 = vsel %vm1418_vm8, %v1414_v5, %v3348_v54  ;;  %v4835_v61 = vsel %vm1418_vm8, %v1415_v38, %v3349_v33  ;;  %v4837_v14 = vpop.permute.xlu1 %3361  ;;  %v1391_v20 = vsel %vm1384_vm6, %v1374_v57, %v3253_v45  ;;  %v3258_v0 = vunpack.i.l.bf16 %v4575_v8  ;;  %v5694_v2 = vld [vmem:[#allocation7_spill] sm:$0xff] }
  0xea   : > { %5680 = vst [vmem:[#allocation41_spill] sm:$0xff] %v4835_v61  ;;  %v4851_v56 = vpop.permute.xlu0 %3356  ;;  %v1392_v13 = vsel %vm1384_vm6, %v1375_v36, %v3254_v43  ;;  %v1389_v46 = vsel %vm1384_vm6, %v1372_v3, %v3248_v35  ;;  %v1390_v12 = vsel %vm1384_vm6, %v4778_v40, %v3249_v28  ;;  %v3329_v44 = vunpack.i.h.bf16 %v4765_v22 }
  0xeb   : > { %3651 = vrot.lane.b32.xlu1 %v4673_v42, %s3871_s25  ;;  %v1408_v7 = vsel %vm1401_vm7, %v1391_v20, %v3293_v11  ;;  %v1409_v43 = vsel %vm1401_vm7, %v1392_v13, %v3294_v50  ;;  %v1406_v45 = vsel %vm1401_vm7, %v1389_v46, %v3288_v18  ;;  %v1407_v3 = vsel %vm1401_vm7, %v1390_v12, %v3289_v34  ;;  %v3823_v50 = vld [vmem:[%s4843_s29 + $0x8] sm:%s4679_s30] }
  0xec   : > { %3646 = vrot.lane.b32.xlu0 %v4685_v21, %s3870_s11  ;;  %v3298_v40 = vunpack.i.l.bf16 %v4663_v63  ;;  %v1425_v28 = vsel %vm1418_vm8, %v1408_v7, %v3333_v41  ;;  %v1426_v53 = vsel %vm1418_vm8, %v1409_v43, %v3334_v48  ;;  %v1423_v11 = vsel %vm1418_vm8, %v1406_v45, %v3328_v16 }
  0xed   : > { %v3372_v35 = vpop.permute.xlu1 %3371  ;;  %v1424_v33 = vsel %vm1418_vm8, %v1407_v3, %v3329_v44  ;;  %v3338_v54 = vunpack.i.l.bf16 %v4795_v10  ;;  %v1376_v34 = vsel %vm1367_vm5, %v4757_v51, %v3218_v60  ;;  %v1570_v20 = vrot.slane %v3820_v39, 7  ;;  %v5693_v39 = vld [vmem:[#allocation30_spill] sm:$0xff] }
  0xee   : > { %v3374_v4 = vunpack.i.h.bf16 %v3372_v35  ;;  %v3373_v22 = vunpack.i.l.bf16 %v3372_v35  ;;  %v3367_v31 = vpop.permute.xlu0 %3366  ;;  %v1393_v57 = vsel %vm1384_vm6, %v1376_v34, %v3258_v0  ;;  %v1571_v13 = vrot.slane %v3823_v50, 7 }
  0xef   : > { %v3369_v24 = vunpack.i.h.bf16 %v3367_v31  ;;  %v3368_v23 = vunpack.i.l.bf16 %v3367_v31  ;;  %3661 = vrot.lane.b32.xlu1 %v4234_v17, %s3872_s12  ;;  %v5681_v48 = vrot.slane %v4721_v26, 7  ;;  %v1410_v51 = vsel %vm1401_vm7, %v1393_v57, %v3298_v40 }
  0xf0   : > { %v4883_v5 = vsel %vm1435_vm9, %v1425_v28, %v3373_v22  ;;  %v4886_v38 = vsel %vm1435_vm9, %v1426_v53, %v3374_v4  ;;  %3656 = vrot.lane.b32.xlu0 %v4162_v58, %s3871_s25  ;;  %v4914_v16 = vpack.i.bf16 %v4729_v9, %v4726_v29  ;;  %v3159_v46 = vunpack.i.h.bf16 %v4444_v49 }
  0xf1   : > { %v4893_v18 = vsel %vm1435_vm9, %v1423_v11, %v3368_v23  ;;  %v4896_v17 = vsel %vm1435_vm9, %v1424_v33, %v3369_v24  ;;  %v4898_v36 = vpop.permute.xlu1 %3381  ;;  %v4906_v58 = vsel %vm765_vm0, %v5681_v48, 0.0  ;;  %v1427_v12 = vsel %vm1418_vm8, %v1410_v51, %v3338_v54  ;;  %v5686_v24 = vld [vmem:[#allocation8_spill] sm:$0xff] }
  0xf2   : > { %v4901_v41 = vpop.permute.xlu0 %3376  ;;  %v5682_v0 = vmov %v5681_v48  ;;  %v5683_v44 = vrot.slane %v4707_v55, 7  ;;  %v959_v26 = vrot.slane %v4906_v58, 1  ;;  %v3158_v40 = vunpack.i.l.bf16 %v4444_v49 }
  0xf3   : > { %v3378_v60 = vunpack.i.l.bf16 %v4901_v41  ;;  %3671 = vrot.lane.b32.xlu1 %v4675_v59, %s3872_s12  ;;  %v4944_v55 = vsel %vm765_vm0, %v1570_v20, %v1571_v13  ;;  %v4947_v4 = vsel %vm765_vm0, 0.0, %v1570_v20  ;;  %v4950_v22 = vsel %vm765_vm0, %v1571_v13, 0.0  ;;  %v5688_v13 = vld [vmem:[#allocation22_spill] sm:$0xff] }
  0xf4   : > { %3666 = vrot.lane.b32.xlu0 %v4695_v47, %s3871_s25  ;;  %v4925_v7 = vsel %vm765_vm0, %v5683_v44, %v5682_v0  ;;  %v5684_v43 = vmov %v5683_v44  ;;  %v1731_v49 = vrot.slane %v4947_v4, 1  ;;  %v1732_v53 = vrot.slane %v4944_v55, 1  ;;  %v5690_v44 = vld [vmem:[#allocation25_spill] sm:$0xff] }
  0xf5   : > { %v4930_v45 = vsel %vm765_vm0, 0.0, %v5684_v43  ;;  %v4933_v29 = vsel %vm1435_vm9, %v1427_v12, %v3378_v60  ;;  %v4935_v9 = vpop.permute.xlu1 %3391  ;;  %v957_v35 = vrot.slane %v4925_v7, 1  ;;  %v1354_v11 = vsel %vm1350_vm4, %v4008_v19, %v3159_v46  ;;  %v5687_v19 = vld [vmem:[#allocation2_spill] sm:$0xff]  ;;  %v5689_v60 = vld [vmem:[#allocation23_spill] sm:$0xff] }
  0xf6   : > { %v956_v3 = vrot.slane %v4930_v45, 1  ;;  %v4941_v28 = vpop.permute.xlu0 %3386  ;;  %v1736_v50 = vrot.slane %v4947_v4, 2  ;;  %v5636_v33 = vrot.slane %v4944_v55, 2  ;;  %v1734_v57 = vrot.slane %v4950_v22, 1 }
  0xf7   : > { %3681 = vrot.lane.b32.xlu1 %v4673_v42, %s5685_s22  ;;  %v4972_v34 = vsel %vm860_vm1, %v957_v35, %v959_v26  ;;  %v1353_v20 = vsel %vm1350_vm4, %v5687_v19, %v3158_v40  ;;  %v3194_v48 = vunpack.i.h.bf16 %v5688_v13  ;;  %v3193_v51 = vunpack.i.l.bf16 %v5688_v13  ;;  %v5691_v19 = vld [vmem:[#allocation29_spill] sm:$0xff] }
  0xf8   : > { %3676 = vrot.lane.b32.xlu0 %v5686_v24, %s3872_s12  ;;  %v4969_v54 = vsel %vm860_vm1, %v956_v3, %v957_v35  ;;  %v3208_v46 = vunpack.i.l.bf16 %v5689_v60  ;;  %v3209_v0 = vunpack.i.h.bf16 %v5689_v60  ;;  %v3213_v43 = vunpack.i.l.bf16 %v5690_v44  ;;  %v5692_v3 = vld [vmem:[#allocation6_spill] sm:$0xff] }
  0xf9   : > { %v4965_v42 = vpop.permute.xlu1 %3401  ;;  %v4989_v35 = vsel %vm860_vm1, %v1731_v49, %v1732_v53  ;;  %v3214_v26 = vunpack.i.h.bf16 %v5690_v44  ;;  %v3244_v13 = vunpack.i.h.bf16 %v5691_v19  ;;  %v3243_v60 = vunpack.i.l.bf16 %v5691_v19 }
  0xfa   : > { %v4980_v12 = vpop.permute.xlu0 %3396  ;;  %v5002_v23 = vsel %vm860_vm1, %v1732_v53, %v1734_v57  ;;  %v5007_v49 = vsel %vm901_vm2, %v1736_v50, %v5636_v33  ;;  %v1370_v44 = vsel %vm1367_vm5, %v1353_v20, %v3193_v51  ;;  %v1371_v40 = vsel %vm1367_vm5, %v1354_v11, %v3194_v48  ;;  %v5695_v50 = vld [vmem:[#allocation34_spill] sm:$0xff]  ;;  %v5696_v48 = vld [vmem:[#allocation35_spill] sm:$0xff] }
  0xfb   : > { %3691 = vrot.lane.b32.xlu1 %v4695_v47, %s5685_s22  ;;  %v1351_v24 = vsel %vm1350_vm4, %v5692_v3, %v3208_v46  ;;  %v3238_v30 = vunpack.i.l.bf16 %v5693_v39  ;;  %v1352_v53 = vsel %vm1350_vm4, %v5694_v2, %v3209_v0  ;;  %v3239_v61 = vunpack.i.h.bf16 %v5693_v39 }
  0xfc   : > { %3686 = vrot.lane.b32.xlu0 %v4702_v1, %s3872_s12  ;;  %v1368_v57 = vsel %vm1367_vm5, %v1351_v24, %v3213_v43  ;;  %v3283_v33 = vunpack.i.l.bf16 %v5695_v50  ;;  %v1369_v11 = vsel %vm1367_vm5, %v1352_v53, %v3214_v26  ;;  %v3284_v20 = vunpack.i.h.bf16 %v5695_v50 }
  0xfd   : > { %v4999_v31 = vpop.permute.xlu1 %3411  ;;  %v3279_v51 = vunpack.i.h.bf16 %v5696_v48  ;;  %v3278_v46 = vunpack.i.l.bf16 %v5696_v48  ;;  %v1387_v2 = vsel %vm1384_vm6, %v1370_v44, %v3243_v60  ;;  %v1388_v39 = vsel %vm1384_vm6, %v1371_v40, %v3244_v13 }
  0xfe   : > { %v5014_v19 = vpop.permute.xlu0 %3406  ;;  %v3324_v0 = vunpack.i.h.bf16 %v4718_v27  ;;  %v3323_v43 = vunpack.i.l.bf16 %v4718_v27  ;;  %v1385_v26 = vsel %vm1384_vm6, %v1368_v57, %v3238_v30  ;;  %v3319_v24 = vunpack.i.h.bf16 %v4723_v6 }
  0xff   : > { %3701 = vrot.lane.b32.xlu1 %v4702_v1, %s3866_s23  ;;  %v3318_v53 = vunpack.i.l.bf16 %v4723_v6  ;;  %v3363_v50 = vunpack.i.l.bf16 %v4837_v14  ;;  %v1404_v40 = vsel %vm1401_vm7, %v1387_v2, %v3283_v33  ;;  %v3364_v13 = vunpack.i.h.bf16 %v4837_v14 }
 0x100   : > { %3696 = vrot.lane.b32.xlu0 %v4675_v59, %s3866_s23  ;;  %v1386_v59 = vsel %vm1384_vm6, %v1369_v11, %v3239_v61  ;;  %v3358_v27 = vunpack.i.l.bf16 %v4851_v56  ;;  %v1405_v30 = vsel %vm1401_vm7, %v1388_v39, %v3284_v20  ;;  %v1402_v60 = vsel %vm1401_vm7, %v1385_v26, %v3278_v46 }
 0x101   : > { %v5033_v3 = vpop.permute.xlu1 %3421  ;;  %v1403_v6 = vsel %vm1401_vm7, %v1386_v59, %v3279_v51  ;;  %v3359_v44 = vunpack.i.h.bf16 %v4851_v56  ;;  %v1421_v61 = vsel %vm1418_vm8, %v1404_v40, %v3323_v43  ;;  %v1422_v14 = vsel %vm1418_vm8, %v1405_v30, %v3324_v0  ;;  %v5698_v59 = vld [vmem:[#allocation13_spill] sm:$0xff] }
 0x102   : > { %v5039_v48 = vpop.permute.xlu0 %3416  ;;  %v3384_v33 = vunpack.i.h.bf16 %v4898_v36  ;;  %v3383_v57 = vunpack.i.l.bf16 %v4898_v36  ;;  %v1419_v20 = vsel %vm1418_vm8, %v1402_v60, %v3318_v53  ;;  %v1420_v46 = vsel %vm1418_vm8, %v1403_v6, %v3319_v24 }
 0x103   : > { %3711 = vrot.lane.b32.xlu1 %v4704_v62, %s5676_s21  ;;  %v5062_v51 = vsel %vm1435_vm9, %v1421_v61, %v3363_v50  ;;  %v3393_v56 = vunpack.i.l.bf16 %v4935_v9  ;;  %v5068_v2 = vsel %vm1435_vm9, %v1422_v14, %v3364_v13  ;;  %v5071_v39 = vsel %vm1435_vm9, %v1419_v20, %v3358_v27  ;;  %v5697_v50 = vld [vmem:[#allocation11_spill] sm:$0xff]  ;;  %v5699_v61 = vld [vmem:[#allocation14_spill] sm:$0xff] }
 0x104   : > { %3706 = vrot.lane.b32.xlu0 %v4685_v21, %s5676_s21  ;;  %v3394_v36 = vunpack.i.h.bf16 %v4935_v9  ;;  %v3389_v0 = vunpack.i.h.bf16 %v4941_v28  ;;  %v5078_v43 = vsel %vm1435_vm9, %v1420_v46, %v3359_v44  ;;  %v3379_v26 = vunpack.i.h.bf16 %v4901_v41  ;;  %v5701_v20 = vld [vmem:[#allocation15_spill] sm:$0xff] }
 0x105   : > { %v5057_v11 = vpop.permute.xlu1 %3431  ;;  %v3388_v24 = vunpack.i.l.bf16 %v4941_v28  ;;  %v3403_v53 = vunpack.i.l.bf16 %v4965_v42  ;;  %v2126_v9 = vsel %vm1350_vm4, %v5697_v50, %v3384_v33  ;;  %v2125_v40 = vsel %vm1350_vm4, %v5698_v59, %v3383_v57  ;;  %v5700_v57 = vld [vmem:[#allocation12_spill] sm:$0xff] }
 0x106   : > { %v5065_v21 = vpop.permute.xlu0 %3426  ;;  %v3404_v13 = vunpack.i.h.bf16 %v4965_v42  ;;  %v3398_v27 = vunpack.i.l.bf16 %v4980_v12  ;;  %v2141_v41 = vsel %vm1367_vm5, %v2125_v40, %v3393_v56  ;;  %v3399_v28 = vunpack.i.h.bf16 %v4980_v12 }
 0x107   : > { %3721 = vrot.lane.b32.xlu1 %v4712_v15, %s5662_s27  ;;  %v3414_v60 = vunpack.i.h.bf16 %v4999_v31  ;;  %v2142_v44 = vsel %vm1367_vm5, %v2126_v9, %v3394_v36  ;;  %v2128_v42 = vsel %vm1350_vm4, %v5699_v61, %v3389_v0  ;;  %v3408_v14 = vunpack.i.l.bf16 %v5014_v19 }
 0x108   : > { %3716 = vrot.lane.b32.xlu0 %v4695_v47, %s5662_s27  ;;  %v3413_v47 = vunpack.i.l.bf16 %v4999_v31  ;;  %v3423_v33 = vunpack.i.l.bf16 %v5033_v3  ;;  %v2127_v12 = vsel %vm1350_vm4, %v5701_v20, %v3388_v24  ;;  %v2157_v46 = vsel %vm1384_vm6, %v2141_v41, %v3403_v53 }
 0x109   : > { %v5091_v30 = vpop.permute.xlu1 %3441  ;;  %v3409_v31 = vunpack.i.h.bf16 %v5014_v19  ;;  %v3424_v56 = vunpack.i.h.bf16 %v5033_v3  ;;  %v2158_v36 = vsel %vm1384_vm6, %v2142_v44, %v3404_v13  ;;  %v2143_v0 = vsel %vm1367_vm5, %v2127_v12, %v3398_v27 }
 0x10a   : > { %v3437_v6 = vpop.permute.xlu0 %3436  ;;  %v3419_v50 = vunpack.i.h.bf16 %v5039_v48  ;;  %v3418_v9 = vunpack.i.l.bf16 %v5039_v48  ;;  %v2144_v24 = vsel %vm1367_vm5, %v2128_v42, %v3399_v28  ;;  %v2173_v53 = vsel %vm1401_vm7, %v2157_v46, %v3413_v47 }
 0x10b   : > { %3731 = vrot.lane.b32.xlu1 %v5700_v57, %s3870_s11  ;;  %v2174_v19 = vsel %vm1401_vm7, %v2158_v36, %v3414_v60  ;;  %v3433_v3 = vunpack.i.l.bf16 %v5057_v11  ;;  %v2189_v13 = vsel %vm1418_vm8, %v2173_v53, %v3423_v33  ;;  %v3429_v27 = vunpack.i.h.bf16 %v5065_v21  ;;  %v5702_v36 = vld [vmem:[#allocation9_spill] sm:$0xff] }
 0x10c   : > { %3726 = vrot.lane.b32.xlu0 %v4702_v1, %s5664_s24  ;;  %v2159_v1 = vsel %vm1384_vm6, %v2143_v0, %v3408_v14  ;;  %v3428_v41 = vunpack.i.l.bf16 %v5065_v21  ;;  %v2160_v48 = vsel %vm1384_vm6, %v2144_v24, %v3409_v31  ;;  %v2190_v28 = vsel %vm1418_vm8, %v2174_v19, %v3424_v56 }
 0x10d   : > { %v3452_v59 = vpop.permute.xlu1 %3451  ;;  %v3439_v47 = vunpack.i.h.bf16 %v3437_v6  ;;  %v3438_v60 = vunpack.i.l.bf16 %v3437_v6  ;;  %v2175_v44 = vsel %vm1401_vm7, %v2159_v1, %v3418_v9  ;;  %v2176_v61 = vsel %vm1401_vm7, %v2160_v48, %v3419_v50 }
 0x10e   : > { %v3447_v40 = vpop.permute.xlu0 %3446  ;;  %v3454_v42 = vunpack.i.h.bf16 %v3452_v59  ;;  %v3453_v14 = vunpack.i.l.bf16 %v3452_v59  ;;  %v3434_v21 = vunpack.i.h.bf16 %v5057_v11  ;;  %v2205_v12 = vsel %vm1435_vm9, %v2189_v13, %v3379_v26 }
 0x10f   : > { %3741 = vrot.lane.b32.xlu1 %v4704_v62, %s3870_s11  ;;  %v2206_v62 = vsel %vm1435_vm9, %v2190_v28, %v3433_v3  ;;  %v3448_v57 = vunpack.i.l.bf16 %v3447_v40  ;;  %v2191_v6 = vsel %vm1418_vm8, %v2175_v44, %v3428_v41  ;;  %v2192_v46 = vsel %vm1418_vm8, %v2176_v61, %v3429_v27 }
 0x110   : > { %3736 = vrot.lane.b32.xlu0 %v4914_v16, %s5664_s24  ;;  %v3443_v0 = vunpack.i.l.bf16 %v5091_v30  ;;  %v3449_v50 = vunpack.i.h.bf16 %v3447_v40  ;;  %v5703_v11 = vpack.i.bf16 %v4925_v7, %v4930_v45  ;;  %v1453_v26 = vsel %vm1452_vm10, %v5071_v39, %v3438_v60 }
 0x111   : > { %v3462_v33 = vpop.permute.xlu1 %3461  ;;  %v1454_v9 = vsel %vm1452_vm10, %v5078_v43, %v3439_v47  ;;  %v1455_v59 = vsel %vm1452_vm10, %v5062_v51, %v3453_v14  ;;  %v1456_v24 = vsel %vm1452_vm10, %v5068_v2, %v3454_v42  ;;  %v2221_v39 = vsel %vm1452_vm10, %v2205_v12, %v3448_v57 }
 0x112   : > { %v3457_v20 = vpop.permute.xlu0 %3456  ;;  %v3464_v41 = vunpack.i.h.bf16 %v3462_v33  ;;  %v3463_v48 = vunpack.i.l.bf16 %v3462_v33  ;;  %v5704_v47 = vpack.i.bf16 %v4944_v55, %v4947_v4  ;;  %v2222_v60 = vsel %vm1452_vm10, %v2206_v62, %v3449_v50 }
 0x113   : > { %v3459_v31 = vunpack.i.h.bf16 %v3457_v20  ;;  %v3458_v56 = vunpack.i.l.bf16 %v3457_v20  ;;  %3751 = vrot.lane.b32.xlu1 %v5702_v36, %s3871_s25  ;;  %v964_v44 = vrot.slane %v4906_v58, 2  ;;  %v2207_v61 = vsel %vm1435_vm9, %v2191_v6, %v3434_v21  ;;  %v5705_v58 = vld [vmem:[#allocation10_spill] sm:$0xff] }
 0x114   : > { %3746 = vrot.lane.b32.xlu0 %v5703_v11, %s3870_s11  ;;  %v2208_v57 = vsel %vm1435_vm9, %v2192_v46, %v3443_v0  ;;  %v5706_v21 = vrot.slane %v4950_v22, 2  ;;  %v5707_v6 = vrot.slane %v4944_v55, 2  ;;  %v5708_v50 = vpack.i.bf16 %v4972_v34, %v4969_v54 }
 0x115   : > { %v3472_v53 = vpop.permute.xlu1 %3471  ;;  %v1470_v19 = vsel %vm1469_vm11, %v1453_v26, %v3458_v56  ;;  %v1471_v3 = vsel %vm1469_vm11, %v1454_v9, %v3459_v31  ;;  %v2223_v56 = vsel %vm1452_vm10, %v2207_v61, %v3463_v48  ;;  %v2224_v62 = vsel %vm1452_vm10, %v2208_v57, %v3464_v41 }
 0x116   : > { %v3474_v40 = vunpack.i.h.bf16 %v3472_v53  ;;  %v3473_v1 = vunpack.i.l.bf16 %v3472_v53  ;;  %v3467_v13 = vpop.permute.xlu0 %3466  ;;  %v1486_v27 = vpack.c.bf16 %v1471_v3, %v1470_v19  ;;  %v1740_v36 = vsel %vm901_vm2, %v5707_v6, %v5706_v21 }
 0x117   : > { %v3469_v43 = vunpack.i.h.bf16 %v3467_v13  ;;  %v3468_v28 = vunpack.i.l.bf16 %v3467_v13  ;;  %3761 = vrot.lane.b32.xlu1 %v4712_v15, %s3871_s25  ;;  %v3775_v11 = vpack.i.bf16 %v5002_v23, %v4989_v35  ;;  %v5709_v55 = vrot.slane %v4925_v7, 2 }
 0x118   : > { %v1472_v51 = vsel %vm1469_vm11, %v1455_v59, %v3473_v1  ;;  %v1473_v2 = vsel %vm1469_vm11, %v1456_v24, %v3474_v40  ;;  %3756 = vrot.lane.b32.xlu0 %v5704_v47, %s3870_s11  ;;  %3073 = vmatprep.mubr.msk.bf16.mxu0 %vm2281_vm12, %v1486_v27  ;;  %v5710_v9 = vrot.slane %v4930_v45, 2  ;;  %v3790_v23 = vpack.i.bf16 %v1740_v36, %v5007_v49  ;;  %v5713_v47 = vld [vmem:[#allocation16_spill] sm:$0xff] }
 0x119   : > { %v1487_v42 = vpack.c.bf16 %v1473_v2, %v1472_v51  ;;  %v3482_v14 = vpop.permute.xlu1 %3481  ;;  %v2237_v15 = vsel %vm1469_vm11, %v2221_v39, %v3468_v28  ;;  %v2238_v33 = vsel %vm1469_vm11, %v2222_v60, %v3469_v43  ;;  %v5711_v24 = vmov %v5709_v55  ;;  %v5712_v51 = vld [vmem:[#allocation17_spill] sm:$0xff] }
 0x11a   : > { %v3484_v20 = vunpack.i.h.bf16 %v3482_v14  ;;  %v3483_v12 = vunpack.i.l.bf16 %v3482_v14  ;;  %v3477_v4 = vpop.permute.xlu0 %3476  ;;  %v2253_v31 = vpack.c.bf16 %v2238_v33, %v2237_v15  ;;  %v963_v59 = vsel %vm901_vm2, %v5710_v9, %v5709_v55 }
 0x11b   : > { %3771 = vrot.lane.b32.xlu1 %v5705_v58, %s3872_s12  ;;  %3074 = vmatmul.mubr.msk.bf16.vlgmr.msra.gmra.mrb[0].mxu0 %vm2281_vm12, %v1487_v42  ;;  %v965_v53 = vsel %vm901_vm2, %v5711_v24, %v964_v44  ;;  %v3479_v1 = vunpack.i.h.bf16 %v3477_v4  ;;  %v3478_v13 = vunpack.i.l.bf16 %v3477_v4  ;;  %v3444_v28 = vunpack.i.h.bf16 %v5091_v30 }
 0x11c   : > { %v2239_v46 = vsel %vm1469_vm11, %v2223_v56, %v3483_v12  ;;  %v2240_v0 = vsel %vm1469_vm11, %v2224_v62, %v3484_v20  ;;  %3766 = vrot.lane.b32.xlu0 %v5708_v50, %s3871_s25  ;;  %3051 = vmatprep.mubr.msk.bf16.mxu1 %vm2281_vm12, %v2253_v31  ;;  %v3785_v54 = vpack.i.bf16 %v965_v53, %v963_v59  ;;  %v5714_v12 = vld [vmem:[#allocation19_spill] sm:$0xff]  ;;  %v5715_v56 = vld [vmem:[#allocation18_spill] sm:$0xff] }
 0x11d   : > { %v2254_v26 = vpack.c.bf16 %v2240_v0, %v2239_v46  ;;  %v3492_v22 = vpop.permute.xlu1 %3491  ;;  %v2130_v2 = vsel %vm1350_vm4, %v5712_v51, %v3479_v1  ;;  %v2129_v60 = vsel %vm1350_vm4, %v5713_v47, %v3478_v13 }
 0x11e   : > { %v3487_v19 = vpop.permute.xlu0 %3486  ;;  %v3493_v27 = vunpack.i.l.bf16 %v3492_v22  ;;  %v3494_v49 = vunpack.i.h.bf16 %v3492_v22 }
 0x11f   : > { %3781 = vrot.lane.b32.xlu1 %v4914_v16, %s3872_s12  ;;  %3052 = vmatmul.mubr.msk.bf16.vlgmr.msra.gmra.mrb[0].mxu1 %vm2281_vm12, %v2254_v26  ;;  %v3489_v41 = vunpack.i.h.bf16 %v3487_v19  ;;  %v3488_v48 = vunpack.i.l.bf16 %v3487_v19 }
 0x120   : > { %3776 = vrot.lane.b32.xlu0 %v3775_v11, %s3871_s25  ;;  %v2145_v42 = vsel %vm1367_vm5, %v2129_v60, %v3493_v27  ;;  %v2146_v20 = vsel %vm1367_vm5, %v2130_v2, %v3494_v49 }
 0x121   : > { %v3502_v34 = vpop.permute.xlu1 %3501  ;;  %v2132_v30 = vsel %vm1350_vm4, %v5714_v12, %v3489_v41  ;;  %v2131_v62 = vsel %vm1350_vm4, %v5715_v56, %v3488_v48 }
 0x122   : > { %v3497_v35 = vpop.permute.xlu0 %3496  ;;  %v3503_v43 = vunpack.i.l.bf16 %v3502_v34  ;;  %v3504_v44 = vunpack.i.h.bf16 %v3502_v34 }
 0x123   : > { %3791 = vrot.lane.b32.xlu1 %v3790_v23, %s3872_s12  ;;  %v3499_v14 = vunpack.i.h.bf16 %v3497_v35  ;;  %v3498_v15 = vunpack.i.l.bf16 %v3497_v35 }
 0x124   : > { %3786 = vrot.lane.b32.xlu0 %v3785_v54, %s3872_s12  ;;  %v2161_v58 = vsel %vm1384_vm6, %v2145_v42, %v3503_v43  ;;  %v2162_v36 = vsel %vm1384_vm6, %v2146_v20, %v3504_v44  ;;  %s5476_s12 = scalar_lea.vmem %s5589_s9, %s3975_s26  ;;  %s2992_s26 = sshll.u32 %s5745_s14, 1 }
 0x125   : > { %v3512_v7 = vpop.permute.xlu1 %3511  ;;  %v2147_v26 = vsel %vm1367_vm5, %v2131_v62, %v3498_v15  ;;  %v2148_v22 = vsel %vm1367_vm5, %v2132_v30, %v3499_v14  ;;  %s709_s27 = sadd.s32 %s2992_s26, %s5753_s13 }
 0x126   : > { %v3507_v45 = vpop.permute.xlu0 %3506  ;;  %v3513_v33 = vunpack.i.l.bf16 %v3512_v7  ;;  %v3514_v4 = vunpack.i.h.bf16 %v3512_v7  ;;  %s2993_s24 = sshll.u32 %s709_s27, 1 }
 0x127   : > { %v3509_v21 = vunpack.i.h.bf16 %v3507_v45  ;;  %v3508_v6 = vunpack.i.l.bf16 %v3507_v45  ;;  %s711_s20 = scalar_lea.vmem %s5590_s10, %s2993_s24 }
 0x128   : > { %v2177_v55 = vsel %vm1401_vm7, %v2161_v58, %v3513_v33  ;;  %v2178_v24 = vsel %vm1401_vm7, %v2162_v36, %v3514_v4 }
 0x129   : > { %v3522_v3 = vpop.permute.xlu1 %3521  ;;  %v2163_v54 = vsel %vm1384_vm6, %v2147_v26, %v3508_v6  ;;  %v2164_v34 = vsel %vm1384_vm6, %v2148_v22, %v3509_v21 }
 0x12a   : > { %v3517_v40 = vpop.permute.xlu0 %3516  ;;  %v3523_v31 = vunpack.i.l.bf16 %v3522_v3  ;;  %v3524_v46 = vunpack.i.h.bf16 %v3522_v3 }
 0x12b   : > { %v3519_v0 = vunpack.i.h.bf16 %v3517_v40  ;;  %v3518_v50 = vunpack.i.l.bf16 %v3517_v40 }
 0x12c   : > { %v2193_v53 = vsel %vm1418_vm8, %v2177_v55, %v3523_v31  ;;  %v2194_v45 = vsel %vm1418_vm8, %v2178_v24, %v3524_v46 }
 0x12d   : > { %v5203_v16 = vpop.permute.xlu1 %3531  ;;  %v2179_v3 = vsel %vm1401_vm7, %v2163_v54, %v3518_v50  ;;  %v2180_v40 = vsel %vm1401_vm7, %v2164_v34, %v3519_v0 }
 0x12e   : > { %v3527_v39 = vpop.permute.xlu0 %3526  ;;  %v3533_v9 = vunpack.i.l.bf16 %v5203_v16  ;;  %v3534_v27 = vunpack.i.h.bf16 %v5203_v16 }
 0x12f   : > { %v3529_v19 = vunpack.i.h.bf16 %v3527_v39  ;;  %v3528_v23 = vunpack.i.l.bf16 %v3527_v39  ;;  %v2209_v39 = vsel %vm1435_vm9, %v2193_v53, %v3444_v28 }
 0x130   : > { %v2210_v49 = vsel %vm1435_vm9, %v2194_v45, %v3533_v9 }
 0x131   : > { %v5210_v61 = vpop.permute.xlu1 %3541  ;;  %v2195_v43 = vsel %vm1418_vm8, %v2179_v3, %v3528_v23  ;;  %v2196_v51 = vsel %vm1418_vm8, %v2180_v40, %v3529_v19  ;;  %v3174_v40 = vunpack.i.h.bf16 %v4464_v25 }
 0x132   : > { %v3537_v57 = vpop.permute.xlu0 %3536  ;;  %v3543_v14 = vunpack.i.l.bf16 %v5210_v61 }
 0x133   : > { %v3539_v35 = vunpack.i.h.bf16 %v3537_v57  ;;  %v3538_v7 = vunpack.i.l.bf16 %v3537_v57 }
 0x135   : > { %v3552_v11 = vpop.permute.xlu1 %3551  ;;  %v1457_v60 = vsel %vm1452_vm10, %v4893_v18, %v3538_v7  ;;  %v1458_v44 = vsel %vm1452_vm10, %v4896_v17, %v3539_v35 }
 0x136   : > { %v3547_v59 = vpop.permute.xlu0 %3546  ;;  %v3553_v1 = vunpack.i.l.bf16 %v3552_v11  ;;  %v3554_v41 = vunpack.i.h.bf16 %v3552_v11  ;;  %v2212_v11 = vsel %vm1435_vm9, %v2196_v51, %v3543_v14  ;;  %v3219_v51 = vunpack.i.h.bf16 %v4520_v32  ;;  %v5721_v14 = vld [vmem:[#allocation5_spill] sm:$0xff] }
 0x137   : > { %v3549_v42 = vunpack.i.h.bf16 %v3547_v59  ;;  %v3548_v16 = vunpack.i.l.bf16 %v3547_v59 }
 0x138   : > { %v1459_v28 = vsel %vm1452_vm10, %v4883_v5, %v3553_v1  ;;  %v1460_v20 = vsel %vm1452_vm10, %v4886_v38, %v3554_v41  ;;  %v2211_v38 = vsel %vm1435_vm9, %v2195_v43, %v3534_v27  ;;  %v5716_v1 = vld [vmem:[#allocation21_spill] sm:$0xff]  ;;  %v5717_v41 = vld [vmem:[#allocation26_spill] sm:$0xff] }
 0x139   : > { %v3562_v13 = vpop.permute.xlu1 %3561  ;;  %v2225_v58 = vsel %vm1452_vm10, %v2209_v39, %v3548_v16  ;;  %v2226_v5 = vsel %vm1452_vm10, %v2210_v49, %v3549_v42  ;;  %v3178_v27 = vunpack.i.l.bf16 %v5716_v1  ;;  %v3224_v39 = vunpack.i.h.bf16 %v5717_v41  ;;  %v5720_v42 = vld [vmem:[#allocation4_spill] sm:$0xff] }
 0x13a   : > { %v3557_v48 = vpop.permute.xlu0 %3556  ;;  %v3564_v17 = vunpack.i.h.bf16 %v3562_v13  ;;  %v3563_v31 = vunpack.i.l.bf16 %v3562_v13  ;;  %v3179_v13 = vunpack.i.h.bf16 %v5716_v1 }
 0x13b   : > { %v3559_v2 = vunpack.i.h.bf16 %v3557_v48  ;;  %v3558_v47 = vunpack.i.l.bf16 %v3557_v48  ;;  %v3223_v48 = vunpack.i.l.bf16 %v5717_v41 }
 0x13c   : > { %v2227_v59 = vsel %vm1452_vm10, %v2211_v38, %v3563_v31  ;;  %v2228_v24 = vsel %vm1452_vm10, %v2212_v11, %v3564_v17  ;;  %v1362_v16 = vsel %vm1350_vm4, %v5720_v42, %v3179_v13  ;;  %v5722_v17 = vld [vmem:[#allocation38_spill] sm:$0xff] }
 0x13d   : > { %v1474_v15 = vsel %vm1469_vm11, %v1457_v60, %v3558_v47  ;;  %v1475_v33 = vsel %vm1469_vm11, %v1458_v44, %v3559_v2  ;;  %v3572_v57 = vpop.permute.xlu1 %3571  ;;  %v5718_v2 = vld [vmem:[#allocation31_spill] sm:$0xff]  ;;  %v3344_v31 = vunpack.i.h.bf16 %v5722_v17 }
 0x13e   : > { %v1488_v12 = vpack.c.bf16 %v1475_v33, %v1474_v15  ;;  %v3574_v18 = vunpack.i.h.bf16 %v3572_v57  ;;  %v3573_v30 = vunpack.i.l.bf16 %v3572_v57  ;;  %v3567_v4 = vpop.permute.xlu0 %3566  ;;  %v3264_v47 = vunpack.i.h.bf16 %v5718_v2  ;;  %v5719_v44 = vld [vmem:[#allocation3_spill] sm:$0xff] }
 0x13f   : > { %v3569_v56 = vunpack.i.h.bf16 %v3567_v4  ;;  %v3568_v62 = vunpack.i.l.bf16 %v3567_v4  ;;  %v3263_v60 = vunpack.i.l.bf16 %v5718_v2  ;;  %v1360_v25 = vsel %vm1350_vm4, %v5719_v44, %v3174_v40 }
 0x140   : > { %v1476_v21 = vsel %vm1469_vm11, %v1459_v28, %v3573_v30  ;;  %v1477_v6 = vsel %vm1469_vm11, %v1460_v20, %v3574_v18  ;;  %3077 = vmatprep.mubr.msk.bf16.mxu0 %vm2281_vm12, %v1488_v12  ;;  %v1361_v28 = vsel %vm1350_vm4, %v5721_v14, %v3178_v27  ;;  %v3259_v15 = vunpack.i.h.bf16 %v4575_v8  ;;  %v5725_v27 = vld [vmem:[#allocation28_spill] sm:$0xff] }
 0x141   : > { %v1489_v36 = vpack.c.bf16 %v1477_v6, %v1476_v21  ;;  %v2241_v46 = vsel %vm1469_vm11, %v2225_v58, %v3568_v62  ;;  %v2242_v0 = vsel %vm1469_vm11, %v2226_v5, %v3569_v56  ;;  %v3582_v50 = vpop.permute.xlu1 %3581  ;;  %v1379_v57 = vsel %vm1367_vm5, %v1362_v16, %v3224_v39 }
 0x142   : > { %v2255_v26 = vpack.c.bf16 %v2242_v0, %v2241_v46  ;;  %v3584_v22 = vunpack.i.h.bf16 %v3582_v50  ;;  %v3583_v55 = vunpack.i.l.bf16 %v3582_v50  ;;  %v5256_v9 = vpop.permute.xlu0 %3576  ;;  %v1378_v32 = vsel %vm1367_vm5, %v1361_v28, %v3223_v48 }
 0x143   : > { %3078 = vmatmul.mubr.msk.bf16.gmra.mrb[4].mxu0 %vm2281_vm12, %v1489_v36  ;;  %v3304_v20 = vunpack.i.h.bf16 %v4659_v52  ;;  %v3303_v12 = vunpack.i.l.bf16 %v4659_v52  ;;  %v1377_v30 = vsel %vm1367_vm5, %v1360_v25, %v3219_v51  ;;  %v3299_v4 = vunpack.i.h.bf16 %v4663_v63  ;;  %v5726_v51 = vld [vmem:[#allocation27_spill] sm:$0xff] }
 0x144   : > { %v2243_v53 = vsel %vm1469_vm11, %v2227_v59, %v3583_v55  ;;  %v2244_v19 = vsel %vm1469_vm11, %v2228_v24, %v3584_v22  ;;  %3055 = vmatprep.mubr.msk.bf16.mxu1 %vm2281_vm12, %v2255_v26  ;;  %v3343_v8 = vunpack.i.l.bf16 %v5722_v17  ;;  %v1395_v56 = vsel %vm1384_vm6, %v1378_v32, %v3263_v60 }
 0x145   : > { %v2256_v23 = vpack.c.bf16 %v2244_v19, %v2243_v53  ;;  %v3592_v54 = vpop.permute.xlu1 %3591  ;;  %v1396_v62 = vsel %vm1384_vm6, %v1379_v57, %v3264_v47  ;;  %v3339_v58 = vunpack.i.h.bf16 %v4795_v10  ;;  %v3578_v5 = vunpack.i.l.bf16 %v5256_v9 }
 0x146   : > { %v5264_v34 = vpop.permute.xlu0 %3586  ;;  %v1394_v52 = vsel %vm1384_vm6, %v1377_v30, %v3259_v15  ;;  %v3544_v21 = vunpack.i.h.bf16 %v5210_v61  ;;  %v3579_v6 = vunpack.i.h.bf16 %v5256_v9  ;;  %v3593_v38 = vunpack.i.l.bf16 %v3592_v54  ;;  %v5723_v9 = vld [vmem:[#allocation20_spill] sm:$0xff] }
 0x147   : > { %3056 = vmatmul.mubr.msk.bf16.gmra.mrb[4].mxu1 %vm2281_vm12, %v2256_v23  ;;  %v1412_v36 = vsel %vm1401_vm7, %v1395_v56, %v3303_v12  ;;  %v1413_v46 = vsel %vm1401_vm7, %v1396_v62, %v3304_v20  ;;  %v3594_v0 = vunpack.i.h.bf16 %v3592_v54  ;;  %v3589_v50 = vunpack.i.h.bf16 %v5264_v34  ;;  %v5724_v23 = vld [vmem:[#allocation24_spill] sm:$0xff] }
 0x148   : > { %v1411_v10 = vsel %vm1401_vm7, %v1394_v52, %v3299_v4  ;;  %v5320_v26 = vsel %vm1418_vm8, %v1412_v36, %v3343_v8  ;;  %v5323_v61 = vsel %vm1418_vm8, %v1413_v46, %v3344_v31  ;;  %v3588_v22 = vunpack.i.l.bf16 %v5264_v34 }
 0x149   : > { %v5267_v35 = vpop.permute.xlu1 %3601  ;;  %v1428_v55 = vsel %vm1418_vm8, %v1411_v10, %v3339_v58  ;;  %v2133_v59 = vsel %vm1350_vm4, %v5723_v9, %v3578_v5  ;;  %v2134_v54 = vsel %vm1350_vm4, %v5724_v23, %v3579_v6  ;;  %v2136_v41 = vsel %vm1350_vm4, %v5725_v27, %v3589_v50 }
 0x14a   : > { %v5269_v7 = vpop.permute.xlu0 %3596  ;;  %v3604_v24 = vunpack.i.h.bf16 %v5267_v35  ;;  %v3603_v53 = vunpack.i.l.bf16 %v5267_v35  ;;  %v1445_v19 = vsel %vm1435_vm9, %v1428_v55, %v3544_v21  ;;  %v2149_v40 = vsel %vm1367_vm5, %v2133_v59, %v3593_v38 }
 0x14b   : > { %v3598_v1 = vunpack.i.l.bf16 %v5269_v7  ;;  %v2150_v34 = vsel %vm1367_vm5, %v2134_v54, %v3594_v0  ;;  %v2135_v2 = vsel %vm1350_vm4, %v5726_v51, %v3588_v22  ;;  %v3599_v47 = vunpack.i.h.bf16 %v5269_v7 }
 0x14c   : > { %v2165_v25 = vsel %vm1384_vm6, %v2149_v40, %v3603_v53  ;;  %v2166_v42 = vsel %vm1384_vm6, %v2150_v34, %v3604_v24 }
 0x14d   : > { %v5271_v45 = vpop.permute.xlu1 %3611  ;;  %v2151_v28 = vsel %vm1367_vm5, %v2135_v2, %v3598_v1  ;;  %v2152_v50 = vsel %vm1367_vm5, %v2136_v41, %v3599_v47 }
 0x14e   : > { %v5273_v3 = vpop.permute.xlu0 %3606  ;;  %v3614_v39 = vunpack.i.h.bf16 %v5271_v45  ;;  %v3613_v48 = vunpack.i.l.bf16 %v5271_v45 }
 0x14f   : > { %v3608_v45 = vunpack.i.l.bf16 %v5273_v3  ;;  %v3609_v5 = vunpack.i.h.bf16 %v5273_v3 }
 0x150   : > { %v2181_v7 = vsel %vm1401_vm7, %v2165_v25, %v3613_v48  ;;  %v2182_v20 = vsel %vm1401_vm7, %v2166_v42, %v3614_v39 }
 0x151   : > { %v5278_v49 = vpop.permute.xlu1 %3621  ;;  %v2167_v10 = vsel %vm1384_vm6, %v2151_v28, %v3608_v45 }
 0x152   : > { %v5282_v43 = vpop.permute.xlu0 %3616  ;;  %v3624_v16 = vunpack.i.h.bf16 %v5278_v49  ;;  %v3623_v14 = vunpack.i.l.bf16 %v5278_v49 }
 0x153   : > { %v3619_v53 = vunpack.i.h.bf16 %v5282_v43 }
 0x154   : > { %v2197_v56 = vsel %vm1418_vm8, %v2181_v7, %v3623_v14  ;;  %v2198_v62 = vsel %vm1418_vm8, %v2182_v20, %v3624_v16 }
 0x155   : > { %v5294_v33 = vpop.permute.xlu1 %3631 }
 0x156   : > { %v5300_v18 = vpop.permute.xlu0 %3626  ;;  %v3634_v15 = vunpack.i.h.bf16 %v5294_v33  ;;  %v3633_v57 = vunpack.i.l.bf16 %v5294_v33 }
 0x157   : > { %v3629_v40 = vunpack.i.h.bf16 %v5300_v18  ;;  %v3628_v1 = vunpack.i.l.bf16 %v5300_v18 }
 0x158   : > { %v2213_v52 = vsel %vm1435_vm9, %v2197_v56, %v3633_v57  ;;  %v2214_v21 = vsel %vm1435_vm9, %v2198_v62, %v3634_v15 }
 0x159   : > { %v3642_v63 = vpop.permute.xlu1 %3641 }
 0x15a   : > { %v5316_v11 = vpop.permute.xlu0 %3636  ;;  %v3644_v60 = vunpack.i.h.bf16 %v3642_v63  ;;  %v3643_v44 = vunpack.i.l.bf16 %v3642_v63 }
 0x15b   : > { %v3639_v38 = vunpack.i.h.bf16 %v5316_v11  ;;  %v3638_v63 = vunpack.i.l.bf16 %v5316_v11  ;;  %v2168_v11 = vsel %vm1384_vm6, %v2152_v50, %v3609_v5 }
 0x15c   : > { %v1461_v17 = vsel %vm1452_vm10, %v4933_v29, %v3643_v44  ;;  %v1462_v49 = vsel %vm1452_vm10, %v1445_v19, %v3644_v60  ;;  %v3618_v19 = vunpack.i.l.bf16 %v5282_v43  ;;  %v2184_v60 = vsel %vm1401_vm7, %v2168_v11, %v3619_v53 }
 0x15d   : > { %v3652_v13 = vpop.permute.xlu1 %3651  ;;  %v1446_v34 = vsel %vm1435_vm9, %v5320_v26, %v3638_v63  ;;  %v2200_v42 = vsel %vm1418_vm8, %v2184_v60, %v3629_v40 }
 0x15e   : > { %v5341_v35 = vpop.permute.xlu0 %3646  ;;  %v3654_v31 = vunpack.i.h.bf16 %v3652_v13  ;;  %v3653_v8 = vunpack.i.l.bf16 %v3652_v13  ;;  %v1447_v13 = vsel %vm1435_vm9, %v5323_v61, %v3639_v38  ;;  %v2183_v61 = vsel %vm1401_vm7, %v2167_v10, %v3618_v19  ;;  %v5728_v10 = vld [vmem:[#allocation33_spill] sm:$0xff] }
 0x15f   : > { %v3649_v41 = vunpack.i.h.bf16 %v5341_v35  ;;  %v3648_v39 = vunpack.i.l.bf16 %v5341_v35  ;;  %v2199_v35 = vsel %vm1418_vm8, %v2183_v61, %v3628_v1 }
 0x160   : > { %v2229_v22 = vsel %vm1452_vm10, %v2213_v52, %v3653_v8  ;;  %v2230_v3 = vsel %vm1452_vm10, %v2214_v21, %v3654_v31 }
 0x161   : > { %v3662_v32 = vpop.permute.xlu1 %3661  ;;  %v2215_v28 = vsel %vm1435_vm9, %v2199_v35, %v3648_v39  ;;  %v2216_v45 = vsel %vm1435_vm9, %v2200_v42, %v3649_v41 }
 0x162   : > { %v3664_v12 = vunpack.i.h.bf16 %v3662_v32  ;;  %v3663_v30 = vunpack.i.l.bf16 %v3662_v32  ;;  %v3657_v4 = vpop.permute.xlu0 %3656 }
 0x163   : > { %v3659_v55 = vunpack.i.h.bf16 %v3657_v4  ;;  %v3658_v9 = vunpack.i.l.bf16 %v3657_v4 }
 0x164   : > { %v1478_v33 = vsel %vm1469_vm11, %v1461_v17, %v3663_v30  ;;  %v1479_v58 = vsel %vm1469_vm11, %v1462_v49, %v3664_v12 }
 0x165   : > { %v1490_v6 = vpack.c.bf16 %v1479_v58, %v1478_v33  ;;  %v3672_v29 = vpop.permute.xlu1 %3671  ;;  %v1463_v43 = vsel %vm1452_vm10, %v1446_v34, %v3658_v9  ;;  %v1464_v2 = vsel %vm1452_vm10, %v1447_v13, %v3659_v55 }
 0x166   : > { %v3674_v36 = vunpack.i.h.bf16 %v3672_v29  ;;  %v3673_v46 = vunpack.i.l.bf16 %v3672_v29  ;;  %v3667_v0 = vpop.permute.xlu0 %3666 }
 0x167   : > { %3081 = vmatprep.mubr.msk.bf16.mxu0 %vm2281_vm12, %v1490_v6  ;;  %v3669_v18 = vunpack.i.h.bf16 %v3667_v0  ;;  %v3668_v47 = vunpack.i.l.bf16 %v3667_v0  ;;  %v5727_v0 = vld [vmem:[#allocation32_spill] sm:$0xff] }
 0x168   : > { %v2245_v59 = vsel %vm1469_vm11, %v2229_v22, %v3673_v46  ;;  %v2246_v24 = vsel %vm1469_vm11, %v2230_v3, %v3674_v36  ;;  %v5729_v3 = vld [vmem:[#allocation36_spill] sm:$0xff] }
 0x169   : > { %v2257_v23 = vpack.c.bf16 %v2246_v24, %v2245_v59  ;;  %v3682_v54 = vpop.permute.xlu1 %3681  ;;  %v2231_v32 = vsel %vm1452_vm10, %v2215_v28, %v3668_v47  ;;  %v2232_v7 = vsel %vm1452_vm10, %v2216_v45, %v3669_v18  ;;  %v5730_v24 = vld [vmem:[#allocation37_spill] sm:$0xff] }
 0x16a   : > { %v3677_v27 = vpop.permute.xlu0 %3676  ;;  %v3684_v58 = vunpack.i.h.bf16 %v3682_v54  ;;  %v3683_v5 = vunpack.i.l.bf16 %v3682_v54 }
 0x16b   : > { %v3679_v48 = vunpack.i.h.bf16 %v3677_v27  ;;  %v3678_v51 = vunpack.i.l.bf16 %v3677_v27  ;;  %3059 = vmatprep.mubr.msk.bf16.mxu1 %vm2281_vm12, %v2257_v23 }
 0x16c   : > { %v2138_v50 = vsel %vm1350_vm4, %v5727_v0, %v3684_v58  ;;  %v2137_v22 = vsel %vm1350_vm4, %v5728_v10, %v3683_v5 }
 0x16d   : > { %v1480_v26 = vsel %vm1469_vm11, %v1463_v43, %v3678_v51  ;;  %v1481_v44 = vsel %vm1469_vm11, %v1464_v2, %v3679_v48  ;;  %v3692_v25 = vpop.permute.xlu1 %3691 }
 0x16e   : > { %v1491_v16 = vpack.c.bf16 %v1481_v44, %v1480_v26  ;;  %v3687_v14 = vpop.permute.xlu0 %3686  ;;  %v3694_v52 = vunpack.i.h.bf16 %v3692_v25  ;;  %v3693_v6 = vunpack.i.l.bf16 %v3692_v25 }
 0x16f   : > { %v3689_v15 = vunpack.i.h.bf16 %v3687_v14  ;;  %v3688_v57 = vunpack.i.l.bf16 %v3687_v14 }
 0x170   : > { %3082 = vmatmul.mubr.msk.bf16.gmra.mrb[8].mxu0 %vm2281_vm12, %v1491_v16  ;;  %v2140_v55 = vsel %vm1350_vm4, %v5729_v3, %v3694_v52  ;;  %v2139_v11 = vsel %vm1350_vm4, %v5730_v24, %v3693_v6 }
 0x171   : > { %v2247_v20 = vsel %vm1469_vm11, %v2231_v32, %v3688_v57  ;;  %v2248_v12 = vsel %vm1469_vm11, %v2232_v7, %v3689_v15  ;;  %v3702_v30 = vpop.permute.xlu1 %3701  ;;  %v5731_v7 = vld [vmem:[#allocation41_spill] sm:$0xff] }
 0x172   : > { %v2258_v4 = vpack.c.bf16 %v2248_v12, %v2247_v20  ;;  %v3697_v17 = vpop.permute.xlu0 %3696  ;;  %v3704_v38 = vunpack.i.h.bf16 %v3702_v30  ;;  %v3703_v63 = vunpack.i.l.bf16 %v3702_v30 }
 0x173   : > { %v3699_v36 = vunpack.i.h.bf16 %v3697_v17  ;;  %v3698_v46 = vunpack.i.l.bf16 %v3697_v17 }
 0x174   : > { %3060 = vmatmul.mubr.msk.bf16.gmra.mrb[8].mxu1 %vm2281_vm12, %v2258_v4  ;;  %v2155_v40 = vsel %vm1367_vm5, %v2139_v11, %v3703_v63  ;;  %v2156_v1 = vsel %vm1367_vm5, %v2140_v55, %v3704_v38 }
 0x175   : > { %v3712_v49 = vpop.permute.xlu1 %3711  ;;  %v2154_v27 = vsel %vm1367_vm5, %v2138_v50, %v3699_v36  ;;  %v2153_v41 = vsel %vm1367_vm5, %v2137_v22, %v3698_v46 }
 0x176   : > { %v3707_v31 = vpop.permute.xlu0 %3706  ;;  %v3713_v9 = vunpack.i.l.bf16 %v3712_v49  ;;  %v3714_v53 = vunpack.i.h.bf16 %v3712_v49 }
 0x177   : > { %v3709_v19 = vunpack.i.h.bf16 %v3707_v31  ;;  %v3708_v23 = vunpack.i.l.bf16 %v3707_v31 }
 0x178   : > { %v2171_v51 = vsel %vm1384_vm6, %v2155_v40, %v3713_v9  ;;  %v2172_v61 = vsel %vm1384_vm6, %v2156_v1, %v3714_v53  ;;  %v5732_v40 = vld [vmem:[#allocation40_spill] sm:$0xff] }
 0x179   : > { %v3722_v8 = vpop.permute.xlu1 %3721  ;;  %v2169_v60 = vsel %vm1384_vm6, %v2153_v41, %v3708_v23  ;;  %v2170_v26 = vsel %vm1384_vm6, %v2154_v27, %v3709_v19 }
 0x17a   : > { %v3717_v56 = vpop.permute.xlu0 %3716  ;;  %v3724_v13 = vunpack.i.h.bf16 %v3722_v8  ;;  %v3723_v34 = vunpack.i.l.bf16 %v3722_v8 }
 0x17b   : > { %v3719_v39 = vunpack.i.h.bf16 %v3717_v56  ;;  %v3718_v48 = vunpack.i.l.bf16 %v3717_v56 }
 0x17c   : > { %v2187_v35 = vsel %vm1401_vm7, %v2171_v51, %v3723_v34  ;;  %v2188_v42 = vsel %vm1401_vm7, %v2172_v61, %v3724_v13  ;;  %v5733_v13 = vld [vmem:[#allocation39_spill] sm:$0xff] }
 0x17d   : > { %v3732_v62 = vpop.permute.xlu1 %3731  ;;  %v2185_v28 = vsel %vm1401_vm7, %v2169_v60, %v3718_v48  ;;  %v2186_v45 = vsel %vm1401_vm7, %v2170_v26, %v3719_v39 }
 0x17e   : > { %v3727_v33 = vpop.permute.xlu0 %3726  ;;  %v3734_v43 = vunpack.i.h.bf16 %v3732_v62  ;;  %v3733_v2 = vunpack.i.l.bf16 %v3732_v62 }
 0x17f   : > { %v3728_v18 = vunpack.i.l.bf16 %v3727_v33  ;;  %v3729_v44 = vunpack.i.h.bf16 %v3727_v33 }
 0x180   : > { %v1448_v32 = vsel %vm1435_vm9, %v4832_v37, %v3733_v2  ;;  %v1449_v20 = vsel %vm1435_vm9, %v5731_v7, %v3734_v43 }
 0x181   : > { %v3742_v21 = vpop.permute.xlu1 %3741  ;;  %v2201_v12 = vsel %vm1418_vm8, %v2185_v28, %v3728_v18  ;;  %v2202_v17 = vsel %vm1418_vm8, %v2186_v45, %v3729_v44 }
 0x182   : > { %v5403_v29 = vpop.permute.xlu0 %3736  ;;  %v3744_v15 = vunpack.i.h.bf16 %v3742_v21  ;;  %v3743_v57 = vunpack.i.l.bf16 %v3742_v21 }
 0x183   : > { %v3739_v30 = vunpack.i.h.bf16 %v5403_v29  ;;  %v3738_v49 = vunpack.i.l.bf16 %v5403_v29 }
 0x184   : > { %v2217_v5 = vsel %vm1435_vm9, %v2201_v12, %v3743_v57  ;;  %v2218_v52 = vsel %vm1435_vm9, %v2202_v17, %v3744_v15 }
 0x185   : > { %v3752_v59 = vpop.permute.xlu1 %3751  ;;  %v2204_v38 = vsel %vm1418_vm8, %v2188_v42, %v3739_v30 }
 0x186   : > { %v5413_v54 = vpop.permute.xlu0 %3746  ;;  %v3754_v16 = vunpack.i.h.bf16 %v3752_v59  ;;  %v3753_v14 = vunpack.i.l.bf16 %v3752_v59 }
 0x187   : > { %v3749_v29 = vunpack.i.h.bf16 %v5413_v54  ;;  %v3748_v63 = vunpack.i.l.bf16 %v5413_v54  ;;  %v2203_v54 = vsel %vm1418_vm8, %v2187_v35, %v3738_v49 }
 0x188   : > { %v1465_v62 = vsel %vm1452_vm10, %v1448_v32, %v3753_v14  ;;  %v1466_v33 = vsel %vm1452_vm10, %v1449_v20, %v3754_v16  ;;  %v5470_v20 = vld [vmem:[%s5588_s8] ss:$0 sm:$0xff] }
 0x189   : > { %v3762_v47 = vpop.permute.xlu1 %3761  ;;  %v1451_v1 = vsel %vm1435_vm9, %v5732_v40, %v3749_v29  ;;  %v1450_v34 = vsel %vm1435_vm9, %v5733_v13, %v3748_v63 }
 0x18a   : > { %v3757_v25 = vpop.permute.xlu0 %3756  ;;  %v3764_v37 = vunpack.i.h.bf16 %v3762_v47  ;;  %v3763_v58 = vunpack.i.l.bf16 %v3762_v47 }
 0x18b   : > { %v3759_v0 = vunpack.i.h.bf16 %v3757_v25  ;;  %v3758_v50 = vunpack.i.l.bf16 %v3757_v25 }
 0x18c   : > { %v2233_v55 = vsel %vm1452_vm10, %v2217_v5, %v3763_v58  ;;  %v2234_v9 = vsel %vm1452_vm10, %v2218_v52, %v3764_v37 }
 0x18d   : > { %v3772_v4 = vpop.permute.xlu1 %3771  ;;  %v2219_v39 = vsel %vm1435_vm9, %v2203_v54, %v3758_v50  ;;  %v2220_v48 = vsel %vm1435_vm9, %v2204_v38, %v3759_v0 }
 0x18e   : > { %v3774_v31 = vunpack.i.h.bf16 %v3772_v4  ;;  %v3773_v8 = vunpack.i.l.bf16 %v3772_v4  ;;  %v3767_v56 = vpop.permute.xlu0 %3766 }
 0x18f   : > { %v3769_v11 = vunpack.i.h.bf16 %v3767_v56  ;;  %v3768_v53 = vunpack.i.l.bf16 %v3767_v56 }
 0x190   : > { %v1482_v21 = vsel %vm1469_vm11, %v1465_v62, %v3773_v8  ;;  %v1483_v6 = vsel %vm1469_vm11, %v1466_v33, %v3774_v31 }
 0x191   : > { %v1492_v36 = vpack.c.bf16 %v1483_v6, %v1482_v21  ;;  %v3782_v46 = vpop.permute.xlu1 %3781  ;;  %v1467_v26 = vsel %vm1452_vm10, %v1450_v34, %v3768_v53  ;;  %v1468_v44 = vsel %vm1452_vm10, %v1451_v1, %v3769_v11 }
 0x192   : > { %v3784_v10 = vunpack.i.h.bf16 %v3782_v46  ;;  %v3783_v22 = vunpack.i.l.bf16 %v3782_v46  ;;  %v3777_v3 = vpop.permute.xlu0 %3776 }
 0x193   : > { %v3779_v59 = vunpack.i.h.bf16 %v3777_v3  ;;  %v3778_v24 = vunpack.i.l.bf16 %v3777_v3  ;;  %3085 = vmatprep.mubr.msk.bf16.mxu0 %vm2281_vm12, %v1492_v36 }
 0x194   : > { %v2249_v19 = vsel %vm1469_vm11, %v2233_v55, %v3783_v22  ;;  %v2250_v23 = vsel %vm1469_vm11, %v2234_v9, %v3784_v10 }
 0x195   : > { %v2259_v27 = vpack.c.bf16 %v2250_v23, %v2249_v19  ;;  %v3792_v41 = vpop.permute.xlu1 %3791  ;;  %v2235_v18 = vsel %vm1452_vm10, %v2219_v39, %v3778_v24  ;;  %v2236_v47 = vsel %vm1452_vm10, %v2220_v48, %v3779_v59 }
 0x196   : > { %v3794_v51 = vunpack.i.h.bf16 %v3792_v41  ;;  %v3793_v43 = vunpack.i.l.bf16 %v3792_v41  ;;  %v3787_v2 = vpop.permute.xlu0 %3786 }
 0x197   : > { %v3789_v61 = vunpack.i.h.bf16 %v3787_v2  ;;  %v3788_v60 = vunpack.i.l.bf16 %v3787_v2  ;;  %3063 = vmatprep.mubr.msk.bf16.mxu1 %vm2281_vm12, %v2259_v27 }
 0x198   : > { %v2251_v25 = vsel %vm1469_vm11, %v2235_v18, %v3793_v43  ;;  %v2252_v35 = vsel %vm1469_vm11, %v2236_v47, %v3794_v51 }
 0x199   : > { %v2260_v42 = vpack.c.bf16 %v2252_v35, %v2251_v25  ;;  %v1484_v16 = vsel %vm1469_vm11, %v1467_v26, %v3788_v60  ;;  %v1485_v14 = vsel %vm1469_vm11, %v1468_v44, %v3789_v61 }
 0x19a   : > { %v1493_v28 = vpack.c.bf16 %v1485_v14, %v1484_v16 }
 0x19b   : > { %3064 = vmatmul.mubr.msk.bf16.gmra.mrb[12].mxu1 %vm2281_vm12, %v2260_v42 }
 0x19c   : > { %3086 = vmatmul.mubr.msk.bf16.gmra.mrb[12].mxu0 %vm2281_vm12, %v1493_v28 }
 0x1ee   : > { %v3075_v45 = vpop.f32.mrb[0].mxu0 }
 0x1ef   : > { %v2483_v15 = vpop.f32.mrb[1].mxu0 }
 0x1f0   : > { %v3076_v57 = vpop.f32.mrb[2].mxu0 }
 0x1f1   : > { %v2486_v32 = vpop.f32.mrb[3].mxu0 }
 0x1f2   : > { %v3053_v7 = vpop.f32.mrb[0].mxu1 }
 0x1f3   : > { %v2492_v12 = vadd.f32 %v3075_v45, %v3053_v7  ;;  %v2344_v30 = vpop.f32.mrb[1].mxu1 }
 0x1f4   : > { %v2484_v4 = vadd.f32 %v2483_v15, %v2344_v30  ;;  %v3054_v17 = vpop.f32.mrb[2].mxu1 }
 0x1f5   : > { %v2555_v49 = vadd.f32 %v5470_v20, %v2492_v12  ;;  %v2495_v31 = vadd.f32 %v3076_v57, %v3054_v17  ;;  %v2347_v8 = vpop.f32.mrb[3].mxu1 }
 0x1f6   : > { %v2553_v56 = vadd.f32 %v5470_v20, %v2484_v4  ;;  %v2487_v62 = vadd.f32 %v2486_v32, %v2347_v8 }
 0x1f7   : > { %2664 = vst.msk [vmem:[%s5476_s12 + $0x10] sm:$0xff] %vm1367_vm5, %v2555_v49  ;;  %v2556_v33 = vadd.f32 %v5470_v20, %v2495_v31  ;;  %v2608_v5 = vmul.f32 %v2555_v49, %v2555_v49  ;;  %v2572_v29 = vsel %vm1367_vm5, %v2555_v49, 0.0 }
 0x1f8   : > { %v2606_v37 = vmul.f32 %v2553_v56, %v2553_v56  ;;  %2662 = vst.msk [vmem:[%s5476_s12] sm:$0xff] %vm1367_vm5, %v2553_v56  ;;  %v2554_v58 = vadd.f32 %v5470_v20, %v2487_v62  ;;  %v2569_v52 = vsel %vm1367_vm5, %v2553_v56, 0.0 }
 0x1f9   : > { %2665 = vst.msk [vmem:[%s5476_s12 + $0x18] sm:$0xff] %vm1367_vm5, %v2556_v33  ;;  %v2609_v36 = vmul.f32 %v2556_v33, %v2556_v33  ;;  %v2625_v10 = vsel %vm1367_vm5, %v2608_v5, 0.0  ;;  %v2574_v22 = vsel %vm1367_vm5, %v2556_v33, 0.0 }
 0x1fa   : > { %v2570_v21 = vsel %vm1367_vm5, %v2554_v58, 0.0  ;;  %v2607_v6 = vmul.f32 %v2554_v58, %v2554_v58  ;;  %2663 = vst.msk [vmem:[%s5476_s12 + $0x8] sm:$0xff] %vm1367_vm5, %v2554_v58  ;;  %v2622_v63 = vsel %vm1367_vm5, %v2606_v37, 0.0 }
 0x1fb   : > { %v2571_v38 = vadd.f32 %v2570_v21, %v2569_v52  ;;  %v2627_v9 = vsel %vm1367_vm5, %v2609_v36, 0.0 }
 0x1fc   : > { %v2623_v46 = vsel %vm1367_vm5, %v2607_v6, 0.0 }
 0x1fd   : > { %v2573_v0 = vadd.f32 %v2572_v29, %v2571_v38  ;;  %v2624_v50 = vadd.f32 %v2623_v46, %v2622_v63 }
 0x1ff   : > { %v2626_v3 = vadd.f32 %v2625_v10, %v2624_v50  ;;  %v2575_v55 = vadd.f32 %v2574_v22, %v2573_v0 }
 0x201   : > { %v2628_v59 = vadd.f32 %v2627_v9, %v2626_v3 }
 0x216   : > { %v3079_v24 = vpop.f32.mrb[4].mxu0 }
 0x217   : > { %v2499_v11 = vpop.f32.mrb[5].mxu0 }
 0x218   : > { %v3080_v53 = vpop.f32.mrb[6].mxu0 }
 0x219   : > { %v2502_v19 = vpop.f32.mrb[7].mxu0 }
 0x21a   : > { %v3057_v23 = vpop.f32.mrb[4].mxu1 }
 0x21b   : > { %v2508_v54 = vadd.f32 %v3079_v24, %v3057_v23  ;;  %v2360_v40 = vpop.f32.mrb[5].mxu1 }
 0x21c   : > { %v2500_v1 = vadd.f32 %v2499_v11, %v2360_v40  ;;  %v3058_v13 = vpop.f32.mrb[6].mxu1 }
 0x21d   : > { %v2559_v34 = vadd.f32 %v5470_v20, %v2508_v54  ;;  %v2511_v27 = vadd.f32 %v3080_v53, %v3058_v13  ;;  %v2363_v41 = vpop.f32.mrb[7].mxu1 }
 0x21e   : > { %v2557_v39 = vadd.f32 %v5470_v20, %v2500_v1  ;;  %v2503_v48 = vadd.f32 %v2502_v19, %v2363_v41 }
 0x21f   : > { %2668 = vst.msk [vmem:[%s5476_s12 + $0x30] sm:$0xff] %vm1367_vm5, %v2559_v34  ;;  %v2560_v51 = vadd.f32 %v5470_v20, %v2511_v27  ;;  %v2612_v61 = vmul.f32 %v2559_v34, %v2559_v34  ;;  %v2580_v42 = vsel %vm1367_vm5, %v2559_v34, 0.0 }
 0x220   : > { %v2576_v43 = vsel %vm1367_vm5, %v2557_v39, 0.0  ;;  %v2610_v2 = vmul.f32 %v2557_v39, %v2557_v39  ;;  %2666 = vst.msk [vmem:[%s5476_s12 + $0x20] sm:$0xff] %vm1367_vm5, %v2557_v39  ;;  %v2558_v18 = vadd.f32 %v5470_v20, %v2503_v48 }
 0x221   : > { %v2577_v47 = vadd.f32 %v2576_v43, %v2575_v55  ;;  %2669 = vst.msk [vmem:[%s5476_s12 + $0x38] sm:$0xff] %vm1367_vm5, %v2560_v51  ;;  %v2613_v16 = vmul.f32 %v2560_v51, %v2560_v51  ;;  %v2633_v15 = vsel %vm1367_vm5, %v2612_v61, 0.0  ;;  %v2582_v57 = vsel %vm1367_vm5, %v2560_v51, 0.0 }
 0x222   : > { %v2629_v60 = vsel %vm1367_vm5, %v2610_v2, 0.0  ;;  %v2578_v26 = vsel %vm1367_vm5, %v2558_v18, 0.0  ;;  %v2611_v44 = vmul.f32 %v2558_v18, %v2558_v18  ;;  %2667 = vst.msk [vmem:[%s5476_s12 + $0x28] sm:$0xff] %vm1367_vm5, %v2558_v18 }
 0x223   : > { %v2630_v25 = vadd.f32 %v2629_v60, %v2628_v59  ;;  %v2579_v35 = vadd.f32 %v2578_v26, %v2577_v47  ;;  %v2635_v12 = vsel %vm1367_vm5, %v2613_v16, 0.0 }
 0x224   : > { %v2631_v14 = vsel %vm1367_vm5, %v2611_v44, 0.0 }
 0x225   : > { %v2581_v28 = vadd.f32 %v2580_v42, %v2579_v35  ;;  %v2632_v45 = vadd.f32 %v2631_v14, %v2630_v25 }
 0x227   : > { %v2634_v32 = vadd.f32 %v2633_v15, %v2632_v45  ;;  %v2583_v7 = vadd.f32 %v2582_v57, %v2581_v28 }
 0x229   : > { %v2636_v30 = vadd.f32 %v2635_v12, %v2634_v32 }
 0x243   : > { %v3083_v4 = vpop.f32.mrb[8].mxu0 }
 0x244   : > { %v2515_v17 = vpop.f32.mrb[9].mxu0 }
 0x245   : > { %v3084_v49 = vpop.f32.mrb[10].mxu0 }
 0x246   : > { %v2518_v31 = vpop.f32.mrb[11].mxu0 }
 0x247   : > { %v3061_v8 = vpop.f32.mrb[8].mxu1 }
 0x248   : > { %v2524_v56 = vadd.f32 %v3083_v4, %v3061_v8  ;;  %v2376_v62 = vpop.f32.mrb[9].mxu1 }
 0x249   : > { %v2516_v33 = vadd.f32 %v2515_v17, %v2376_v62  ;;  %v3062_v37 = vpop.f32.mrb[10].mxu1 }
 0x24a   : > { %v2563_v58 = vadd.f32 %v5470_v20, %v2524_v56  ;;  %v2527_v5 = vadd.f32 %v3084_v49, %v3062_v37  ;;  %v2379_v52 = vpop.f32.mrb[11].mxu1 }
 0x24b   : > { %v2561_v21 = vadd.f32 %v5470_v20, %v2516_v33  ;;  %v2519_v6 = vadd.f32 %v2518_v31, %v2379_v52 }
 0x24c   : > { %2672 = vst.msk [vmem:[%s5476_s12 + $0x50] sm:$0xff] %vm1367_vm5, %v2563_v58  ;;  %v2564_v38 = vadd.f32 %v5470_v20, %v2527_v5  ;;  %v2616_v0 = vmul.f32 %v2563_v58, %v2563_v58  ;;  %v2588_v9 = vsel %vm1367_vm5, %v2563_v58, 0.0 }
 0x24d   : > { %v2584_v29 = vsel %vm1367_vm5, %v2561_v21, 0.0  ;;  %v2614_v63 = vmul.f32 %v2561_v21, %v2561_v21  ;;  %2670 = vst.msk [vmem:[%s5476_s12 + $0x40] sm:$0xff] %vm1367_vm5, %v2561_v21  ;;  %v2562_v36 = vadd.f32 %v5470_v20, %v2519_v6 }
 0x24e   : > { %v2585_v46 = vadd.f32 %v2584_v29, %v2583_v7  ;;  %2673 = vst.msk [vmem:[%s5476_s12 + $0x58] sm:$0xff] %vm1367_vm5, %v2564_v38  ;;  %v2617_v59 = vmul.f32 %v2564_v38, %v2564_v38  ;;  %v2641_v19 = vsel %vm1367_vm5, %v2616_v0, 0.0  ;;  %v2590_v23 = vsel %vm1367_vm5, %v2564_v38, 0.0 }
 0x24f   : > { %v2637_v50 = vsel %vm1367_vm5, %v2614_v63, 0.0  ;;  %v2586_v10 = vsel %vm1367_vm5, %v2562_v36, 0.0  ;;  %v2615_v22 = vmul.f32 %v2562_v36, %v2562_v36  ;;  %2671 = vst.msk [vmem:[%s5476_s12 + $0x48] sm:$0xff] %vm1367_vm5, %v2562_v36 }
 0x250   : > { %v2638_v3 = vadd.f32 %v2637_v50, %v2636_v30  ;;  %v2587_v55 = vadd.f32 %v2586_v10, %v2585_v46  ;;  %v2643_v1 = vsel %vm1367_vm5, %v2617_v59, 0.0 }
 0x251   : > { %v2639_v24 = vsel %vm1367_vm5, %v2615_v22, 0.0 }
 0x252   : > { %v2589_v11 = vadd.f32 %v2588_v9, %v2587_v55  ;;  %v2640_v53 = vadd.f32 %v2639_v24, %v2638_v3 }
 0x254   : > { %v2642_v54 = vadd.f32 %v2641_v19, %v2640_v53  ;;  %v2591_v40 = vadd.f32 %v2590_v23, %v2589_v11 }
 0x256   : > { %v2644_v13 = vadd.f32 %v2643_v1, %v2642_v54 }
 0x26e   : > { %v3065_v34 = vpop.f32.mrb[12].mxu1 }
 0x26f   : > { %v3087_v27 = vpop.f32.mrb[12].mxu0  ;;  %v2392_v41 = vpop.f32.mrb[13].mxu1 }
 0x270   : > { %v2540_v39 = vadd.f32 %v3087_v27, %v3065_v34  ;;  %v2531_v48 = vpop.f32.mrb[13].mxu0  ;;  %v3066_v51 = vpop.f32.mrb[14].mxu1 }
 0x271   : > { %v2532_v43 = vadd.f32 %v2531_v48, %v2392_v41  ;;  %v3088_v2 = vpop.f32.mrb[14].mxu0  ;;  %v2395_v18 = vpop.f32.mrb[15].mxu1 }
 0x272   : > { %v2567_v47 = vadd.f32 %v5470_v20, %v2540_v39  ;;  %v2543_v61 = vadd.f32 %v3088_v2, %v3066_v51  ;;  %v2534_v60 = vpop.f32.mrb[15].mxu0 }
 0x273   : > { %v2565_v26 = vadd.f32 %v5470_v20, %v2532_v43  ;;  %v2535_v44 = vadd.f32 %v2534_v60, %v2395_v18 }
 0x274   : > { %2676 = vst.msk [vmem:[%s5476_s12 + $0x70] sm:$0xff] %vm1367_vm5, %v2567_v47  ;;  %v2568_v25 = vadd.f32 %v5470_v20, %v2543_v61  ;;  %v2620_v28 = vmul.f32 %v2567_v47, %v2567_v47  ;;  %v2596_v12 = vsel %vm1367_vm5, %v2567_v47, 0.0 }
 0x275   : > { %v2592_v35 = vsel %vm1367_vm5, %v2565_v26, 0.0  ;;  %v2618_v42 = vmul.f32 %v2565_v26, %v2565_v26  ;;  %2674 = vst.msk [vmem:[%s5476_s12 + $0x60] sm:$0xff] %vm1367_vm5, %v2565_v26  ;;  %v2566_v16 = vadd.f32 %v5470_v20, %v2535_v44 }
 0x276   : > { %v2593_v14 = vadd.f32 %v2592_v35, %v2591_v40  ;;  %2677 = vst.msk [vmem:[%s5476_s12 + $0x78] sm:$0xff] %vm1367_vm5, %v2568_v25  ;;  %v2621_v30 = vmul.f32 %v2568_v25, %v2568_v25  ;;  %v2649_v49 = vsel %vm1367_vm5, %v2620_v28, 0.0  ;;  %v2598_v31 = vsel %vm1367_vm5, %v2568_v25, 0.0 }
 0x277   : > { %v2645_v45 = vsel %vm1367_vm5, %v2618_v42, 0.0  ;;  %v2594_v15 = vsel %vm1367_vm5, %v2566_v16, 0.0  ;;  %v2619_v57 = vmul.f32 %v2566_v16, %v2566_v16  ;;  %2675 = vst.msk [vmem:[%s5476_s12 + $0x68] sm:$0xff] %vm1367_vm5, %v2566_v16 }
 0x278   : > { %v2646_v32 = vadd.f32 %v2645_v45, %v2644_v13  ;;  %v2595_v7 = vadd.f32 %v2594_v15, %v2593_v14  ;;  %v2651_v62 = vsel %vm1367_vm5, %v2621_v30, 0.0 }
 0x279   : > { %v2647_v20 = vsel %vm1367_vm5, %v2619_v57, 0.0 }
 0x27a   : > { %v2597_v4 = vadd.f32 %v2596_v12, %v2595_v7  ;;  %v2648_v17 = vadd.f32 %v2647_v20, %v2646_v32 }
 0x27c   : > { %v2599_v8 = vadd.f32 %v2598_v31, %v2597_v4  ;;  %v2650_v56 = vadd.f32 %v2649_v49, %v2648_v17 }
 0x27e   : > { %v2600_v33 = vrot.slane %v2599_v8, 4  ;;  %v2652_v37 = vadd.f32 %v2651_v62, %v2650_v56 }
 0x280   : > { %v2601_v58 = vadd.f32 %v2600_v33, %v2599_v8  ;;  %v2653_v5 = vrot.slane %v2652_v37, 4 }
 0x282   : > { %v2602_v52 = vrot.slane %v2601_v58, 2  ;;  %v2654_v21 = vadd.f32 %v2653_v5, %v2652_v37 }
 0x284   : > { %v2603_v6 = vadd.f32 %v2602_v52, %v2601_v58  ;;  %v2655_v38 = vrot.slane %v2654_v21, 2 }
 0x286   : > { %v2604_v29 = vrot.slane %v2603_v6, 1  ;;  %v2656_v63 = vadd.f32 %v2655_v38, %v2654_v21 }
 0x288   : > { %v2657_v36 = vrot.slane %v2656_v63, 1  ;;  %v2605_v46 = vadd.f32 %v2604_v29, %v2603_v6 }
 0x28a   : > { %v2658_v0 = vadd.f32 %v2657_v36, %v2656_v63 }
 0x28c   : > { %v2659_v50 = vsel %vm765_vm0, %v2605_v46, %v2658_v0 }
 0x28d   : > { %2661 = vst.msk [vmem:[%s711_s20] sm:$0x3] %vm2660_vm13, %v2659_v50 }
 0x28e PF: > { %s21_s17 = sadd.s32 1, %s3863_s17   ;;  %s5734_s13 = smov %s3855_s15 }
 0x28f   : > { %p18_p13 = scmp.ge.s32.totalorder %s21_s17, 6   ;;  %s5735_s14 = smov %s3859_s16 }
 0x290   : > { %s5736_s15 = smov %s5739_s18  ;;  %s5737_s16 = smov %s5743_s19 }
 0x291   :  { %20 = sbr.rel (!%p18_p13) target bundleno = 3 (0x3), region = 113 }

</bundles_post_ra>
